<compile_context>
chip_gen: v7x
topology: tpu7x:2x2x1
jax: 0.10.0
libtpu: 0.0.40
codegen_flags: <defaults>
</compile_context>

<pallas_src>
import jax
import jax.numpy as jnp
from jax.experimental import pallas as pl
from jax.experimental.pallas import tpu as pltpu

_ONES_GEN = 30.0  # tanh(30.0) == 1.0 in f32: regenerates the ones column.


def diffeq_solver_kernel(ts_ref,    # SMEM (T,)        f32  time grid
                         y0_ref,    # VMEM (N, D+1)    f32  [first_point | 1]
                         w1_ref,    # VMEM (D+1, H+1)  bf16 [[w1,0],[b1,BIG]]
                         w2_ref,    # VMEM (H+1, D+1)  bf16 [[w2,0],[b2,0]]
                         out_ref):  # VMEM (N, T*D)    f32  full output block
    T = ts_ref.shape[0]
    N, d_aug = y0_ref.shape
    D = d_aug - 1

    # Load the (bias-augmented) weights once.
    w1 = w1_ref[...]                                     # bf16 (D+1, H+1)
    w2 = w2_ref[...]                                     # bf16 (H+1, D+1)

    # Two independent half-batch chains (when sublane-aligned) so the LLO
    # scheduler can overlap the MXU/EUP latency of one dot->tanh->dot chain
    # with the other; single chain otherwise.
    if N % 16 == 0:
        splits = ((0, N // 2), (N // 2, N))
    else:
        splits = ((0, N),)

    def ode_all(ys):
        # dy/dt = W2 @ tanh(W1 @ y + b1) + b2 with biases folded into the
        # augmented weights (the trailing ones column selects the bias row).
        # bf16 MXU matmuls, f32 accumulation; ops of the independent chains
        # are interleaved in trace order to keep both pipelines in flight.
        ps = [jnp.dot(y.astype(jnp.bfloat16), w1,
                      preferred_element_type=jnp.float32) for y in ys]
        hs = [jnp.tanh(p) for p in ps]   # last col: tanh(BIG) == 1.0
        return [jnp.dot(h.astype(jnp.bfloat16), w2,
                        preferred_element_type=jnp.float32) for h in hs]

    def rk4_all(ys, dt):
        # Classical RK4; the derivative's last column is exactly 0 (zero last
        # column of w2_aug), so the state's ones column stays exactly 1.
        k1 = ode_all(ys)
        k2 = ode_all([y + (0.5 * dt) * k for y, k in zip(ys, k1)])
        k3 = ode_all([y + (0.5 * dt) * k for y, k in zip(ys, k2)])
        k4 = ode_all([y + dt * k for y, k in zip(ys, k3)])
        return [y + (dt * (1.0 / 6.0)) * (a + 2.0 * b + 2.0 * c + d)
                for y, a, b, c, d in zip(ys, k1, k2, k3, k4)]

    def store(ys, t):
        # (N, T*D) layout: time step t occupies columns [t*D, (t+1)*D).
        for (lo, hi), y in zip(splits, ys):
            out_ref[lo:hi, t * D:(t + 1) * D] = y[:, :D]

    # Running (augmented) states stay in registers for the whole solve.
    ys = [y0_ref[lo:hi, :] for lo, hi in splits]
    store(ys, 0)

    # Fully unrolled RK4 over the static, small output time grid.
    for i in range(T - 1):
        dt = ts_ref[i + 1] - ts_ref[i]                   # scalar from SMEM
        ys = rk4_all(ys, dt)
        store(ys, i + 1)


def prepare_diffeq_params(w1, b1, w2, b2):
    """One-time (out of the hot path) bias folding + bf16 cast of the ODE net.

    w1_aug = [[w1, 0], [b1, BIG]]  so  [y, 1] @ w1_aug = [y@w1 + b1, BIG]
    w2_aug = [[w2, 0], [b2, 0]]    so  [h, 1] @ w2_aug = [h@w2 + b2, 0]
    tanh(BIG) == 1.0 regenerates the ones column between the two matmuls and
    the zero last column of w2_aug keeps the state's ones column invariant.
    """
    D, H = w1.shape
    w1_aug = jnp.zeros((D + 1, H + 1), jnp.float32)
    w1_aug = w1_aug.at[:D, :H].set(w1.astype(jnp.float32))
    w1_aug = w1_aug.at[D, :H].set(b1.astype(jnp.float32))
    w1_aug = w1_aug.at[D, H].set(_ONES_GEN)
    w2_aug = jnp.zeros((H + 1, D + 1), jnp.float32)
    w2_aug = w2_aug.at[:H, :D].set(w2.astype(jnp.float32))
    w2_aug = w2_aug.at[H, :D].set(b2.astype(jnp.float32))
    return w1_aug.astype(jnp.bfloat16), w2_aug.astype(jnp.bfloat16)


def diffeq_solver_forward(first_point, time_steps, w1_aug, w2_aug):
    """first_point: (S, B, D); time_steps: (T,). Returns (S, B, T, D)."""
    S, B, D = first_point.shape
    T = time_steps.shape[0]
    N = S * B

    y0 = first_point.reshape(N, D).astype(jnp.float32)
    y0_aug = jnp.concatenate([y0, jnp.ones((N, 1), jnp.float32)], axis=1)

    pred_flat = pl.pallas_call(
        diffeq_solver_kernel,
        out_shape=jax.ShapeDtypeStruct((N, T * D), jnp.float32),
        in_specs=[
            pl.BlockSpec(memory_space=pltpu.MemorySpace.SMEM),   # time grid
            pl.BlockSpec(memory_space=pltpu.MemorySpace.VMEM),   # y0 (augmented)
            pl.BlockSpec(memory_space=pltpu.MemorySpace.VMEM),   # w1_aug bf16
            pl.BlockSpec(memory_space=pltpu.MemorySpace.VMEM),   # w2_aug bf16
        ],
        out_specs=pl.BlockSpec(memory_space=pltpu.MemorySpace.VMEM),
    )(time_steps.astype(jnp.float32), y0_aug, w1_aug, w2_aug)

    # (N, T*D) row-major is exactly (S, B, T, D): free reshape, no transpose.
    return pred_flat.reshape(S, B, T, D)


def reference_forward(first_point, time_steps, w1, b1, w2, b2):
    """Pure-JAX f32 reference of the same fixed-grid RK4 odeint."""
    def f(y):
        return jnp.tanh(y @ w1 + b1) @ w2 + b2

    def step(y, dt):
        k1 = f(y)
        k2 = f(y + 0.5 * dt * k1)
        k3 = f(y + 0.5 * dt * k2)
        k4 = f(y + dt * k3)
        return y + (dt / 6.0) * (k1 + 2.0 * k2 + 2.0 * k3 + k4)

    ys = [first_point]
    y = first_point
    for i in range(time_steps.shape[0] - 1):
        y = step(y, time_steps[i + 1] - time_steps[i])
        ys.append(y)
    pred = jnp.stack(ys, axis=0)              # (T, S, B, D)
    return jnp.transpose(pred, (1, 2, 0, 3))  # (S, B, T, D)


if __name__ == "__main__":
    # Small shapes consistent with the module:
    #   n_traj_samples=2, n_traj=8, latents=32, ODE-net hidden=64, T=8 steps.
    S, B, D, H, T = 2, 8, 32, 64, 8

    key = jax.random.PRNGKey(0)
    k1, k2, k3, k4, k5 = jax.random.split(key, 5)

    first_point = jax.random.normal(k1, (S, B, D), dtype=jnp.float32)
    time_steps = jnp.linspace(0.0, 1.0, T, dtype=jnp.float32)

    # ODEFunc MLP parameters (Linear(D,H) - Tanh - Linear(H,D)).
    w1 = 0.1 * jax.random.normal(k2, (D, H), dtype=jnp.float32)
    b1 = 0.1 * jax.random.normal(k3, (H,), dtype=jnp.float32)
    w2 = 0.1 * jax.random.normal(k4, (H, D), dtype=jnp.float32)
    b2 = 0.1 * jax.random.normal(k5, (D,), dtype=jnp.float32)

    # One-time parameter prep, kept out of the per-call hot path.
    w1_aug, w2_aug = prepare_diffeq_params(w1, b1, w2, b2)

    fwd = jax.jit(diffeq_solver_forward)
    pred_y = jax.block_until_ready(fwd(first_point, time_steps, w1_aug, w2_aug))

    # Shape / initial-condition assertions mirroring the PyTorch forward,
    # plus a stricter max-abs check on the initial condition.
    assert pred_y.shape == (S, B, T, D)
    assert float(jnp.mean(pred_y[:, :, 0, :] - first_point)) < 0.001
    assert float(jnp.max(jnp.abs(pred_y[:, :, 0, :] - first_point))) < 1e-5

    # Numerical check against the pure-JAX f32 reference.  The kernel feeds
    # the MXU bf16 operands (weights + folded biases) with f32 accumulation
    # and f32 RK4 combination, so a bf16-level tolerance is used.
    ref = reference_forward(first_point, time_steps, w1, b1, w2, b2)
    assert jnp.allclose(pred_y, ref, atol=1e-2, rtol=1e-2), (
        float(jnp.max(jnp.abs(pred_y - ref))))

    print("KERNEL_OK")
</pallas_src>

<mosaic_0001>
module attributes {stable_mosaic.version = 11 : i64} {
  func.func @diffeq_solver_kernel(%arg0: memref<8xf32, #tpu.memory_space<smem>>, %arg1: memref<16x33xf32, #tpu.memory_space<vmem>>, %arg2: memref<33x65xbf16, #tpu.memory_space<vmem>>, %arg3: memref<65x33xbf16, #tpu.memory_space<vmem>>, %arg4: memref<16x256xf32, #tpu.memory_space<vmem>>) attributes {dimension_semantics = [], scalar_prefetch = 0 : i64, scratch_operands = 0 : i64, tpu.core_type = #tpu.core_type<tc>} {
    %c0 = arith.constant 0 : index
    %c0_0 = arith.constant 0 : index
    %0 = vector.load %arg2[%c0, %c0_0] : memref<33x65xbf16, #tpu.memory_space<vmem>>, vector<33x65xbf16>
    %c0_1 = arith.constant 0 : index
    %c0_2 = arith.constant 0 : index
    %1 = vector.load %arg3[%c0_1, %c0_2] : memref<65x33xbf16, #tpu.memory_space<vmem>>, vector<65x33xbf16>
    %c0_3 = arith.constant 0 : index
    %c0_4 = arith.constant 0 : index
    %2 = vector.load %arg1[%c0_3, %c0_4] : memref<16x33xf32, #tpu.memory_space<vmem>>, vector<8x33xf32>
    %c8 = arith.constant 8 : index
    %c0_5 = arith.constant 0 : index
    %3 = vector.load %arg1[%c8, %c0_5] : memref<16x33xf32, #tpu.memory_space<vmem>>, vector<8x33xf32>
    %4 = vector.extract_strided_slice %2 {offsets = [0, 0], sizes = [8, 32], strides = [1, 1]} : vector<8x33xf32> to vector<8x32xf32>
    %c0_6 = arith.constant 0 : index
    %c0_7 = arith.constant 0 : index
    %5 = vector.load %arg4[%c0_6, %c0_7] : memref<16x256xf32, #tpu.memory_space<vmem>>, vector<8x32xf32>
    tpu.vector_store %arg4[%c0_6, %c0_7], %4 {strides = array<i32>} : memref<16x256xf32, #tpu.memory_space<vmem>>, vector<8x32xf32>,
    %6 = vector.extract_strided_slice %3 {offsets = [0, 0], sizes = [8, 32], strides = [1, 1]} : vector<8x33xf32> to vector<8x32xf32>
    %c8_8 = arith.constant 8 : index
    %c0_9 = arith.constant 0 : index
    %7 = vector.load %arg4[%c8_8, %c0_9] : memref<16x256xf32, #tpu.memory_space<vmem>>, vector<8x32xf32>
    tpu.vector_store %arg4[%c8_8, %c0_9], %6 {strides = array<i32>} : memref<16x256xf32, #tpu.memory_space<vmem>>, vector<8x32xf32>,
    %c1 = arith.constant 1 : index
    %8 = memref.load %arg0[%c1] : memref<8xf32, #tpu.memory_space<smem>>
    %c0_10 = arith.constant 0 : index
    %9 = memref.load %arg0[%c0_10] : memref<8xf32, #tpu.memory_space<smem>>
    %10 = arith.subf %8, %9 : f32
    %11 = arith.truncf %2 : vector<8x33xf32> to vector<8x33xbf16>
    %cst = arith.constant dense<0.000000e+00> : vector<8x65xf32>
    %12 = tpu.matmul %11, %0, %cst {dimension_numbers = #tpu.dot_dimension_numbers<[1], [0], [0], [1], [0, 0, 1, 1], [], []>} : vector<8x33xbf16>, vector<33x65xbf16>, vector<8x65xf32> -> vector<8x65xf32>
    %13 = arith.truncf %3 : vector<8x33xf32> to vector<8x33xbf16>
    %cst_11 = arith.constant dense<0.000000e+00> : vector<8x65xf32>
    %14 = tpu.matmul %13, %0, %cst_11 {dimension_numbers = #tpu.dot_dimension_numbers<[1], [0], [0], [1], [0, 0, 1, 1], [], []>} : vector<8x33xbf16>, vector<33x65xbf16>, vector<8x65xf32> -> vector<8x65xf32>
    %15 = math.tanh %12 : vector<8x65xf32>
    %16 = math.tanh %14 : vector<8x65xf32>
    %17 = arith.truncf %15 : vector<8x65xf32> to vector<8x65xbf16>
    %cst_12 = arith.constant dense<0.000000e+00> : vector<8x33xf32>
    %18 = tpu.matmul %17, %1, %cst_12 {dimension_numbers = #tpu.dot_dimension_numbers<[1], [0], [0], [1], [0, 0, 1, 1], [], []>} : vector<8x65xbf16>, vector<65x33xbf16>, vector<8x33xf32> -> vector<8x33xf32>
    %19 = arith.truncf %16 : vector<8x65xf32> to vector<8x65xbf16>
    %cst_13 = arith.constant dense<0.000000e+00> : vector<8x33xf32>
    %20 = tpu.matmul %19, %1, %cst_13 {dimension_numbers = #tpu.dot_dimension_numbers<[1], [0], [0], [1], [0, 0, 1, 1], [], []>} : vector<8x65xbf16>, vector<65x33xbf16>, vector<8x33xf32> -> vector<8x33xf32>
    %cst_14 = arith.constant 5.000000e-01 : f32
    %21 = arith.mulf %cst_14, %10 : f32
    %22 = vector.broadcast %21 : f32 to vector<8x33xf32>
    %23 = arith.mulf %22, %18 : vector<8x33xf32>
    %24 = arith.addf %2, %23 : vector<8x33xf32>
    %cst_15 = arith.constant 5.000000e-01 : f32
    %25 = arith.mulf %cst_15, %10 : f32
    %26 = vector.broadcast %25 : f32 to vector<8x33xf32>
    %27 = arith.mulf %26, %20 : vector<8x33xf32>
    %28 = arith.addf %3, %27 : vector<8x33xf32>
    %29 = arith.truncf %24 : vector<8x33xf32> to vector<8x33xbf16>
    %cst_16 = arith.constant dense<0.000000e+00> : vector<8x65xf32>
    %30 = tpu.matmul %29, %0, %cst_16 {dimension_numbers = #tpu.dot_dimension_numbers<[1], [0], [0], [1], [0, 0, 1, 1], [], []>} : vector<8x33xbf16>, vector<33x65xbf16>, vector<8x65xf32> -> vector<8x65xf32>
    %31 = arith.truncf %28 : vector<8x33xf32> to vector<8x33xbf16>
    %cst_17 = arith.constant dense<0.000000e+00> : vector<8x65xf32>
    %32 = tpu.matmul %31, %0, %cst_17 {dimension_numbers = #tpu.dot_dimension_numbers<[1], [0], [0], [1], [0, 0, 1, 1], [], []>} : vector<8x33xbf16>, vector<33x65xbf16>, vector<8x65xf32> -> vector<8x65xf32>
    %33 = math.tanh %30 : vector<8x65xf32>
    %34 = math.tanh %32 : vector<8x65xf32>
    %35 = arith.truncf %33 : vector<8x65xf32> to vector<8x65xbf16>
    %cst_18 = arith.constant dense<0.000000e+00> : vector<8x33xf32>
    %36 = tpu.matmul %35, %1, %cst_18 {dimension_numbers = #tpu.dot_dimension_numbers<[1], [0], [0], [1], [0, 0, 1, 1], [], []>} : vector<8x65xbf16>, vector<65x33xbf16>, vector<8x33xf32> -> vector<8x33xf32>
    %37 = arith.truncf %34 : vector<8x65xf32> to vector<8x65xbf16>
    %cst_19 = arith.constant dense<0.000000e+00> : vector<8x33xf32>
    %38 = tpu.matmul %37, %1, %cst_19 {dimension_numbers = #tpu.dot_dimension_numbers<[1], [0], [0], [1], [0, 0, 1, 1], [], []>} : vector<8x65xbf16>, vector<65x33xbf16>, vector<8x33xf32> -> vector<8x33xf32>
    %cst_20 = arith.constant 5.000000e-01 : f32
    %39 = arith.mulf %cst_20, %10 : f32
    %40 = vector.broadcast %39 : f32 to vector<8x33xf32>
    %41 = arith.mulf %40, %36 : vector<8x33xf32>
    %42 = arith.addf %2, %41 : vector<8x33xf32>
    %cst_21 = arith.constant 5.000000e-01 : f32
    %43 = arith.mulf %cst_21, %10 : f32
    %44 = vector.broadcast %43 : f32 to vector<8x33xf32>
    %45 = arith.mulf %44, %38 : vector<8x33xf32>
    %46 = arith.addf %3, %45 : vector<8x33xf32>
    %47 = arith.truncf %42 : vector<8x33xf32> to vector<8x33xbf16>
    %cst_22 = arith.constant dense<0.000000e+00> : vector<8x65xf32>
    %48 = tpu.matmul %47, %0, %cst_22 {dimension_numbers = #tpu.dot_dimension_numbers<[1], [0], [0], [1], [0, 0, 1, 1], [], []>} : vector<8x33xbf16>, vector<33x65xbf16>, vector<8x65xf32> -> vector<8x65xf32>
    %49 = arith.truncf %46 : vector<8x33xf32> to vector<8x33xbf16>
    %cst_23 = arith.constant dense<0.000000e+00> : vector<8x65xf32>
    %50 = tpu.matmul %49, %0, %cst_23 {dimension_numbers = #tpu.dot_dimension_numbers<[1], [0], [0], [1], [0, 0, 1, 1], [], []>} : vector<8x33xbf16>, vector<33x65xbf16>, vector<8x65xf32> -> vector<8x65xf32>
    %51 = math.tanh %48 : vector<8x65xf32>
    %52 = math.tanh %50 : vector<8x65xf32>
    %53 = arith.truncf %51 : vector<8x65xf32> to vector<8x65xbf16>
    %cst_24 = arith.constant dense<0.000000e+00> : vector<8x33xf32>
    %54 = tpu.matmul %53, %1, %cst_24 {dimension_numbers = #tpu.dot_dimension_numbers<[1], [0], [0], [1], [0, 0, 1, 1], [], []>} : vector<8x65xbf16>, vector<65x33xbf16>, vector<8x33xf32> -> vector<8x33xf32>
    %55 = arith.truncf %52 : vector<8x65xf32> to vector<8x65xbf16>
    %cst_25 = arith.constant dense<0.000000e+00> : vector<8x33xf32>
    %56 = tpu.matmul %55, %1, %cst_25 {dimension_numbers = #tpu.dot_dimension_numbers<[1], [0], [0], [1], [0, 0, 1, 1], [], []>} : vector<8x65xbf16>, vector<65x33xbf16>, vector<8x33xf32> -> vector<8x33xf32>
    %57 = vector.broadcast %10 : f32 to vector<8x33xf32>
    %58 = arith.mulf %57, %54 : vector<8x33xf32>
    %59 = arith.addf %2, %58 : vector<8x33xf32>
    %60 = vector.broadcast %10 : f32 to vector<8x33xf32>
    %61 = arith.mulf %60, %56 : vector<8x33xf32>
    %62 = arith.addf %3, %61 : vector<8x33xf32>
    %63 = arith.truncf %59 : vector<8x33xf32> to vector<8x33xbf16>
    %cst_26 = arith.constant dense<0.000000e+00> : vector<8x65xf32>
    %64 = tpu.matmul %63, %0, %cst_26 {dimension_numbers = #tpu.dot_dimension_numbers<[1], [0], [0], [1], [0, 0, 1, 1], [], []>} : vector<8x33xbf16>, vector<33x65xbf16>, vector<8x65xf32> -> vector<8x65xf32>
    %65 = arith.truncf %62 : vector<8x33xf32> to vector<8x33xbf16>
    %cst_27 = arith.constant dense<0.000000e+00> : vector<8x65xf32>
    %66 = tpu.matmul %65, %0, %cst_27 {dimension_numbers = #tpu.dot_dimension_numbers<[1], [0], [0], [1], [0, 0, 1, 1], [], []>} : vector<8x33xbf16>, vector<33x65xbf16>, vector<8x65xf32> -> vector<8x65xf32>
    %67 = math.tanh %64 : vector<8x65xf32>
    %68 = math.tanh %66 : vector<8x65xf32>
    %69 = arith.truncf %67 : vector<8x65xf32> to vector<8x65xbf16>
    %cst_28 = arith.constant dense<0.000000e+00> : vector<8x33xf32>
    %70 = tpu.matmul %69, %1, %cst_28 {dimension_numbers = #tpu.dot_dimension_numbers<[1], [0], [0], [1], [0, 0, 1, 1], [], []>} : vector<8x65xbf16>, vector<65x33xbf16>, vector<8x33xf32> -> vector<8x33xf32>
    %71 = arith.truncf %68 : vector<8x65xf32> to vector<8x65xbf16>
    %cst_29 = arith.constant dense<0.000000e+00> : vector<8x33xf32>
    %72 = tpu.matmul %71, %1, %cst_29 {dimension_numbers = #tpu.dot_dimension_numbers<[1], [0], [0], [1], [0, 0, 1, 1], [], []>} : vector<8x65xbf16>, vector<65x33xbf16>, vector<8x33xf32> -> vector<8x33xf32>
    %cst_30 = arith.constant 0.166666672 : f32
    %73 = arith.mulf %10, %cst_30 : f32
    %cst_31 = arith.constant 2.000000e+00 : f32
    %74 = vector.broadcast %cst_31 : f32 to vector<8x33xf32>
    %75 = arith.mulf %74, %36 : vector<8x33xf32>
    %76 = arith.addf %18, %75 : vector<8x33xf32>
    %cst_32 = arith.constant 2.000000e+00 : f32
    %77 = vector.broadcast %cst_32 : f32 to vector<8x33xf32>
    %78 = arith.mulf %77, %54 : vector<8x33xf32>
    %79 = arith.addf %76, %78 : vector<8x33xf32>
    %80 = arith.addf %79, %70 : vector<8x33xf32>
    %81 = vector.broadcast %73 : f32 to vector<8x33xf32>
    %82 = arith.mulf %81, %80 : vector<8x33xf32>
    %83 = arith.addf %2, %82 : vector<8x33xf32>
    %cst_33 = arith.constant 0.166666672 : f32
    %84 = arith.mulf %10, %cst_33 : f32
    %cst_34 = arith.constant 2.000000e+00 : f32
    %85 = vector.broadcast %cst_34 : f32 to vector<8x33xf32>
    %86 = arith.mulf %85, %38 : vector<8x33xf32>
    %87 = arith.addf %20, %86 : vector<8x33xf32>
    %cst_35 = arith.constant 2.000000e+00 : f32
    %88 = vector.broadcast %cst_35 : f32 to vector<8x33xf32>
    %89 = arith.mulf %88, %56 : vector<8x33xf32>
    %90 = arith.addf %87, %89 : vector<8x33xf32>
    %91 = arith.addf %90, %72 : vector<8x33xf32>
    %92 = vector.broadcast %84 : f32 to vector<8x33xf32>
    %93 = arith.mulf %92, %91 : vector<8x33xf32>
    %94 = arith.addf %3, %93 : vector<8x33xf32>
    %95 = vector.extract_strided_slice %83 {offsets = [0, 0], sizes = [8, 32], strides = [1, 1]} : vector<8x33xf32> to vector<8x32xf32>
    %c0_36 = arith.constant 0 : index
    %c32 = arith.constant 32 : index
    %96 = vector.load %arg4[%c0_36, %c32] : memref<16x256xf32, #tpu.memory_space<vmem>>, vector<8x32xf32>
    tpu.vector_store %arg4[%c0_36, %c32], %95 {strides = array<i32>} : memref<16x256xf32, #tpu.memory_space<vmem>>, vector<8x32xf32>,
    %97 = vector.extract_strided_slice %94 {offsets = [0, 0], sizes = [8, 32], strides = [1, 1]} : vector<8x33xf32> to vector<8x32xf32>
    %c8_37 = arith.constant 8 : index
    %c32_38 = arith.constant 32 : index
    %98 = vector.load %arg4[%c8_37, %c32_38] : memref<16x256xf32, #tpu.memory_space<vmem>>, vector<8x32xf32>
    tpu.vector_store %arg4[%c8_37, %c32_38], %97 {strides = array<i32>} : memref<16x256xf32, #tpu.memory_space<vmem>>, vector<8x32xf32>,
    %c2 = arith.constant 2 : index
    %99 = memref.load %arg0[%c2] : memref<8xf32, #tpu.memory_space<smem>>
    %c1_39 = arith.constant 1 : index
    %100 = memref.load %arg0[%c1_39] : memref<8xf32, #tpu.memory_space<smem>>
    %101 = arith.subf %99, %100 : f32
    %102 = arith.truncf %83 : vector<8x33xf32> to vector<8x33xbf16>
    %cst_40 = arith.constant dense<0.000000e+00> : vector<8x65xf32>
    %103 = tpu.matmul %102, %0, %cst_40 {dimension_numbers = #tpu.dot_dimension_numbers<[1], [0], [0], [1], [0, 0, 1, 1], [], []>} : vector<8x33xbf16>, vector<33x65xbf16>, vector<8x65xf32> -> vector<8x65xf32>
    %104 = arith.truncf %94 : vector<8x33xf32> to vector<8x33xbf16>
    %cst_41 = arith.constant dense<0.000000e+00> : vector<8x65xf32>
    %105 = tpu.matmul %104, %0, %cst_41 {dimension_numbers = #tpu.dot_dimension_numbers<[1], [0], [0], [1], [0, 0, 1, 1], [], []>} : vector<8x33xbf16>, vector<33x65xbf16>, vector<8x65xf32> -> vector<8x65xf32>
    %106 = math.tanh %103 : vector<8x65xf32>
    %107 = math.tanh %105 : vector<8x65xf32>
    %108 = arith.truncf %106 : vector<8x65xf32> to vector<8x65xbf16>
    %cst_42 = arith.constant dense<0.000000e+00> : vector<8x33xf32>
    %109 = tpu.matmul %108, %1, %cst_42 {dimension_numbers = #tpu.dot_dimension_numbers<[1], [0], [0], [1], [0, 0, 1, 1], [], []>} : vector<8x65xbf16>, vector<65x33xbf16>, vector<8x33xf32> -> vector<8x33xf32>
    %110 = arith.truncf %107 : vector<8x65xf32> to vector<8x65xbf16>
    %cst_43 = arith.constant dense<0.000000e+00> : vector<8x33xf32>
    %111 = tpu.matmul %110, %1, %cst_43 {dimension_numbers = #tpu.dot_dimension_numbers<[1], [0], [0], [1], [0, 0, 1, 1], [], []>} : vector<8x65xbf16>, vector<65x33xbf16>, vector<8x33xf32> -> vector<8x33xf32>
    %cst_44 = arith.constant 5.000000e-01 : f32
    %112 = arith.mulf %cst_44, %101 : f32
    %113 = vector.broadcast %112 : f32 to vector<8x33xf32>
    %114 = arith.mulf %113, %109 : vector<8x33xf32>
    %115 = arith.addf %83, %114 : vector<8x33xf32>
    %cst_45 = arith.constant 5.000000e-01 : f32
    %116 = arith.mulf %cst_45, %101 : f32
    %117 = vector.broadcast %116 : f32 to vector<8x33xf32>
    %118 = arith.mulf %117, %111 : vector<8x33xf32>
    %119 = arith.addf %94, %118 : vector<8x33xf32>
    %120 = arith.truncf %115 : vector<8x33xf32> to vector<8x33xbf16>
    %cst_46 = arith.constant dense<0.000000e+00> : vector<8x65xf32>
    %121 = tpu.matmul %120, %0, %cst_46 {dimension_numbers = #tpu.dot_dimension_numbers<[1], [0], [0], [1], [0, 0, 1, 1], [], []>} : vector<8x33xbf16>, vector<33x65xbf16>, vector<8x65xf32> -> vector<8x65xf32>
    %122 = arith.truncf %119 : vector<8x33xf32> to vector<8x33xbf16>
    %cst_47 = arith.constant dense<0.000000e+00> : vector<8x65xf32>
    %123 = tpu.matmul %122, %0, %cst_47 {dimension_numbers = #tpu.dot_dimension_numbers<[1], [0], [0], [1], [0, 0, 1, 1], [], []>} : vector<8x33xbf16>, vector<33x65xbf16>, vector<8x65xf32> -> vector<8x65xf32>
    %124 = math.tanh %121 : vector<8x65xf32>
    %125 = math.tanh %123 : vector<8x65xf32>
    %126 = arith.truncf %124 : vector<8x65xf32> to vector<8x65xbf16>
    %cst_48 = arith.constant dense<0.000000e+00> : vector<8x33xf32>
    %127 = tpu.matmul %126, %1, %cst_48 {dimension_numbers = #tpu.dot_dimension_numbers<[1], [0], [0], [1], [0, 0, 1, 1], [], []>} : vector<8x65xbf16>, vector<65x33xbf16>, vector<8x33xf32> -> vector<8x33xf32>
    %128 = arith.truncf %125 : vector<8x65xf32> to vector<8x65xbf16>
    %cst_49 = arith.constant dense<0.000000e+00> : vector<8x33xf32>
    %129 = tpu.matmul %128, %1, %cst_49 {dimension_numbers = #tpu.dot_dimension_numbers<[1], [0], [0], [1], [0, 0, 1, 1], [], []>} : vector<8x65xbf16>, vector<65x33xbf16>, vector<8x33xf32> -> vector<8x33xf32>
    %cst_50 = arith.constant 5.000000e-01 : f32
    %130 = arith.mulf %cst_50, %101 : f32
    %131 = vector.broadcast %130 : f32 to vector<8x33xf32>
    %132 = arith.mulf %131, %127 : vector<8x33xf32>
    %133 = arith.addf %83, %132 : vector<8x33xf32>
    %cst_51 = arith.constant 5.000000e-01 : f32
    %134 = arith.mulf %cst_51, %101 : f32
    %135 = vector.broadcast %134 : f32 to vector<8x33xf32>
    %136 = arith.mulf %135, %129 : vector<8x33xf32>
    %137 = arith.addf %94, %136 : vector<8x33xf32>
    %138 = arith.truncf %133 : vector<8x33xf32> to vector<8x33xbf16>
    %cst_52 = arith.constant dense<0.000000e+00> : vector<8x65xf32>
    %139 = tpu.matmul %138, %0, %cst_52 {dimension_numbers = #tpu.dot_dimension_numbers<[1], [0], [0], [1], [0, 0, 1, 1], [], []>} : vector<8x33xbf16>, vector<33x65xbf16>, vector<8x65xf32> -> vector<8x65xf32>
    %140 = arith.truncf %137 : vector<8x33xf32> to vector<8x33xbf16>
    %cst_53 = arith.constant dense<0.000000e+00> : vector<8x65xf32>
    %141 = tpu.matmul %140, %0, %cst_53 {dimension_numbers = #tpu.dot_dimension_numbers<[1], [0], [0], [1], [0, 0, 1, 1], [], []>} : vector<8x33xbf16>, vector<33x65xbf16>, vector<8x65xf32> -> vector<8x65xf32>
    %142 = math.tanh %139 : vector<8x65xf32>
    %143 = math.tanh %141 : vector<8x65xf32>
    %144 = arith.truncf %142 : vector<8x65xf32> to vector<8x65xbf16>
    %cst_54 = arith.constant dense<0.000000e+00> : vector<8x33xf32>
    %145 = tpu.matmul %144, %1, %cst_54 {dimension_numbers = #tpu.dot_dimension_numbers<[1], [0], [0], [1], [0, 0, 1, 1], [], []>} : vector<8x65xbf16>, vector<65x33xbf16>, vector<8x33xf32> -> vector<8x33xf32>
    %146 = arith.truncf %143 : vector<8x65xf32> to vector<8x65xbf16>
    %cst_55 = arith.constant dense<0.000000e+00> : vector<8x33xf32>
    %147 = tpu.matmul %146, %1, %cst_55 {dimension_numbers = #tpu.dot_dimension_numbers<[1], [0], [0], [1], [0, 0, 1, 1], [], []>} : vector<8x65xbf16>, vector<65x33xbf16>, vector<8x33xf32> -> vector<8x33xf32>
    %148 = vector.broadcast %101 : f32 to vector<8x33xf32>
    %149 = arith.mulf %148, %145 : vector<8x33xf32>
    %150 = arith.addf %83, %149 : vector<8x33xf32>
    %151 = vector.broadcast %101 : f32 to vector<8x33xf32>
    %152 = arith.mulf %151, %147 : vector<8x33xf32>
    %153 = arith.addf %94, %152 : vector<8x33xf32>
    %154 = arith.truncf %150 : vector<8x33xf32> to vector<8x33xbf16>
    %cst_56 = arith.constant dense<0.000000e+00> : vector<8x65xf32>
    %155 = tpu.matmul %154, %0, %cst_56 {dimension_numbers = #tpu.dot_dimension_numbers<[1], [0], [0], [1], [0, 0, 1, 1], [], []>} : vector<8x33xbf16>, vector<33x65xbf16>, vector<8x65xf32> -> vector<8x65xf32>
    %156 = arith.truncf %153 : vector<8x33xf32> to vector<8x33xbf16>
    %cst_57 = arith.constant dense<0.000000e+00> : vector<8x65xf32>
    %157 = tpu.matmul %156, %0, %cst_57 {dimension_numbers = #tpu.dot_dimension_numbers<[1], [0], [0], [1], [0, 0, 1, 1], [], []>} : vector<8x33xbf16>, vector<33x65xbf16>, vector<8x65xf32> -> vector<8x65xf32>
    %158 = math.tanh %155 : vector<8x65xf32>
    %159 = math.tanh %157 : vector<8x65xf32>
    %160 = arith.truncf %158 : vector<8x65xf32> to vector<8x65xbf16>
    %cst_58 = arith.constant dense<0.000000e+00> : vector<8x33xf32>
    %161 = tpu.matmul %160, %1, %cst_58 {dimension_numbers = #tpu.dot_dimension_numbers<[1], [0], [0], [1], [0, 0, 1, 1], [], []>} : vector<8x65xbf16>, vector<65x33xbf16>, vector<8x33xf32> -> vector<8x33xf32>
    %162 = arith.truncf %159 : vector<8x65xf32> to vector<8x65xbf16>
    %cst_59 = arith.constant dense<0.000000e+00> : vector<8x33xf32>
    %163 = tpu.matmul %162, %1, %cst_59 {dimension_numbers = #tpu.dot_dimension_numbers<[1], [0], [0], [1], [0, 0, 1, 1], [], []>} : vector<8x65xbf16>, vector<65x33xbf16>, vector<8x33xf32> -> vector<8x33xf32>
    %cst_60 = arith.constant 0.166666672 : f32
    %164 = arith.mulf %101, %cst_60 : f32
    %cst_61 = arith.constant 2.000000e+00 : f32
    %165 = vector.broadcast %cst_61 : f32 to vector<8x33xf32>
    %166 = arith.mulf %165, %127 : vector<8x33xf32>
    %167 = arith.addf %109, %166 : vector<8x33xf32>
    %cst_62 = arith.constant 2.000000e+00 : f32
    %168 = vector.broadcast %cst_62 : f32 to vector<8x33xf32>
    %169 = arith.mulf %168, %145 : vector<8x33xf32>
    %170 = arith.addf %167, %169 : vector<8x33xf32>
    %171 = arith.addf %170, %161 : vector<8x33xf32>
    %172 = vector.broadcast %164 : f32 to vector<8x33xf32>
    %173 = arith.mulf %172, %171 : vector<8x33xf32>
    %174 = arith.addf %83, %173 : vector<8x33xf32>
    %cst_63 = arith.constant 0.166666672 : f32
    %175 = arith.mulf %101, %cst_63 : f32
    %cst_64 = arith.constant 2.000000e+00 : f32
    %176 = vector.broadcast %cst_64 : f32 to vector<8x33xf32>
    %177 = arith.mulf %176, %129 : vector<8x33xf32>
    %178 = arith.addf %111, %177 : vector<8x33xf32>
    %cst_65 = arith.constant 2.000000e+00 : f32
    %179 = vector.broadcast %cst_65 : f32 to vector<8x33xf32>
    %180 = arith.mulf %179, %147 : vector<8x33xf32>
    %181 = arith.addf %178, %180 : vector<8x33xf32>
    %182 = arith.addf %181, %163 : vector<8x33xf32>
    %183 = vector.broadcast %175 : f32 to vector<8x33xf32>
    %184 = arith.mulf %183, %182 : vector<8x33xf32>
    %185 = arith.addf %94, %184 : vector<8x33xf32>
    %186 = vector.extract_strided_slice %174 {offsets = [0, 0], sizes = [8, 32], strides = [1, 1]} : vector<8x33xf32> to vector<8x32xf32>
    %c0_66 = arith.constant 0 : index
    %c64 = arith.constant 64 : index
    %187 = vector.load %arg4[%c0_66, %c64] : memref<16x256xf32, #tpu.memory_space<vmem>>, vector<8x32xf32>
    tpu.vector_store %arg4[%c0_66, %c64], %186 {strides = array<i32>} : memref<16x256xf32, #tpu.memory_space<vmem>>, vector<8x32xf32>,
    %188 = vector.extract_strided_slice %185 {offsets = [0, 0], sizes = [8, 32], strides = [1, 1]} : vector<8x33xf32> to vector<8x32xf32>
    %c8_67 = arith.constant 8 : index
    %c64_68 = arith.constant 64 : index
    %189 = vector.load %arg4[%c8_67, %c64_68] : memref<16x256xf32, #tpu.memory_space<vmem>>, vector<8x32xf32>
    tpu.vector_store %arg4[%c8_67, %c64_68], %188 {strides = array<i32>} : memref<16x256xf32, #tpu.memory_space<vmem>>, vector<8x32xf32>,
    %c3 = arith.constant 3 : index
    %190 = memref.load %arg0[%c3] : memref<8xf32, #tpu.memory_space<smem>>
    %c2_69 = arith.constant 2 : index
    %191 = memref.load %arg0[%c2_69] : memref<8xf32, #tpu.memory_space<smem>>
    %192 = arith.subf %190, %191 : f32
    %193 = arith.truncf %174 : vector<8x33xf32> to vector<8x33xbf16>
    %cst_70 = arith.constant dense<0.000000e+00> : vector<8x65xf32>
    %194 = tpu.matmul %193, %0, %cst_70 {dimension_numbers = #tpu.dot_dimension_numbers<[1], [0], [0], [1], [0, 0, 1, 1], [], []>} : vector<8x33xbf16>, vector<33x65xbf16>, vector<8x65xf32> -> vector<8x65xf32>
    %195 = arith.truncf %185 : vector<8x33xf32> to vector<8x33xbf16>
    %cst_71 = arith.constant dense<0.000000e+00> : vector<8x65xf32>
    %196 = tpu.matmul %195, %0, %cst_71 {dimension_numbers = #tpu.dot_dimension_numbers<[1], [0], [0], [1], [0, 0, 1, 1], [], []>} : vector<8x33xbf16>, vector<33x65xbf16>, vector<8x65xf32> -> vector<8x65xf32>
    %197 = math.tanh %194 : vector<8x65xf32>
    %198 = math.tanh %196 : vector<8x65xf32>
    %199 = arith.truncf %197 : vector<8x65xf32> to vector<8x65xbf16>
    %cst_72 = arith.constant dense<0.000000e+00> : vector<8x33xf32>
    %200 = tpu.matmul %199, %1, %cst_72 {dimension_numbers = #tpu.dot_dimension_numbers<[1], [0], [0], [1], [0, 0, 1, 1], [], []>} : vector<8x65xbf16>, vector<65x33xbf16>, vector<8x33xf32> -> vector<8x33xf32>
    %201 = arith.truncf %198 : vector<8x65xf32> to vector<8x65xbf16>
    %cst_73 = arith.constant dense<0.000000e+00> : vector<8x33xf32>
    %202 = tpu.matmul %201, %1, %cst_73 {dimension_numbers = #tpu.dot_dimension_numbers<[1], [0], [0], [1], [0, 0, 1, 1], [], []>} : vector<8x65xbf16>, vector<65x33xbf16>, vector<8x33xf32> -> vector<8x33xf32>
    %cst_74 = arith.constant 5.000000e-01 : f32
    %203 = arith.mulf %cst_74, %192 : f32
    %204 = vector.broadcast %203 : f32 to vector<8x33xf32>
    %205 = arith.mulf %204, %200 : vector<8x33xf32>
    %206 = arith.addf %174, %205 : vector<8x33xf32>
    %cst_75 = arith.constant 5.000000e-01 : f32
    %207 = arith.mulf %cst_75, %192 : f32
    %208 = vector.broadcast %207 : f32 to vector<8x33xf32>
    %209 = arith.mulf %208, %202 : vector<8x33xf32>
    %210 = arith.addf %185, %209 : vector<8x33xf32>
    %211 = arith.truncf %206 : vector<8x33xf32> to vector<8x33xbf16>
    %cst_76 = arith.constant dense<0.000000e+00> : vector<8x65xf32>
    %212 = tpu.matmul %211, %0, %cst_76 {dimension_numbers = #tpu.dot_dimension_numbers<[1], [0], [0], [1], [0, 0, 1, 1], [], []>} : vector<8x33xbf16>, vector<33x65xbf16>, vector<8x65xf32> -> vector<8x65xf32>
    %213 = arith.truncf %210 : vector<8x33xf32> to vector<8x33xbf16>
    %cst_77 = arith.constant dense<0.000000e+00> : vector<8x65xf32>
    %214 = tpu.matmul %213, %0, %cst_77 {dimension_numbers = #tpu.dot_dimension_numbers<[1], [0], [0], [1], [0, 0, 1, 1], [], []>} : vector<8x33xbf16>, vector<33x65xbf16>, vector<8x65xf32> -> vector<8x65xf32>
    %215 = math.tanh %212 : vector<8x65xf32>
    %216 = math.tanh %214 : vector<8x65xf32>
    %217 = arith.truncf %215 : vector<8x65xf32> to vector<8x65xbf16>
    %cst_78 = arith.constant dense<0.000000e+00> : vector<8x33xf32>
    %218 = tpu.matmul %217, %1, %cst_78 {dimension_numbers = #tpu.dot_dimension_numbers<[1], [0], [0], [1], [0, 0, 1, 1], [], []>} : vector<8x65xbf16>, vector<65x33xbf16>, vector<8x33xf32> -> vector<8x33xf32>
    %219 = arith.truncf %216 : vector<8x65xf32> to vector<8x65xbf16>
    %cst_79 = arith.constant dense<0.000000e+00> : vector<8x33xf32>
    %220 = tpu.matmul %219, %1, %cst_79 {dimension_numbers = #tpu.dot_dimension_numbers<[1], [0], [0], [1], [0, 0, 1, 1], [], []>} : vector<8x65xbf16>, vector<65x33xbf16>, vector<8x33xf32> -> vector<8x33xf32>
    %cst_80 = arith.constant 5.000000e-01 : f32
    %221 = arith.mulf %cst_80, %192 : f32
    %222 = vector.broadcast %221 : f32 to vector<8x33xf32>
    %223 = arith.mulf %222, %218 : vector<8x33xf32>
    %224 = arith.addf %174, %223 : vector<8x33xf32>
    %cst_81 = arith.constant 5.000000e-01 : f32
    %225 = arith.mulf %cst_81, %192 : f32
    %226 = vector.broadcast %225 : f32 to vector<8x33xf32>
    %227 = arith.mulf %226, %220 : vector<8x33xf32>
    %228 = arith.addf %185, %227 : vector<8x33xf32>
    %229 = arith.truncf %224 : vector<8x33xf32> to vector<8x33xbf16>
    %cst_82 = arith.constant dense<0.000000e+00> : vector<8x65xf32>
    %230 = tpu.matmul %229, %0, %cst_82 {dimension_numbers = #tpu.dot_dimension_numbers<[1], [0], [0], [1], [0, 0, 1, 1], [], []>} : vector<8x33xbf16>, vector<33x65xbf16>, vector<8x65xf32> -> vector<8x65xf32>
    %231 = arith.truncf %228 : vector<8x33xf32> to vector<8x33xbf16>
    %cst_83 = arith.constant dense<0.000000e+00> : vector<8x65xf32>
    %232 = tpu.matmul %231, %0, %cst_83 {dimension_numbers = #tpu.dot_dimension_numbers<[1], [0], [0], [1], [0, 0, 1, 1], [], []>} : vector<8x33xbf16>, vector<33x65xbf16>, vector<8x65xf32> -> vector<8x65xf32>
    %233 = math.tanh %230 : vector<8x65xf32>
    %234 = math.tanh %232 : vector<8x65xf32>
    %235 = arith.truncf %233 : vector<8x65xf32> to vector<8x65xbf16>
    %cst_84 = arith.constant dense<0.000000e+00> : vector<8x33xf32>
    %236 = tpu.matmul %235, %1, %cst_84 {dimension_numbers = #tpu.dot_dimension_numbers<[1], [0], [0], [1], [0, 0, 1, 1], [], []>} : vector<8x65xbf16>, vector<65x33xbf16>, vector<8x33xf32> -> vector<8x33xf32>
    %237 = arith.truncf %234 : vector<8x65xf32> to vector<8x65xbf16>
    %cst_85 = arith.constant dense<0.000000e+00> : vector<8x33xf32>
    %238 = tpu.matmul %237, %1, %cst_85 {dimension_numbers = #tpu.dot_dimension_numbers<[1], [0], [0], [1], [0, 0, 1, 1], [], []>} : vector<8x65xbf16>, vector<65x33xbf16>, vector<8x33xf32> -> vector<8x33xf32>
    %239 = vector.broadcast %192 : f32 to vector<8x33xf32>
    %240 = arith.mulf %239, %236 : vector<8x33xf32>
    %241 = arith.addf %174, %240 : vector<8x33xf32>
    %242 = vector.broadcast %192 : f32 to vector<8x33xf32>
    %243 = arith.mulf %242, %238 : vector<8x33xf32>
    %244 = arith.addf %185, %243 : vector<8x33xf32>
    %245 = arith.truncf %241 : vector<8x33xf32> to vector<8x33xbf16>
    %cst_86 = arith.constant dense<0.000000e+00> : vector<8x65xf32>
    %246 = tpu.matmul %245, %0, %cst_86 {dimension_numbers = #tpu.dot_dimension_numbers<[1], [0], [0], [1], [0, 0, 1, 1], [], []>} : vector<8x33xbf16>, vector<33x65xbf16>, vector<8x65xf32> -> vector<8x65xf32>
    %247 = arith.truncf %244 : vector<8x33xf32> to vector<8x33xbf16>
    %cst_87 = arith.constant dense<0.000000e+00> : vector<8x65xf32>
    %248 = tpu.matmul %247, %0, %cst_87 {dimension_numbers = #tpu.dot_dimension_numbers<[1], [0], [0], [1], [0, 0, 1, 1], [], []>} : vector<8x33xbf16>, vector<33x65xbf16>, vector<8x65xf32> -> vector<8x65xf32>
    %249 = math.tanh %246 : vector<8x65xf32>
    %250 = math.tanh %248 : vector<8x65xf32>
    %251 = arith.truncf %249 : vector<8x65xf32> to vector<8x65xbf16>
    %cst_88 = arith.constant dense<0.000000e+00> : vector<8x33xf32>
    %252 = tpu.matmul %251, %1, %cst_88 {dimension_numbers = #tpu.dot_dimension_numbers<[1], [0], [0], [1], [0, 0, 1, 1], [], []>} : vector<8x65xbf16>, vector<65x33xbf16>, vector<8x33xf32> -> vector<8x33xf32>
    %253 = arith.truncf %250 : vector<8x65xf32> to vector<8x65xbf16>
    %cst_89 = arith.constant dense<0.000000e+00> : vector<8x33xf32>
    %254 = tpu.matmul %253, %1, %cst_89 {dimension_numbers = #tpu.dot_dimension_numbers<[1], [0], [0], [1], [0, 0, 1, 1], [], []>} : vector<8x65xbf16>, vector<65x33xbf16>, vector<8x33xf32> -> vector<8x33xf32>
    %cst_90 = arith.constant 0.166666672 : f32
    %255 = arith.mulf %192, %cst_90 : f32
    %cst_91 = arith.constant 2.000000e+00 : f32
    %256 = vector.broadcast %cst_91 : f32 to vector<8x33xf32>
    %257 = arith.mulf %256, %218 : vector<8x33xf32>
    %258 = arith.addf %200, %257 : vector<8x33xf32>
    %cst_92 = arith.constant 2.000000e+00 : f32
    %259 = vector.broadcast %cst_92 : f32 to vector<8x33xf32>
    %260 = arith.mulf %259, %236 : vector<8x33xf32>
    %261 = arith.addf %258, %260 : vector<8x33xf32>
    %262 = arith.addf %261, %252 : vector<8x33xf32>
    %263 = vector.broadcast %255 : f32 to vector<8x33xf32>
    %264 = arith.mulf %263, %262 : vector<8x33xf32>
    %265 = arith.addf %174, %264 : vector<8x33xf32>
    %cst_93 = arith.constant 0.166666672 : f32
    %266 = arith.mulf %192, %cst_93 : f32
    %cst_94 = arith.constant 2.000000e+00 : f32
    %267 = vector.broadcast %cst_94 : f32 to vector<8x33xf32>
    %268 = arith.mulf %267, %220 : vector<8x33xf32>
    %269 = arith.addf %202, %268 : vector<8x33xf32>
    %cst_95 = arith.constant 2.000000e+00 : f32
    %270 = vector.broadcast %cst_95 : f32 to vector<8x33xf32>
    %271 = arith.mulf %270, %238 : vector<8x33xf32>
    %272 = arith.addf %269, %271 : vector<8x33xf32>
    %273 = arith.addf %272, %254 : vector<8x33xf32>
    %274 = vector.broadcast %266 : f32 to vector<8x33xf32>
    %275 = arith.mulf %274, %273 : vector<8x33xf32>
    %276 = arith.addf %185, %275 : vector<8x33xf32>
    %277 = vector.extract_strided_slice %265 {offsets = [0, 0], sizes = [8, 32], strides = [1, 1]} : vector<8x33xf32> to vector<8x32xf32>
    %c0_96 = arith.constant 0 : index
    %c96 = arith.constant 96 : index
    %278 = vector.load %arg4[%c0_96, %c96] : memref<16x256xf32, #tpu.memory_space<vmem>>, vector<8x32xf32>
    tpu.vector_store %arg4[%c0_96, %c96], %277 {strides = array<i32>} : memref<16x256xf32, #tpu.memory_space<vmem>>, vector<8x32xf32>,
    %279 = vector.extract_strided_slice %276 {offsets = [0, 0], sizes = [8, 32], strides = [1, 1]} : vector<8x33xf32> to vector<8x32xf32>
    %c8_97 = arith.constant 8 : index
    %c96_98 = arith.constant 96 : index
    %280 = vector.load %arg4[%c8_97, %c96_98] : memref<16x256xf32, #tpu.memory_space<vmem>>, vector<8x32xf32>
    tpu.vector_store %arg4[%c8_97, %c96_98], %279 {strides = array<i32>} : memref<16x256xf32, #tpu.memory_space<vmem>>, vector<8x32xf32>,
    %c4 = arith.constant 4 : index
    %281 = memref.load %arg0[%c4] : memref<8xf32, #tpu.memory_space<smem>>
    %c3_99 = arith.constant 3 : index
    %282 = memref.load %arg0[%c3_99] : memref<8xf32, #tpu.memory_space<smem>>
    %283 = arith.subf %281, %282 : f32
    %284 = arith.truncf %265 : vector<8x33xf32> to vector<8x33xbf16>
    %cst_100 = arith.constant dense<0.000000e+00> : vector<8x65xf32>
    %285 = tpu.matmul %284, %0, %cst_100 {dimension_numbers = #tpu.dot_dimension_numbers<[1], [0], [0], [1], [0, 0, 1, 1], [], []>} : vector<8x33xbf16>, vector<33x65xbf16>, vector<8x65xf32> -> vector<8x65xf32>
    %286 = arith.truncf %276 : vector<8x33xf32> to vector<8x33xbf16>
    %cst_101 = arith.constant dense<0.000000e+00> : vector<8x65xf32>
    %287 = tpu.matmul %286, %0, %cst_101 {dimension_numbers = #tpu.dot_dimension_numbers<[1], [0], [0], [1], [0, 0, 1, 1], [], []>} : vector<8x33xbf16>, vector<33x65xbf16>, vector<8x65xf32> -> vector<8x65xf32>
    %288 = math.tanh %285 : vector<8x65xf32>
    %289 = math.tanh %287 : vector<8x65xf32>
    %290 = arith.truncf %288 : vector<8x65xf32> to vector<8x65xbf16>
    %cst_102 = arith.constant dense<0.000000e+00> : vector<8x33xf32>
    %291 = tpu.matmul %290, %1, %cst_102 {dimension_numbers = #tpu.dot_dimension_numbers<[1], [0], [0], [1], [0, 0, 1, 1], [], []>} : vector<8x65xbf16>, vector<65x33xbf16>, vector<8x33xf32> -> vector<8x33xf32>
    %292 = arith.truncf %289 : vector<8x65xf32> to vector<8x65xbf16>
    %cst_103 = arith.constant dense<0.000000e+00> : vector<8x33xf32>
    %293 = tpu.matmul %292, %1, %cst_103 {dimension_numbers = #tpu.dot_dimension_numbers<[1], [0], [0], [1], [0, 0, 1, 1], [], []>} : vector<8x65xbf16>, vector<65x33xbf16>, vector<8x33xf32> -> vector<8x33xf32>
    %cst_104 = arith.constant 5.000000e-01 : f32
    %294 = arith.mulf %cst_104, %283 : f32
    %295 = vector.broadcast %294 : f32 to vector<8x33xf32>
    %296 = arith.mulf %295, %291 : vector<8x33xf32>
    %297 = arith.addf %265, %296 : vector<8x33xf32>
    %cst_105 = arith.constant 5.000000e-01 : f32
    %298 = arith.mulf %cst_105, %283 : f32
    %299 = vector.broadcast %298 : f32 to vector<8x33xf32>
    %300 = arith.mulf %299, %293 : vector<8x33xf32>
    %301 = arith.addf %276, %300 : vector<8x33xf32>
    %302 = arith.truncf %297 : vector<8x33xf32> to vector<8x33xbf16>
    %cst_106 = arith.constant dense<0.000000e+00> : vector<8x65xf32>
    %303 = tpu.matmul %302, %0, %cst_106 {dimension_numbers = #tpu.dot_dimension_numbers<[1], [0], [0], [1], [0, 0, 1, 1], [], []>} : vector<8x33xbf16>, vector<33x65xbf16>, vector<8x65xf32> -> vector<8x65xf32>
    %304 = arith.truncf %301 : vector<8x33xf32> to vector<8x33xbf16>
    %cst_107 = arith.constant dense<0.000000e+00> : vector<8x65xf32>
    %305 = tpu.matmul %304, %0, %cst_107 {dimension_numbers = #tpu.dot_dimension_numbers<[1], [0], [0], [1], [0, 0, 1, 1], [], []>} : vector<8x33xbf16>, vector<33x65xbf16>, vector<8x65xf32> -> vector<8x65xf32>
    %306 = math.tanh %303 : vector<8x65xf32>
    %307 = math.tanh %305 : vector<8x65xf32>
    %308 = arith.truncf %306 : vector<8x65xf32> to vector<8x65xbf16>
    %cst_108 = arith.constant dense<0.000000e+00> : vector<8x33xf32>
    %309 = tpu.matmul %308, %1, %cst_108 {dimension_numbers = #tpu.dot_dimension_numbers<[1], [0], [0], [1], [0, 0, 1, 1], [], []>} : vector<8x65xbf16>, vector<65x33xbf16>, vector<8x33xf32> -> vector<8x33xf32>
    %310 = arith.truncf %307 : vector<8x65xf32> to vector<8x65xbf16>
    %cst_109 = arith.constant dense<0.000000e+00> : vector<8x33xf32>
    %311 = tpu.matmul %310, %1, %cst_109 {dimension_numbers = #tpu.dot_dimension_numbers<[1], [0], [0], [1], [0, 0, 1, 1], [], []>} : vector<8x65xbf16>, vector<65x33xbf16>, vector<8x33xf32> -> vector<8x33xf32>
    %cst_110 = arith.constant 5.000000e-01 : f32
    %312 = arith.mulf %cst_110, %283 : f32
    %313 = vector.broadcast %312 : f32 to vector<8x33xf32>
    %314 = arith.mulf %313, %309 : vector<8x33xf32>
    %315 = arith.addf %265, %314 : vector<8x33xf32>
    %cst_111 = arith.constant 5.000000e-01 : f32
    %316 = arith.mulf %cst_111, %283 : f32
    %317 = vector.broadcast %316 : f32 to vector<8x33xf32>
    %318 = arith.mulf %317, %311 : vector<8x33xf32>
    %319 = arith.addf %276, %318 : vector<8x33xf32>
    %320 = arith.truncf %315 : vector<8x33xf32> to vector<8x33xbf16>
    %cst_112 = arith.constant dense<0.000000e+00> : vector<8x65xf32>
    %321 = tpu.matmul %320, %0, %cst_112 {dimension_numbers = #tpu.dot_dimension_numbers<[1], [0], [0], [1], [0, 0, 1, 1], [], []>} : vector<8x33xbf16>, vector<33x65xbf16>, vector<8x65xf32> -> vector<8x65xf32>
    %322 = arith.truncf %319 : vector<8x33xf32> to vector<8x33xbf16>
    %cst_113 = arith.constant dense<0.000000e+00> : vector<8x65xf32>
    %323 = tpu.matmul %322, %0, %cst_113 {dimension_numbers = #tpu.dot_dimension_numbers<[1], [0], [0], [1], [0, 0, 1, 1], [], []>} : vector<8x33xbf16>, vector<33x65xbf16>, vector<8x65xf32> -> vector<8x65xf32>
    %324 = math.tanh %321 : vector<8x65xf32>
    %325 = math.tanh %323 : vector<8x65xf32>
    %326 = arith.truncf %324 : vector<8x65xf32> to vector<8x65xbf16>
    %cst_114 = arith.constant dense<0.000000e+00> : vector<8x33xf32>
    %327 = tpu.matmul %326, %1, %cst_114 {dimension_numbers = #tpu.dot_dimension_numbers<[1], [0], [0], [1], [0, 0, 1, 1], [], []>} : vector<8x65xbf16>, vector<65x33xbf16>, vector<8x33xf32> -> vector<8x33xf32>
    %328 = arith.truncf %325 : vector<8x65xf32> to vector<8x65xbf16>
    %cst_115 = arith.constant dense<0.000000e+00> : vector<8x33xf32>
    %329 = tpu.matmul %328, %1, %cst_115 {dimension_numbers = #tpu.dot_dimension_numbers<[1], [0], [0], [1], [0, 0, 1, 1], [], []>} : vector<8x65xbf16>, vector<65x33xbf16>, vector<8x33xf32> -> vector<8x33xf32>
    %330 = vector.broadcast %283 : f32 to vector<8x33xf32>
    %331 = arith.mulf %330, %327 : vector<8x33xf32>
    %332 = arith.addf %265, %331 : vector<8x33xf32>
    %333 = vector.broadcast %283 : f32 to vector<8x33xf32>
    %334 = arith.mulf %333, %329 : vector<8x33xf32>
    %335 = arith.addf %276, %334 : vector<8x33xf32>
    %336 = arith.truncf %332 : vector<8x33xf32> to vector<8x33xbf16>
    %cst_116 = arith.constant dense<0.000000e+00> : vector<8x65xf32>
    %337 = tpu.matmul %336, %0, %cst_116 {dimension_numbers = #tpu.dot_dimension_numbers<[1], [0], [0], [1], [0, 0, 1, 1], [], []>} : vector<8x33xbf16>, vector<33x65xbf16>, vector<8x65xf32> -> vector<8x65xf32>
    %338 = arith.truncf %335 : vector<8x33xf32> to vector<8x33xbf16>
    %cst_117 = arith.constant dense<0.000000e+00> : vector<8x65xf32>
    %339 = tpu.matmul %338, %0, %cst_117 {dimension_numbers = #tpu.dot_dimension_numbers<[1], [0], [0], [1], [0, 0, 1, 1], [], []>} : vector<8x33xbf16>, vector<33x65xbf16>, vector<8x65xf32> -> vector<8x65xf32>
    %340 = math.tanh %337 : vector<8x65xf32>
    %341 = math.tanh %339 : vector<8x65xf32>
    %342 = arith.truncf %340 : vector<8x65xf32> to vector<8x65xbf16>
    %cst_118 = arith.constant dense<0.000000e+00> : vector<8x33xf32>
    %343 = tpu.matmul %342, %1, %cst_118 {dimension_numbers = #tpu.dot_dimension_numbers<[1], [0], [0], [1], [0, 0, 1, 1], [], []>} : vector<8x65xbf16>, vector<65x33xbf16>, vector<8x33xf32> -> vector<8x33xf32>
    %344 = arith.truncf %341 : vector<8x65xf32> to vector<8x65xbf16>
    %cst_119 = arith.constant dense<0.000000e+00> : vector<8x33xf32>
    %345 = tpu.matmul %344, %1, %cst_119 {dimension_numbers = #tpu.dot_dimension_numbers<[1], [0], [0], [1], [0, 0, 1, 1], [], []>} : vector<8x65xbf16>, vector<65x33xbf16>, vector<8x33xf32> -> vector<8x33xf32>
    %cst_120 = arith.constant 0.166666672 : f32
    %346 = arith.mulf %283, %cst_120 : f32
    %cst_121 = arith.constant 2.000000e+00 : f32
    %347 = vector.broadcast %cst_121 : f32 to vector<8x33xf32>
    %348 = arith.mulf %347, %309 : vector<8x33xf32>
    %349 = arith.addf %291, %348 : vector<8x33xf32>
    %cst_122 = arith.constant 2.000000e+00 : f32
    %350 = vector.broadcast %cst_122 : f32 to vector<8x33xf32>
    %351 = arith.mulf %350, %327 : vector<8x33xf32>
    %352 = arith.addf %349, %351 : vector<8x33xf32>
    %353 = arith.addf %352, %343 : vector<8x33xf32>
    %354 = vector.broadcast %346 : f32 to vector<8x33xf32>
    %355 = arith.mulf %354, %353 : vector<8x33xf32>
    %356 = arith.addf %265, %355 : vector<8x33xf32>
    %cst_123 = arith.constant 0.166666672 : f32
    %357 = arith.mulf %283, %cst_123 : f32
    %cst_124 = arith.constant 2.000000e+00 : f32
    %358 = vector.broadcast %cst_124 : f32 to vector<8x33xf32>
    %359 = arith.mulf %358, %311 : vector<8x33xf32>
    %360 = arith.addf %293, %359 : vector<8x33xf32>
    %cst_125 = arith.constant 2.000000e+00 : f32
    %361 = vector.broadcast %cst_125 : f32 to vector<8x33xf32>
    %362 = arith.mulf %361, %329 : vector<8x33xf32>
    %363 = arith.addf %360, %362 : vector<8x33xf32>
    %364 = arith.addf %363, %345 : vector<8x33xf32>
    %365 = vector.broadcast %357 : f32 to vector<8x33xf32>
    %366 = arith.mulf %365, %364 : vector<8x33xf32>
    %367 = arith.addf %276, %366 : vector<8x33xf32>
    %368 = vector.extract_strided_slice %356 {offsets = [0, 0], sizes = [8, 32], strides = [1, 1]} : vector<8x33xf32> to vector<8x32xf32>
    %c0_126 = arith.constant 0 : index
    %c128 = arith.constant 128 : index
    %369 = vector.load %arg4[%c0_126, %c128] : memref<16x256xf32, #tpu.memory_space<vmem>>, vector<8x32xf32>
    tpu.vector_store %arg4[%c0_126, %c128], %368 {strides = array<i32>} : memref<16x256xf32, #tpu.memory_space<vmem>>, vector<8x32xf32>,
    %370 = vector.extract_strided_slice %367 {offsets = [0, 0], sizes = [8, 32], strides = [1, 1]} : vector<8x33xf32> to vector<8x32xf32>
    %c8_127 = arith.constant 8 : index
    %c128_128 = arith.constant 128 : index
    %371 = vector.load %arg4[%c8_127, %c128_128] : memref<16x256xf32, #tpu.memory_space<vmem>>, vector<8x32xf32>
    tpu.vector_store %arg4[%c8_127, %c128_128], %370 {strides = array<i32>} : memref<16x256xf32, #tpu.memory_space<vmem>>, vector<8x32xf32>,
    %c5 = arith.constant 5 : index
    %372 = memref.load %arg0[%c5] : memref<8xf32, #tpu.memory_space<smem>>
    %c4_129 = arith.constant 4 : index
    %373 = memref.load %arg0[%c4_129] : memref<8xf32, #tpu.memory_space<smem>>
    %374 = arith.subf %372, %373 : f32
    %375 = arith.truncf %356 : vector<8x33xf32> to vector<8x33xbf16>
    %cst_130 = arith.constant dense<0.000000e+00> : vector<8x65xf32>
    %376 = tpu.matmul %375, %0, %cst_130 {dimension_numbers = #tpu.dot_dimension_numbers<[1], [0], [0], [1], [0, 0, 1, 1], [], []>} : vector<8x33xbf16>, vector<33x65xbf16>, vector<8x65xf32> -> vector<8x65xf32>
    %377 = arith.truncf %367 : vector<8x33xf32> to vector<8x33xbf16>
    %cst_131 = arith.constant dense<0.000000e+00> : vector<8x65xf32>
    %378 = tpu.matmul %377, %0, %cst_131 {dimension_numbers = #tpu.dot_dimension_numbers<[1], [0], [0], [1], [0, 0, 1, 1], [], []>} : vector<8x33xbf16>, vector<33x65xbf16>, vector<8x65xf32> -> vector<8x65xf32>
    %379 = math.tanh %376 : vector<8x65xf32>
    %380 = math.tanh %378 : vector<8x65xf32>
    %381 = arith.truncf %379 : vector<8x65xf32> to vector<8x65xbf16>
    %cst_132 = arith.constant dense<0.000000e+00> : vector<8x33xf32>
    %382 = tpu.matmul %381, %1, %cst_132 {dimension_numbers = #tpu.dot_dimension_numbers<[1], [0], [0], [1], [0, 0, 1, 1], [], []>} : vector<8x65xbf16>, vector<65x33xbf16>, vector<8x33xf32> -> vector<8x33xf32>
    %383 = arith.truncf %380 : vector<8x65xf32> to vector<8x65xbf16>
    %cst_133 = arith.constant dense<0.000000e+00> : vector<8x33xf32>
    %384 = tpu.matmul %383, %1, %cst_133 {dimension_numbers = #tpu.dot_dimension_numbers<[1], [0], [0], [1], [0, 0, 1, 1], [], []>} : vector<8x65xbf16>, vector<65x33xbf16>, vector<8x33xf32> -> vector<8x33xf32>
    %cst_134 = arith.constant 5.000000e-01 : f32
    %385 = arith.mulf %cst_134, %374 : f32
    %386 = vector.broadcast %385 : f32 to vector<8x33xf32>
    %387 = arith.mulf %386, %382 : vector<8x33xf32>
    %388 = arith.addf %356, %387 : vector<8x33xf32>
    %cst_135 = arith.constant 5.000000e-01 : f32
    %389 = arith.mulf %cst_135, %374 : f32
    %390 = vector.broadcast %389 : f32 to vector<8x33xf32>
    %391 = arith.mulf %390, %384 : vector<8x33xf32>
    %392 = arith.addf %367, %391 : vector<8x33xf32>
    %393 = arith.truncf %388 : vector<8x33xf32> to vector<8x33xbf16>
    %cst_136 = arith.constant dense<0.000000e+00> : vector<8x65xf32>
    %394 = tpu.matmul %393, %0, %cst_136 {dimension_numbers = #tpu.dot_dimension_numbers<[1], [0], [0], [1], [0, 0, 1, 1], [], []>} : vector<8x33xbf16>, vector<33x65xbf16>, vector<8x65xf32> -> vector<8x65xf32>
    %395 = arith.truncf %392 : vector<8x33xf32> to vector<8x33xbf16>
    %cst_137 = arith.constant dense<0.000000e+00> : vector<8x65xf32>
    %396 = tpu.matmul %395, %0, %cst_137 {dimension_numbers = #tpu.dot_dimension_numbers<[1], [0], [0], [1], [0, 0, 1, 1], [], []>} : vector<8x33xbf16>, vector<33x65xbf16>, vector<8x65xf32> -> vector<8x65xf32>
    %397 = math.tanh %394 : vector<8x65xf32>
    %398 = math.tanh %396 : vector<8x65xf32>
    %399 = arith.truncf %397 : vector<8x65xf32> to vector<8x65xbf16>
    %cst_138 = arith.constant dense<0.000000e+00> : vector<8x33xf32>
    %400 = tpu.matmul %399, %1, %cst_138 {dimension_numbers = #tpu.dot_dimension_numbers<[1], [0], [0], [1], [0, 0, 1, 1], [], []>} : vector<8x65xbf16>, vector<65x33xbf16>, vector<8x33xf32> -> vector<8x33xf32>
    %401 = arith.truncf %398 : vector<8x65xf32> to vector<8x65xbf16>
    %cst_139 = arith.constant dense<0.000000e+00> : vector<8x33xf32>
    %402 = tpu.matmul %401, %1, %cst_139 {dimension_numbers = #tpu.dot_dimension_numbers<[1], [0], [0], [1], [0, 0, 1, 1], [], []>} : vector<8x65xbf16>, vector<65x33xbf16>, vector<8x33xf32> -> vector<8x33xf32>
    %cst_140 = arith.constant 5.000000e-01 : f32
    %403 = arith.mulf %cst_140, %374 : f32
    %404 = vector.broadcast %403 : f32 to vector<8x33xf32>
    %405 = arith.mulf %404, %400 : vector<8x33xf32>
    %406 = arith.addf %356, %405 : vector<8x33xf32>
    %cst_141 = arith.constant 5.000000e-01 : f32
    %407 = arith.mulf %cst_141, %374 : f32
    %408 = vector.broadcast %407 : f32 to vector<8x33xf32>
    %409 = arith.mulf %408, %402 : vector<8x33xf32>
    %410 = arith.addf %367, %409 : vector<8x33xf32>
    %411 = arith.truncf %406 : vector<8x33xf32> to vector<8x33xbf16>
    %cst_142 = arith.constant dense<0.000000e+00> : vector<8x65xf32>
    %412 = tpu.matmul %411, %0, %cst_142 {dimension_numbers = #tpu.dot_dimension_numbers<[1], [0], [0], [1], [0, 0, 1, 1], [], []>} : vector<8x33xbf16>, vector<33x65xbf16>, vector<8x65xf32> -> vector<8x65xf32>
    %413 = arith.truncf %410 : vector<8x33xf32> to vector<8x33xbf16>
    %cst_143 = arith.constant dense<0.000000e+00> : vector<8x65xf32>
    %414 = tpu.matmul %413, %0, %cst_143 {dimension_numbers = #tpu.dot_dimension_numbers<[1], [0], [0], [1], [0, 0, 1, 1], [], []>} : vector<8x33xbf16>, vector<33x65xbf16>, vector<8x65xf32> -> vector<8x65xf32>
    %415 = math.tanh %412 : vector<8x65xf32>
    %416 = math.tanh %414 : vector<8x65xf32>
    %417 = arith.truncf %415 : vector<8x65xf32> to vector<8x65xbf16>
    %cst_144 = arith.constant dense<0.000000e+00> : vector<8x33xf32>
    %418 = tpu.matmul %417, %1, %cst_144 {dimension_numbers = #tpu.dot_dimension_numbers<[1], [0], [0], [1], [0, 0, 1, 1], [], []>} : vector<8x65xbf16>, vector<65x33xbf16>, vector<8x33xf32> -> vector<8x33xf32>
    %419 = arith.truncf %416 : vector<8x65xf32> to vector<8x65xbf16>
    %cst_145 = arith.constant dense<0.000000e+00> : vector<8x33xf32>
    %420 = tpu.matmul %419, %1, %cst_145 {dimension_numbers = #tpu.dot_dimension_numbers<[1], [0], [0], [1], [0, 0, 1, 1], [], []>} : vector<8x65xbf16>, vector<65x33xbf16>, vector<8x33xf32> -> vector<8x33xf32>
    %421 = vector.broadcast %374 : f32 to vector<8x33xf32>
    %422 = arith.mulf %421, %418 : vector<8x33xf32>
    %423 = arith.addf %356, %422 : vector<8x33xf32>
    %424 = vector.broadcast %374 : f32 to vector<8x33xf32>
    %425 = arith.mulf %424, %420 : vector<8x33xf32>
    %426 = arith.addf %367, %425 : vector<8x33xf32>
    %427 = arith.truncf %423 : vector<8x33xf32> to vector<8x33xbf16>
    %cst_146 = arith.constant dense<0.000000e+00> : vector<8x65xf32>
    %428 = tpu.matmul %427, %0, %cst_146 {dimension_numbers = #tpu.dot_dimension_numbers<[1], [0], [0], [1], [0, 0, 1, 1], [], []>} : vector<8x33xbf16>, vector<33x65xbf16>, vector<8x65xf32> -> vector<8x65xf32>
    %429 = arith.truncf %426 : vector<8x33xf32> to vector<8x33xbf16>
    %cst_147 = arith.constant dense<0.000000e+00> : vector<8x65xf32>
    %430 = tpu.matmul %429, %0, %cst_147 {dimension_numbers = #tpu.dot_dimension_numbers<[1], [0], [0], [1], [0, 0, 1, 1], [], []>} : vector<8x33xbf16>, vector<33x65xbf16>, vector<8x65xf32> -> vector<8x65xf32>
    %431 = math.tanh %428 : vector<8x65xf32>
    %432 = math.tanh %430 : vector<8x65xf32>
    %433 = arith.truncf %431 : vector<8x65xf32> to vector<8x65xbf16>
    %cst_148 = arith.constant dense<0.000000e+00> : vector<8x33xf32>
    %434 = tpu.matmul %433, %1, %cst_148 {dimension_numbers = #tpu.dot_dimension_numbers<[1], [0], [0], [1], [0, 0, 1, 1], [], []>} : vector<8x65xbf16>, vector<65x33xbf16>, vector<8x33xf32> -> vector<8x33xf32>
    %435 = arith.truncf %432 : vector<8x65xf32> to vector<8x65xbf16>
    %cst_149 = arith.constant dense<0.000000e+00> : vector<8x33xf32>
    %436 = tpu.matmul %435, %1, %cst_149 {dimension_numbers = #tpu.dot_dimension_numbers<[1], [0], [0], [1], [0, 0, 1, 1], [], []>} : vector<8x65xbf16>, vector<65x33xbf16>, vector<8x33xf32> -> vector<8x33xf32>
    %cst_150 = arith.constant 0.166666672 : f32
    %437 = arith.mulf %374, %cst_150 : f32
    %cst_151 = arith.constant 2.000000e+00 : f32
    %438 = vector.broadcast %cst_151 : f32 to vector<8x33xf32>
    %439 = arith.mulf %438, %400 : vector<8x33xf32>
    %440 = arith.addf %382, %439 : vector<8x33xf32>
    %cst_152 = arith.constant 2.000000e+00 : f32
    %441 = vector.broadcast %cst_152 : f32 to vector<8x33xf32>
    %442 = arith.mulf %441, %418 : vector<8x33xf32>
    %443 = arith.addf %440, %442 : vector<8x33xf32>
    %444 = arith.addf %443, %434 : vector<8x33xf32>
    %445 = vector.broadcast %437 : f32 to vector<8x33xf32>
    %446 = arith.mulf %445, %444 : vector<8x33xf32>
    %447 = arith.addf %356, %446 : vector<8x33xf32>
    %cst_153 = arith.constant 0.166666672 : f32
    %448 = arith.mulf %374, %cst_153 : f32
    %cst_154 = arith.constant 2.000000e+00 : f32
    %449 = vector.broadcast %cst_154 : f32 to vector<8x33xf32>
    %450 = arith.mulf %449, %402 : vector<8x33xf32>
    %451 = arith.addf %384, %450 : vector<8x33xf32>
    %cst_155 = arith.constant 2.000000e+00 : f32
    %452 = vector.broadcast %cst_155 : f32 to vector<8x33xf32>
    %453 = arith.mulf %452, %420 : vector<8x33xf32>
    %454 = arith.addf %451, %453 : vector<8x33xf32>
    %455 = arith.addf %454, %436 : vector<8x33xf32>
    %456 = vector.broadcast %448 : f32 to vector<8x33xf32>
    %457 = arith.mulf %456, %455 : vector<8x33xf32>
    %458 = arith.addf %367, %457 : vector<8x33xf32>
    %459 = vector.extract_strided_slice %447 {offsets = [0, 0], sizes = [8, 32], strides = [1, 1]} : vector<8x33xf32> to vector<8x32xf32>
    %c0_156 = arith.constant 0 : index
    %c160 = arith.constant 160 : index
    %460 = vector.load %arg4[%c0_156, %c160] : memref<16x256xf32, #tpu.memory_space<vmem>>, vector<8x32xf32>
    tpu.vector_store %arg4[%c0_156, %c160], %459 {strides = array<i32>} : memref<16x256xf32, #tpu.memory_space<vmem>>, vector<8x32xf32>,
    %461 = vector.extract_strided_slice %458 {offsets = [0, 0], sizes = [8, 32], strides = [1, 1]} : vector<8x33xf32> to vector<8x32xf32>
    %c8_157 = arith.constant 8 : index
    %c160_158 = arith.constant 160 : index
    %462 = vector.load %arg4[%c8_157, %c160_158] : memref<16x256xf32, #tpu.memory_space<vmem>>, vector<8x32xf32>
    tpu.vector_store %arg4[%c8_157, %c160_158], %461 {strides = array<i32>} : memref<16x256xf32, #tpu.memory_space<vmem>>, vector<8x32xf32>,
    %c6 = arith.constant 6 : index
    %463 = memref.load %arg0[%c6] : memref<8xf32, #tpu.memory_space<smem>>
    %c5_159 = arith.constant 5 : index
    %464 = memref.load %arg0[%c5_159] : memref<8xf32, #tpu.memory_space<smem>>
    %465 = arith.subf %463, %464 : f32
    %466 = arith.truncf %447 : vector<8x33xf32> to vector<8x33xbf16>
    %cst_160 = arith.constant dense<0.000000e+00> : vector<8x65xf32>
    %467 = tpu.matmul %466, %0, %cst_160 {dimension_numbers = #tpu.dot_dimension_numbers<[1], [0], [0], [1], [0, 0, 1, 1], [], []>} : vector<8x33xbf16>, vector<33x65xbf16>, vector<8x65xf32> -> vector<8x65xf32>
    %468 = arith.truncf %458 : vector<8x33xf32> to vector<8x33xbf16>
    %cst_161 = arith.constant dense<0.000000e+00> : vector<8x65xf32>
    %469 = tpu.matmul %468, %0, %cst_161 {dimension_numbers = #tpu.dot_dimension_numbers<[1], [0], [0], [1], [0, 0, 1, 1], [], []>} : vector<8x33xbf16>, vector<33x65xbf16>, vector<8x65xf32> -> vector<8x65xf32>
    %470 = math.tanh %467 : vector<8x65xf32>
    %471 = math.tanh %469 : vector<8x65xf32>
    %472 = arith.truncf %470 : vector<8x65xf32> to vector<8x65xbf16>
    %cst_162 = arith.constant dense<0.000000e+00> : vector<8x33xf32>
    %473 = tpu.matmul %472, %1, %cst_162 {dimension_numbers = #tpu.dot_dimension_numbers<[1], [0], [0], [1], [0, 0, 1, 1], [], []>} : vector<8x65xbf16>, vector<65x33xbf16>, vector<8x33xf32> -> vector<8x33xf32>
    %474 = arith.truncf %471 : vector<8x65xf32> to vector<8x65xbf16>
    %cst_163 = arith.constant dense<0.000000e+00> : vector<8x33xf32>
    %475 = tpu.matmul %474, %1, %cst_163 {dimension_numbers = #tpu.dot_dimension_numbers<[1], [0], [0], [1], [0, 0, 1, 1], [], []>} : vector<8x65xbf16>, vector<65x33xbf16>, vector<8x33xf32> -> vector<8x33xf32>
    %cst_164 = arith.constant 5.000000e-01 : f32
    %476 = arith.mulf %cst_164, %465 : f32
    %477 = vector.broadcast %476 : f32 to vector<8x33xf32>
    %478 = arith.mulf %477, %473 : vector<8x33xf32>
    %479 = arith.addf %447, %478 : vector<8x33xf32>
    %cst_165 = arith.constant 5.000000e-01 : f32
    %480 = arith.mulf %cst_165, %465 : f32
    %481 = vector.broadcast %480 : f32 to vector<8x33xf32>
    %482 = arith.mulf %481, %475 : vector<8x33xf32>
    %483 = arith.addf %458, %482 : vector<8x33xf32>
    %484 = arith.truncf %479 : vector<8x33xf32> to vector<8x33xbf16>
    %cst_166 = arith.constant dense<0.000000e+00> : vector<8x65xf32>
    %485 = tpu.matmul %484, %0, %cst_166 {dimension_numbers = #tpu.dot_dimension_numbers<[1], [0], [0], [1], [0, 0, 1, 1], [], []>} : vector<8x33xbf16>, vector<33x65xbf16>, vector<8x65xf32> -> vector<8x65xf32>
    %486 = arith.truncf %483 : vector<8x33xf32> to vector<8x33xbf16>
    %cst_167 = arith.constant dense<0.000000e+00> : vector<8x65xf32>
    %487 = tpu.matmul %486, %0, %cst_167 {dimension_numbers = #tpu.dot_dimension_numbers<[1], [0], [0], [1], [0, 0, 1, 1], [], []>} : vector<8x33xbf16>, vector<33x65xbf16>, vector<8x65xf32> -> vector<8x65xf32>
    %488 = math.tanh %485 : vector<8x65xf32>
    %489 = math.tanh %487 : vector<8x65xf32>
    %490 = arith.truncf %488 : vector<8x65xf32> to vector<8x65xbf16>
    %cst_168 = arith.constant dense<0.000000e+00> : vector<8x33xf32>
    %491 = tpu.matmul %490, %1, %cst_168 {dimension_numbers = #tpu.dot_dimension_numbers<[1], [0], [0], [1], [0, 0, 1, 1], [], []>} : vector<8x65xbf16>, vector<65x33xbf16>, vector<8x33xf32> -> vector<8x33xf32>
    %492 = arith.truncf %489 : vector<8x65xf32> to vector<8x65xbf16>
    %cst_169 = arith.constant dense<0.000000e+00> : vector<8x33xf32>
    %493 = tpu.matmul %492, %1, %cst_169 {dimension_numbers = #tpu.dot_dimension_numbers<[1], [0], [0], [1], [0, 0, 1, 1], [], []>} : vector<8x65xbf16>, vector<65x33xbf16>, vector<8x33xf32> -> vector<8x33xf32>
    %cst_170 = arith.constant 5.000000e-01 : f32
    %494 = arith.mulf %cst_170, %465 : f32
    %495 = vector.broadcast %494 : f32 to vector<8x33xf32>
    %496 = arith.mulf %495, %491 : vector<8x33xf32>
    %497 = arith.addf %447, %496 : vector<8x33xf32>
    %cst_171 = arith.constant 5.000000e-01 : f32
    %498 = arith.mulf %cst_171, %465 : f32
    %499 = vector.broadcast %498 : f32 to vector<8x33xf32>
    %500 = arith.mulf %499, %493 : vector<8x33xf32>
    %501 = arith.addf %458, %500 : vector<8x33xf32>
    %502 = arith.truncf %497 : vector<8x33xf32> to vector<8x33xbf16>
    %cst_172 = arith.constant dense<0.000000e+00> : vector<8x65xf32>
    %503 = tpu.matmul %502, %0, %cst_172 {dimension_numbers = #tpu.dot_dimension_numbers<[1], [0], [0], [1], [0, 0, 1, 1], [], []>} : vector<8x33xbf16>, vector<33x65xbf16>, vector<8x65xf32> -> vector<8x65xf32>
    %504 = arith.truncf %501 : vector<8x33xf32> to vector<8x33xbf16>
    %cst_173 = arith.constant dense<0.000000e+00> : vector<8x65xf32>
    %505 = tpu.matmul %504, %0, %cst_173 {dimension_numbers = #tpu.dot_dimension_numbers<[1], [0], [0], [1], [0, 0, 1, 1], [], []>} : vector<8x33xbf16>, vector<33x65xbf16>, vector<8x65xf32> -> vector<8x65xf32>
    %506 = math.tanh %503 : vector<8x65xf32>
    %507 = math.tanh %505 : vector<8x65xf32>
    %508 = arith.truncf %506 : vector<8x65xf32> to vector<8x65xbf16>
    %cst_174 = arith.constant dense<0.000000e+00> : vector<8x33xf32>
    %509 = tpu.matmul %508, %1, %cst_174 {dimension_numbers = #tpu.dot_dimension_numbers<[1], [0], [0], [1], [0, 0, 1, 1], [], []>} : vector<8x65xbf16>, vector<65x33xbf16>, vector<8x33xf32> -> vector<8x33xf32>
    %510 = arith.truncf %507 : vector<8x65xf32> to vector<8x65xbf16>
    %cst_175 = arith.constant dense<0.000000e+00> : vector<8x33xf32>
    %511 = tpu.matmul %510, %1, %cst_175 {dimension_numbers = #tpu.dot_dimension_numbers<[1], [0], [0], [1], [0, 0, 1, 1], [], []>} : vector<8x65xbf16>, vector<65x33xbf16>, vector<8x33xf32> -> vector<8x33xf32>
    %512 = vector.broadcast %465 : f32 to vector<8x33xf32>
    %513 = arith.mulf %512, %509 : vector<8x33xf32>
    %514 = arith.addf %447, %513 : vector<8x33xf32>
    %515 = vector.broadcast %465 : f32 to vector<8x33xf32>
    %516 = arith.mulf %515, %511 : vector<8x33xf32>
    %517 = arith.addf %458, %516 : vector<8x33xf32>
    %518 = arith.truncf %514 : vector<8x33xf32> to vector<8x33xbf16>
    %cst_176 = arith.constant dense<0.000000e+00> : vector<8x65xf32>
    %519 = tpu.matmul %518, %0, %cst_176 {dimension_numbers = #tpu.dot_dimension_numbers<[1], [0], [0], [1], [0, 0, 1, 1], [], []>} : vector<8x33xbf16>, vector<33x65xbf16>, vector<8x65xf32> -> vector<8x65xf32>
    %520 = arith.truncf %517 : vector<8x33xf32> to vector<8x33xbf16>
    %cst_177 = arith.constant dense<0.000000e+00> : vector<8x65xf32>
    %521 = tpu.matmul %520, %0, %cst_177 {dimension_numbers = #tpu.dot_dimension_numbers<[1], [0], [0], [1], [0, 0, 1, 1], [], []>} : vector<8x33xbf16>, vector<33x65xbf16>, vector<8x65xf32> -> vector<8x65xf32>
    %522 = math.tanh %519 : vector<8x65xf32>
    %523 = math.tanh %521 : vector<8x65xf32>
    %524 = arith.truncf %522 : vector<8x65xf32> to vector<8x65xbf16>
    %cst_178 = arith.constant dense<0.000000e+00> : vector<8x33xf32>
    %525 = tpu.matmul %524, %1, %cst_178 {dimension_numbers = #tpu.dot_dimension_numbers<[1], [0], [0], [1], [0, 0, 1, 1], [], []>} : vector<8x65xbf16>, vector<65x33xbf16>, vector<8x33xf32> -> vector<8x33xf32>
    %526 = arith.truncf %523 : vector<8x65xf32> to vector<8x65xbf16>
    %cst_179 = arith.constant dense<0.000000e+00> : vector<8x33xf32>
    %527 = tpu.matmul %526, %1, %cst_179 {dimension_numbers = #tpu.dot_dimension_numbers<[1], [0], [0], [1], [0, 0, 1, 1], [], []>} : vector<8x65xbf16>, vector<65x33xbf16>, vector<8x33xf32> -> vector<8x33xf32>
    %cst_180 = arith.constant 0.166666672 : f32
    %528 = arith.mulf %465, %cst_180 : f32
    %cst_181 = arith.constant 2.000000e+00 : f32
    %529 = vector.broadcast %cst_181 : f32 to vector<8x33xf32>
    %530 = arith.mulf %529, %491 : vector<8x33xf32>
    %531 = arith.addf %473, %530 : vector<8x33xf32>
    %cst_182 = arith.constant 2.000000e+00 : f32
    %532 = vector.broadcast %cst_182 : f32 to vector<8x33xf32>
    %533 = arith.mulf %532, %509 : vector<8x33xf32>
    %534 = arith.addf %531, %533 : vector<8x33xf32>
    %535 = arith.addf %534, %525 : vector<8x33xf32>
    %536 = vector.broadcast %528 : f32 to vector<8x33xf32>
    %537 = arith.mulf %536, %535 : vector<8x33xf32>
    %538 = arith.addf %447, %537 : vector<8x33xf32>
    %cst_183 = arith.constant 0.166666672 : f32
    %539 = arith.mulf %465, %cst_183 : f32
    %cst_184 = arith.constant 2.000000e+00 : f32
    %540 = vector.broadcast %cst_184 : f32 to vector<8x33xf32>
    %541 = arith.mulf %540, %493 : vector<8x33xf32>
    %542 = arith.addf %475, %541 : vector<8x33xf32>
    %cst_185 = arith.constant 2.000000e+00 : f32
    %543 = vector.broadcast %cst_185 : f32 to vector<8x33xf32>
    %544 = arith.mulf %543, %511 : vector<8x33xf32>
    %545 = arith.addf %542, %544 : vector<8x33xf32>
    %546 = arith.addf %545, %527 : vector<8x33xf32>
    %547 = vector.broadcast %539 : f32 to vector<8x33xf32>
    %548 = arith.mulf %547, %546 : vector<8x33xf32>
    %549 = arith.addf %458, %548 : vector<8x33xf32>
    %550 = vector.extract_strided_slice %538 {offsets = [0, 0], sizes = [8, 32], strides = [1, 1]} : vector<8x33xf32> to vector<8x32xf32>
    %c0_186 = arith.constant 0 : index
    %c192 = arith.constant 192 : index
    %551 = vector.load %arg4[%c0_186, %c192] : memref<16x256xf32, #tpu.memory_space<vmem>>, vector<8x32xf32>
    tpu.vector_store %arg4[%c0_186, %c192], %550 {strides = array<i32>} : memref<16x256xf32, #tpu.memory_space<vmem>>, vector<8x32xf32>,
    %552 = vector.extract_strided_slice %549 {offsets = [0, 0], sizes = [8, 32], strides = [1, 1]} : vector<8x33xf32> to vector<8x32xf32>
    %c8_187 = arith.constant 8 : index
    %c192_188 = arith.constant 192 : index
    %553 = vector.load %arg4[%c8_187, %c192_188] : memref<16x256xf32, #tpu.memory_space<vmem>>, vector<8x32xf32>
    tpu.vector_store %arg4[%c8_187, %c192_188], %552 {strides = array<i32>} : memref<16x256xf32, #tpu.memory_space<vmem>>, vector<8x32xf32>,
    %c7 = arith.constant 7 : index
    %554 = memref.load %arg0[%c7] : memref<8xf32, #tpu.memory_space<smem>>
    %c6_189 = arith.constant 6 : index
    %555 = memref.load %arg0[%c6_189] : memref<8xf32, #tpu.memory_space<smem>>
    %556 = arith.subf %554, %555 : f32
    %557 = arith.truncf %538 : vector<8x33xf32> to vector<8x33xbf16>
    %cst_190 = arith.constant dense<0.000000e+00> : vector<8x65xf32>
    %558 = tpu.matmul %557, %0, %cst_190 {dimension_numbers = #tpu.dot_dimension_numbers<[1], [0], [0], [1], [0, 0, 1, 1], [], []>} : vector<8x33xbf16>, vector<33x65xbf16>, vector<8x65xf32> -> vector<8x65xf32>
    %559 = arith.truncf %549 : vector<8x33xf32> to vector<8x33xbf16>
    %cst_191 = arith.constant dense<0.000000e+00> : vector<8x65xf32>
    %560 = tpu.matmul %559, %0, %cst_191 {dimension_numbers = #tpu.dot_dimension_numbers<[1], [0], [0], [1], [0, 0, 1, 1], [], []>} : vector<8x33xbf16>, vector<33x65xbf16>, vector<8x65xf32> -> vector<8x65xf32>
    %561 = math.tanh %558 : vector<8x65xf32>
    %562 = math.tanh %560 : vector<8x65xf32>
    %563 = arith.truncf %561 : vector<8x65xf32> to vector<8x65xbf16>
    %cst_192 = arith.constant dense<0.000000e+00> : vector<8x33xf32>
    %564 = tpu.matmul %563, %1, %cst_192 {dimension_numbers = #tpu.dot_dimension_numbers<[1], [0], [0], [1], [0, 0, 1, 1], [], []>} : vector<8x65xbf16>, vector<65x33xbf16>, vector<8x33xf32> -> vector<8x33xf32>
    %565 = arith.truncf %562 : vector<8x65xf32> to vector<8x65xbf16>
    %cst_193 = arith.constant dense<0.000000e+00> : vector<8x33xf32>
    %566 = tpu.matmul %565, %1, %cst_193 {dimension_numbers = #tpu.dot_dimension_numbers<[1], [0], [0], [1], [0, 0, 1, 1], [], []>} : vector<8x65xbf16>, vector<65x33xbf16>, vector<8x33xf32> -> vector<8x33xf32>
    %cst_194 = arith.constant 5.000000e-01 : f32
    %567 = arith.mulf %cst_194, %556 : f32
    %568 = vector.broadcast %567 : f32 to vector<8x33xf32>
    %569 = arith.mulf %568, %564 : vector<8x33xf32>
    %570 = arith.addf %538, %569 : vector<8x33xf32>
    %cst_195 = arith.constant 5.000000e-01 : f32
    %571 = arith.mulf %cst_195, %556 : f32
    %572 = vector.broadcast %571 : f32 to vector<8x33xf32>
    %573 = arith.mulf %572, %566 : vector<8x33xf32>
    %574 = arith.addf %549, %573 : vector<8x33xf32>
    %575 = arith.truncf %570 : vector<8x33xf32> to vector<8x33xbf16>
    %cst_196 = arith.constant dense<0.000000e+00> : vector<8x65xf32>
    %576 = tpu.matmul %575, %0, %cst_196 {dimension_numbers = #tpu.dot_dimension_numbers<[1], [0], [0], [1], [0, 0, 1, 1], [], []>} : vector<8x33xbf16>, vector<33x65xbf16>, vector<8x65xf32> -> vector<8x65xf32>
    %577 = arith.truncf %574 : vector<8x33xf32> to vector<8x33xbf16>
    %cst_197 = arith.constant dense<0.000000e+00> : vector<8x65xf32>
    %578 = tpu.matmul %577, %0, %cst_197 {dimension_numbers = #tpu.dot_dimension_numbers<[1], [0], [0], [1], [0, 0, 1, 1], [], []>} : vector<8x33xbf16>, vector<33x65xbf16>, vector<8x65xf32> -> vector<8x65xf32>
    %579 = math.tanh %576 : vector<8x65xf32>
    %580 = math.tanh %578 : vector<8x65xf32>
    %581 = arith.truncf %579 : vector<8x65xf32> to vector<8x65xbf16>
    %cst_198 = arith.constant dense<0.000000e+00> : vector<8x33xf32>
    %582 = tpu.matmul %581, %1, %cst_198 {dimension_numbers = #tpu.dot_dimension_numbers<[1], [0], [0], [1], [0, 0, 1, 1], [], []>} : vector<8x65xbf16>, vector<65x33xbf16>, vector<8x33xf32> -> vector<8x33xf32>
    %583 = arith.truncf %580 : vector<8x65xf32> to vector<8x65xbf16>
    %cst_199 = arith.constant dense<0.000000e+00> : vector<8x33xf32>
    %584 = tpu.matmul %583, %1, %cst_199 {dimension_numbers = #tpu.dot_dimension_numbers<[1], [0], [0], [1], [0, 0, 1, 1], [], []>} : vector<8x65xbf16>, vector<65x33xbf16>, vector<8x33xf32> -> vector<8x33xf32>
    %cst_200 = arith.constant 5.000000e-01 : f32
    %585 = arith.mulf %cst_200, %556 : f32
    %586 = vector.broadcast %585 : f32 to vector<8x33xf32>
    %587 = arith.mulf %586, %582 : vector<8x33xf32>
    %588 = arith.addf %538, %587 : vector<8x33xf32>
    %cst_201 = arith.constant 5.000000e-01 : f32
    %589 = arith.mulf %cst_201, %556 : f32
    %590 = vector.broadcast %589 : f32 to vector<8x33xf32>
    %591 = arith.mulf %590, %584 : vector<8x33xf32>
    %592 = arith.addf %549, %591 : vector<8x33xf32>
    %593 = arith.truncf %588 : vector<8x33xf32> to vector<8x33xbf16>
    %cst_202 = arith.constant dense<0.000000e+00> : vector<8x65xf32>
    %594 = tpu.matmul %593, %0, %cst_202 {dimension_numbers = #tpu.dot_dimension_numbers<[1], [0], [0], [1], [0, 0, 1, 1], [], []>} : vector<8x33xbf16>, vector<33x65xbf16>, vector<8x65xf32> -> vector<8x65xf32>
    %595 = arith.truncf %592 : vector<8x33xf32> to vector<8x33xbf16>
    %cst_203 = arith.constant dense<0.000000e+00> : vector<8x65xf32>
    %596 = tpu.matmul %595, %0, %cst_203 {dimension_numbers = #tpu.dot_dimension_numbers<[1], [0], [0], [1], [0, 0, 1, 1], [], []>} : vector<8x33xbf16>, vector<33x65xbf16>, vector<8x65xf32> -> vector<8x65xf32>
    %597 = math.tanh %594 : vector<8x65xf32>
    %598 = math.tanh %596 : vector<8x65xf32>
    %599 = arith.truncf %597 : vector<8x65xf32> to vector<8x65xbf16>
    %cst_204 = arith.constant dense<0.000000e+00> : vector<8x33xf32>
    %600 = tpu.matmul %599, %1, %cst_204 {dimension_numbers = #tpu.dot_dimension_numbers<[1], [0], [0], [1], [0, 0, 1, 1], [], []>} : vector<8x65xbf16>, vector<65x33xbf16>, vector<8x33xf32> -> vector<8x33xf32>
    %601 = arith.truncf %598 : vector<8x65xf32> to vector<8x65xbf16>
    %cst_205 = arith.constant dense<0.000000e+00> : vector<8x33xf32>
    %602 = tpu.matmul %601, %1, %cst_205 {dimension_numbers = #tpu.dot_dimension_numbers<[1], [0], [0], [1], [0, 0, 1, 1], [], []>} : vector<8x65xbf16>, vector<65x33xbf16>, vector<8x33xf32> -> vector<8x33xf32>
    %603 = vector.broadcast %556 : f32 to vector<8x33xf32>
    %604 = arith.mulf %603, %600 : vector<8x33xf32>
    %605 = arith.addf %538, %604 : vector<8x33xf32>
    %606 = vector.broadcast %556 : f32 to vector<8x33xf32>
    %607 = arith.mulf %606, %602 : vector<8x33xf32>
    %608 = arith.addf %549, %607 : vector<8x33xf32>
    %609 = arith.truncf %605 : vector<8x33xf32> to vector<8x33xbf16>
    %cst_206 = arith.constant dense<0.000000e+00> : vector<8x65xf32>
    %610 = tpu.matmul %609, %0, %cst_206 {dimension_numbers = #tpu.dot_dimension_numbers<[1], [0], [0], [1], [0, 0, 1, 1], [], []>} : vector<8x33xbf16>, vector<33x65xbf16>, vector<8x65xf32> -> vector<8x65xf32>
    %611 = arith.truncf %608 : vector<8x33xf32> to vector<8x33xbf16>
    %cst_207 = arith.constant dense<0.000000e+00> : vector<8x65xf32>
    %612 = tpu.matmul %611, %0, %cst_207 {dimension_numbers = #tpu.dot_dimension_numbers<[1], [0], [0], [1], [0, 0, 1, 1], [], []>} : vector<8x33xbf16>, vector<33x65xbf16>, vector<8x65xf32> -> vector<8x65xf32>
    %613 = math.tanh %610 : vector<8x65xf32>
    %614 = math.tanh %612 : vector<8x65xf32>
    %615 = arith.truncf %613 : vector<8x65xf32> to vector<8x65xbf16>
    %cst_208 = arith.constant dense<0.000000e+00> : vector<8x33xf32>
    %616 = tpu.matmul %615, %1, %cst_208 {dimension_numbers = #tpu.dot_dimension_numbers<[1], [0], [0], [1], [0, 0, 1, 1], [], []>} : vector<8x65xbf16>, vector<65x33xbf16>, vector<8x33xf32> -> vector<8x33xf32>
    %617 = arith.truncf %614 : vector<8x65xf32> to vector<8x65xbf16>
    %cst_209 = arith.constant dense<0.000000e+00> : vector<8x33xf32>
    %618 = tpu.matmul %617, %1, %cst_209 {dimension_numbers = #tpu.dot_dimension_numbers<[1], [0], [0], [1], [0, 0, 1, 1], [], []>} : vector<8x65xbf16>, vector<65x33xbf16>, vector<8x33xf32> -> vector<8x33xf32>
    %cst_210 = arith.constant 0.166666672 : f32
    %619 = arith.mulf %556, %cst_210 : f32
    %cst_211 = arith.constant 2.000000e+00 : f32
    %620 = vector.broadcast %cst_211 : f32 to vector<8x33xf32>
    %621 = arith.mulf %620, %582 : vector<8x33xf32>
    %622 = arith.addf %564, %621 : vector<8x33xf32>
    %cst_212 = arith.constant 2.000000e+00 : f32
    %623 = vector.broadcast %cst_212 : f32 to vector<8x33xf32>
    %624 = arith.mulf %623, %600 : vector<8x33xf32>
    %625 = arith.addf %622, %624 : vector<8x33xf32>
    %626 = arith.addf %625, %616 : vector<8x33xf32>
    %627 = vector.broadcast %619 : f32 to vector<8x33xf32>
    %628 = arith.mulf %627, %626 : vector<8x33xf32>
    %629 = arith.addf %538, %628 : vector<8x33xf32>
    %cst_213 = arith.constant 0.166666672 : f32
    %630 = arith.mulf %556, %cst_213 : f32
    %cst_214 = arith.constant 2.000000e+00 : f32
    %631 = vector.broadcast %cst_214 : f32 to vector<8x33xf32>
    %632 = arith.mulf %631, %584 : vector<8x33xf32>
    %633 = arith.addf %566, %632 : vector<8x33xf32>
    %cst_215 = arith.constant 2.000000e+00 : f32
    %634 = vector.broadcast %cst_215 : f32 to vector<8x33xf32>
    %635 = arith.mulf %634, %602 : vector<8x33xf32>
    %636 = arith.addf %633, %635 : vector<8x33xf32>
    %637 = arith.addf %636, %618 : vector<8x33xf32>
    %638 = vector.broadcast %630 : f32 to vector<8x33xf32>
    %639 = arith.mulf %638, %637 : vector<8x33xf32>
    %640 = arith.addf %549, %639 : vector<8x33xf32>
    %641 = vector.extract_strided_slice %629 {offsets = [0, 0], sizes = [8, 32], strides = [1, 1]} : vector<8x33xf32> to vector<8x32xf32>
    %c0_216 = arith.constant 0 : index
    %c224 = arith.constant 224 : index
    %642 = vector.load %arg4[%c0_216, %c224] : memref<16x256xf32, #tpu.memory_space<vmem>>, vector<8x32xf32>
    tpu.vector_store %arg4[%c0_216, %c224], %641 {strides = array<i32>} : memref<16x256xf32, #tpu.memory_space<vmem>>, vector<8x32xf32>,
    %643 = vector.extract_strided_slice %640 {offsets = [0, 0], sizes = [8, 32], strides = [1, 1]} : vector<8x33xf32> to vector<8x32xf32>
    %c8_217 = arith.constant 8 : index
    %c224_218 = arith.constant 224 : index
    %644 = vector.load %arg4[%c8_217, %c224_218] : memref<16x256xf32, #tpu.memory_space<vmem>>, vector<8x32xf32>
    tpu.vector_store %arg4[%c8_217, %c224_218], %643 {strides = array<i32>} : memref<16x256xf32, #tpu.memory_space<vmem>>, vector<8x32xf32>,
    return
  }
}

</mosaic_0001>

<bundles_post_ra>
// kernel: diffeq_solver_forward.1
= control target key start
LH: loop header
LB: loop body
LE: loop exit
PB: predicated region body
PF: predicated region fallthrough
CT: control target
= control target key end

     0   :  { %9 = vsyncpa [#allocation3], 0  ;;  %s9431_s0 = inlined_call_operand.vmem [shape: f32[8], index: 0, kind: input, shape index: {}]   ;;  %s9432_s1 = inlined_call_operand.vmem [shape: f32[16,33], index: 1, kind: input, shape index: {}]   ;;  %s9433_s2 = inlined_call_operand.vmem [shape: bf16[33,65], index: 2, kind: input, shape index: {}]   ;;  %s9434_s3 = inlined_call_operand.vmem [shape: bf16[65,33], index: 3, kind: input, shape index: {}]   ;;  %s9435_s4 = inlined_call_operand.vmem [shape: f32[16,256], index: 4, kind: output, shape index: {}]  }
   0x1   :  { %s16_s17 = sshll.u32 %s9431_s0, 4  ;;  %s17_s17 = int_to_ptr.vmem [resolvable:$true] %s16_s17 }
   0x2   :  { %s7577_s18 = scalar_lea.vmem %s17_s17, 16  ;;  %p7582_p1 = scmp.lt.s32.totalorder %s17_s17, %s17_s17 }
   0x3   :  { %p7578_p0 = scmp.ne.s32.totalorder %s17_s17, %s7577_s18  ;;  %p7583_p2 = scmp.lt.s32.totalorder %s7577_s18, %s7577_s18 }
   0x5   :  { %p7584_p3 = por %p7583_p2, %p7582_p1 }
   0x7   :  { %p7585_p4 = pnand %p7584_p3, %p7578_p0 }
   0x9   :  { %7588 = shalt.err (!%p7585_p4)
}
   0xa   :  { %s7591_s19 = smov [#allocation2]  }
   0xb   :  { %19 = dma.vmem_to_smem %s17_s17, 16, %s7591_s19, [#allocation3]  }
   0xc   :  { %7589 = dma.done.wait [#allocation3], 16  }
   0xd   :  { %7590 = vsyncadd [#allocation3], 4294967280 }
   0xe   :  { %29 = sfence }
   0xf   :  { %v7629_v0 = vld [vmem:[%s9433_s2] sm:$0xff]   ;;  %v7592_v1 = vmov 0.0   ;;  %v7636_v2 = vld [vmem:[%s9433_s2 + $0x8] sm:$0xff]   ;;  %vm73_vm0 = vcmask 1040384   ;;  %v7593_v4 = vmov 0   ;;  %vm7594_vm1 = vmmov 0  }
  0x10   :  { %6088 = vmatprep.subr.bf16.mxu0 %v7592_v1  ;;  %6098 = vmatprep.subr.bf16.mxu1 %v7592_v1  ;;  %v7441_v3 = vld [vmem:[%s9433_s2 + $0x10] ss:$0 sps:$4 sm:$0x11]   ;;  %v75_v5 = vsel %vm73_vm0, 65535, %v7593_v4  ;;  %v7652_v6 = vld [vmem:[%s9432_s1] sm:$0xff]  ;;  %v7657_v7 = vld [vmem:[%s9432_s1 + $0x8] sm:$0xff] }
  0x11   :  { %6089 = vmatpush3.bf16.msra.mxu0 %v7629_v0  ;;  %6099 = vmatpush3.bf16.msra.mxu1 %v7629_v0  ;;  %v7661_v8 = vand.u32 %v7441_v3, %v75_v5  ;;  %v53_v9 = vpack.c.bf16 %v7652_v6, %v7652_v6  ;;  %v119_v10 = vpack.c.bf16 %v7657_v7, %v7657_v7  ;;  %vm69_vm2 = vcmask 269312   ;;  %v7674_v11 = vld [vmem:[%s9434_s3] sm:$0xff]   ;;  %v7685_v12 = vld [vmem:[%s9434_s3 + $0x8] sm:$0xff]   ;;  %v7700_v13 = vld [vmem:[%s9434_s3 + $0x10] sm:$0xff]   ;;  %s7742_s12 = sld [smem:[#allocation2 + $0x1]]  ;;  %s51_s13 = sld [smem:[#allocation2]] }
  0x12   :  { %6090 = vmatprep.subr.bf16.mxu0 %v7592_v1  ;;  %6100 = vmatprep.subr.bf16.mxu1 %v7592_v1  ;;  %v7709_v14 = vld [vmem:[%s9434_s3 + $0x18] sm:$0xff]   ;;  %v7446_v15 = vld [vmem:[%s9434_s3 + $0x20] ss:$0 sps:$4 sm:$0x11]   ;;  %vm193_vm3 = vcmask 531456   ;;  %vm47_vm4 = vcmask 261120  }
  0x13   :  { %6094 = vmatprep.mubr.msk.bf16.mxu0 %vm7594_vm1, %v7592_v1  ;;  %6104 = vmatprep.mubr.msk.bf16.mxu1 %vm7594_vm1, %v7592_v1  ;;  %v7718_v16 = vand.u32 %v7446_v15, %v75_v5  ;;  %48 = vst.msk [vmem:[%s9435_s4] sm:$0xff] %vm47_vm4, %v7652_v6  ;;  %49 = vst.msk [vmem:[%s9435_s4 + $0x10] sm:$0xff] %vm47_vm4, %v7657_v7  ;;  %s7595_s21 = smov 32   ;;  %vm853_vm5 = vcmask 523520   ;;  %s7990_s25 = sld [smem:[#allocation2 + $0x2]]  ;;  %vm1610_vm6 = vcmask 785920  }
  0x14   :  { %s8259_s19 = sld [smem:[#allocation2 + $0x3]]  ;;  %s7597_s23 = smov 96   ;;  %vm2367_vm7 = vcmask 1048320  }
  0x15   :  { %6091 = vmatpush3.bf16.msra.mxu0 %v7636_v2  ;;  %6101 = vmatpush3.bf16.msra.mxu1 %v7636_v2  ;;  %s8498_s28 = sld [smem:[#allocation2 + $0x4]]  ;;  %s9014_s7 = sld [smem:[#allocation2 + $0x6]] }
  0x16   :  { %6092 = vmatprep.subr.bf16.mxu0 %v7592_v1  ;;  %6102 = vmatprep.subr.bf16.mxu1 %v7592_v1 }
  0x17   :  { %s7745_s14 = ssub.f32 %s7742_s12, %s51_s13 }
  0x19   :  { %6093 = vmatpush3.bf16.msra.mxu0 %v7661_v8  ;;  %6103 = vmatpush3.bf16.msra.mxu1 %v7661_v8  ;;  %s284_s15 = smul.f32 0.5, %s7745_s14  ;;  %s7994_s26 = ssub.f32 %s7990_s25, %s7742_s12 }
  0x1a   :  { %6108 = vmatprep.subr.bf16.mxu0 %v7592_v1  ;;  %6122 = vmatprep.subr.bf16.mxu1 %v7592_v1  ;;  %s833_s20 = smul.f32 0.16666667, %s7745_s14 }
  0x1b   :  { %v7748_v29 = vstv %s284_s15  ;;  %s1041_s27 = smul.f32 0.5, %s7994_s26  ;;  %s8502_s1 = ssub.f32 %s8498_s28, %s8259_s19 }
  0x1c   :  { %6095 = vmatmul.mubr.msk.bf16.vlgmr.msra.gmra.mrb[0].mxu0 %vm69_vm2, %v53_v9  ;;  %6105 = vmatmul.mubr.msk.bf16.vlgmr.msra.gmra.mrb[0].mxu1 %vm69_vm2, %v119_v10  ;;  %s1590_s13 = smul.f32 0.16666667, %s7994_s26 }
  0x1d   :  { %6109 = vmatpush3.bf16.msra.mxu0 %v7674_v11  ;;  %6123 = vmatpush3.bf16.msra.mxu1 %v7674_v11  ;;  %s2555_s29 = smul.f32 0.5, %s8502_s1 }
  0x1e   :  { %6110 = vmatprep.subr.bf16.mxu0 %v7592_v1  ;;  %6124 = vmatprep.subr.bf16.mxu1 %v7592_v1  ;;  %s3104_s17 = smul.f32 0.16666667, %s8502_s1 }
  0x1f   :  { %6118 = vmatprep.mubr.msk.bf16.mxu0 %vm7594_vm1, %v7592_v1  ;;  %6132 = vmatprep.mubr.msk.bf16.mxu1 %vm7594_vm1, %v7592_v1 }
  0x21   :  { %6111 = vmatpush3.bf16.msra.mxu0 %v7685_v12  ;;  %6125 = vmatpush3.bf16.msra.mxu1 %v7685_v12 }
  0x22   :  { %6112 = vmatprep.subr.bf16.mxu0 %v7592_v1  ;;  %6126 = vmatprep.subr.bf16.mxu1 %v7592_v1 }
  0x25   :  { %6113 = vmatpush3.bf16.msra.mxu0 %v7700_v13  ;;  %6127 = vmatpush3.bf16.msra.mxu1 %v7700_v13 }
  0x26   :  { %6114 = vmatprep.subr.bf16.mxu0 %v7592_v1  ;;  %6128 = vmatprep.subr.bf16.mxu1 %v7592_v1 }
  0x29   :  { %6115 = vmatpush3.bf16.msra.mxu0 %v7709_v14  ;;  %6129 = vmatpush3.bf16.msra.mxu1 %v7709_v14 }
  0x2a   :  { %6116 = vmatprep.subr.bf16.mxu0 %v7592_v1  ;;  %6130 = vmatprep.subr.bf16.mxu1 %v7592_v1 }
  0x2d   :  { %6117 = vmatpush3.bf16.msra.mxu0 %v7718_v16  ;;  %6131 = vmatpush3.bf16.msra.mxu1 %v7718_v16 }
  0x2e   :  { %6136 = vmatprep.subr.bf16.mxu0 %v7592_v1  ;;  %6146 = vmatprep.subr.bf16.mxu1 %v7592_v1 }
  0xef   :  { %v113_v17 = vpop.f32.mrb[0].mxu0  ;;  %v157_v18 = vpop.f32.mrb[0].mxu1 }
  0xf0   :  { %7447 = vtanh.f32 %v113_v17  ;;  %v6096_v19 = vpop.f32.mrb[1].mxu0  ;;  %v6106_v20 = vpop.f32.mrb[1].mxu1 }
  0xf1   :  { %7449 = vtanh.f32 %v157_v18  ;;  %v116_v21 = vpop.f32.mrb[2].mxu0  ;;  %v160_v22 = vpop.f32.mrb[2].mxu1 }
  0xf2   :  { %v6097_v23 = vpop.f32.mrb[3].mxu0  ;;  %v6107_v24 = vpop.f32.mrb[3].mxu1 }
  0xfa   :  { %v7448_v25 = vpop.eup %7447 }
  0xfb   :  { %v7450_v26 = vpop.eup %7449  ;;  %v165_v27 = vpack.c.bf16 %v7448_v25, %v7448_v25 }
  0xfc   :  { %v240_v28 = vpack.c.bf16 %v7450_v26, %v7450_v26 }
  0xfd   :  { %6119 = vmatmul.mubr.msk.bf16.vlgmr.msra.gmra.mrb[4].mxu0 %vm193_vm3, %v165_v27 }
  0xfe   :  { %6133 = vmatmul.mubr.msk.bf16.vlgmr.msra.gmra.mrb[4].mxu1 %vm193_vm3, %v240_v28  ;;  %6137 = vmatpush3.bf16.msra.mxu0 %v7629_v0 }
  0xff   :  { %6147 = vmatpush3.bf16.msra.mxu1 %v7629_v0  ;;  %6138 = vmatprep.subr.bf16.mxu0 %v7592_v1 }
 0x100   :  { %6148 = vmatprep.subr.bf16.mxu1 %v7592_v1  ;;  %6142 = vmatprep.mubr.msk.bf16.mxu0 %vm7594_vm1, %v7592_v1 }
 0x101   :  { %6152 = vmatprep.mubr.msk.bf16.mxu1 %vm7594_vm1, %v7592_v1 }
 0x102   :  { %6139 = vmatpush3.bf16.msra.mxu0 %v7636_v2 }
 0x103   :  { %6149 = vmatpush3.bf16.msra.mxu1 %v7636_v2  ;;  %6140 = vmatprep.subr.bf16.mxu0 %v7592_v1 }
 0x104   :  { %6150 = vmatprep.subr.bf16.mxu1 %v7592_v1 }
 0x106   :  { %6141 = vmatpush3.bf16.msra.mxu0 %v7661_v8 }
 0x107   :  { %6151 = vmatpush3.bf16.msra.mxu1 %v7661_v8  ;;  %6156 = vmatprep.subr.bf16.mxu0 %v7592_v1 }
 0x108   :  { %6170 = vmatprep.subr.bf16.mxu1 %v7592_v1 }
 0x1d0   :  { %v7750_v30 = vpop.f32.mrb[4].mxu0 }
 0x1d1   :  { %v286_v31 = vmul.f32 %v7748_v29, %v7750_v30  ;;  %v7754_v32 = vpop.f32.mrb[4].mxu1  ;;  %v6120_v33 = vpop.f32.mrb[5].mxu0 }
 0x1d2   :  { %v288_v34 = vmul.f32 %v7748_v29, %v7754_v32  ;;  %v6134_v35 = vpop.f32.mrb[5].mxu1  ;;  %v237_v36 = vpop.f32.mrb[6].mxu0  ;;  %v650_v33 = vstv %s7745_s14  ;;  %s7596_s14 = smov 64  }
 0x1d3   :  { %v287_v37 = vadd.f32 %v286_v31, %v7652_v6  ;;  %v281_v38 = vpop.f32.mrb[6].mxu1  ;;  %v6121_v39 = vpop.f32.mrb[7].mxu0 }
 0x1d4   :  { %v289_v40 = vadd.f32 %v288_v34, %v7657_v7  ;;  %v6135_v41 = vpop.f32.mrb[7].mxu1 }
 0x1d5   :  { %v290_v42 = vpack.c.bf16 %v287_v37, %v287_v37 }
 0x1d6   :  { %v334_v43 = vpack.c.bf16 %v289_v40, %v289_v40 }
 0x1d7   :  { %6143 = vmatmul.mubr.msk.bf16.vlgmr.msra.gmra.mrb[8].mxu0 %vm69_vm2, %v290_v42 }
 0x1d8   :  { %6153 = vmatmul.mubr.msk.bf16.vlgmr.msra.gmra.mrb[8].mxu1 %vm69_vm2, %v334_v43  ;;  %6157 = vmatpush3.bf16.msra.mxu0 %v7674_v11 }
 0x1d9   :  { %6171 = vmatpush3.bf16.msra.mxu1 %v7674_v11  ;;  %6158 = vmatprep.subr.bf16.mxu0 %v7592_v1 }
 0x1da   :  { %6172 = vmatprep.subr.bf16.mxu1 %v7592_v1  ;;  %6166 = vmatprep.mubr.msk.bf16.mxu0 %vm7594_vm1, %v7592_v1 }
 0x1db   :  { %6180 = vmatprep.mubr.msk.bf16.mxu1 %vm7594_vm1, %v7592_v1 }
 0x1dc   :  { %6159 = vmatpush3.bf16.msra.mxu0 %v7685_v12 }
 0x1dd   :  { %6173 = vmatpush3.bf16.msra.mxu1 %v7685_v12  ;;  %6160 = vmatprep.subr.bf16.mxu0 %v7592_v1 }
 0x1de   :  { %6174 = vmatprep.subr.bf16.mxu1 %v7592_v1 }
 0x1e0   :  { %6161 = vmatpush3.bf16.msra.mxu0 %v7700_v13 }
 0x1e1   :  { %6175 = vmatpush3.bf16.msra.mxu1 %v7700_v13  ;;  %6162 = vmatprep.subr.bf16.mxu0 %v7592_v1 }
 0x1e2   :  { %6176 = vmatprep.subr.bf16.mxu1 %v7592_v1 }
 0x1e4   :  { %6163 = vmatpush3.bf16.msra.mxu0 %v7709_v14 }
 0x1e5   :  { %6177 = vmatpush3.bf16.msra.mxu1 %v7709_v14  ;;  %6164 = vmatprep.subr.bf16.mxu0 %v7592_v1 }
 0x1e6   :  { %6178 = vmatprep.subr.bf16.mxu1 %v7592_v1 }
 0x1e8   :  { %6165 = vmatpush3.bf16.msra.mxu0 %v7718_v16 }
 0x1e9   :  { %6179 = vmatpush3.bf16.msra.mxu1 %v7718_v16  ;;  %6184 = vmatprep.subr.bf16.mxu0 %v7592_v1 }
 0x1ea   :  { %6194 = vmatprep.subr.bf16.mxu1 %v7592_v1 }
 0x2aa   :  { %v328_v44 = vpop.f32.mrb[8].mxu0 }
 0x2ab   :  { %7451 = vtanh.f32 %v328_v44  ;;  %v372_v45 = vpop.f32.mrb[8].mxu1  ;;  %v6144_v46 = vpop.f32.mrb[9].mxu0 }
 0x2ac   :  { %7453 = vtanh.f32 %v372_v45  ;;  %v6154_v47 = vpop.f32.mrb[9].mxu1  ;;  %v331_v48 = vpop.f32.mrb[10].mxu0 }
 0x2ad   :  { %v375_v49 = vpop.f32.mrb[10].mxu1  ;;  %v6145_v50 = vpop.f32.mrb[11].mxu0 }
 0x2ae   :  { %v6155_v51 = vpop.f32.mrb[11].mxu1 }
 0x2b5   :  { %v7452_v52 = vpop.eup %7451 }
 0x2b6   :  { %v7454_v53 = vpop.eup %7453  ;;  %v380_v54 = vpack.c.bf16 %v7452_v52, %v7452_v52 }
 0x2b7   :  { %v424_v55 = vpack.c.bf16 %v7454_v53, %v7454_v53 }
 0x2b8   :  { %6167 = vmatmul.mubr.msk.bf16.vlgmr.msra.gmra.mrb[12].mxu0 %vm193_vm3, %v380_v54 }
 0x2b9   :  { %6181 = vmatmul.mubr.msk.bf16.vlgmr.msra.gmra.mrb[12].mxu1 %vm193_vm3, %v424_v55  ;;  %6185 = vmatpush3.bf16.msra.mxu0 %v7629_v0 }
 0x2ba   :  { %6195 = vmatpush3.bf16.msra.mxu1 %v7629_v0  ;;  %6186 = vmatprep.subr.bf16.mxu0 %v7592_v1 }
 0x2bb   :  { %6196 = vmatprep.subr.bf16.mxu1 %v7592_v1  ;;  %6190 = vmatprep.mubr.msk.bf16.mxu0 %vm7594_vm1, %v7592_v1 }
 0x2bc   :  { %6200 = vmatprep.mubr.msk.bf16.mxu1 %vm7594_vm1, %v7592_v1 }
 0x2bd   :  { %6187 = vmatpush3.bf16.msra.mxu0 %v7636_v2 }
 0x2be   :  { %6197 = vmatpush3.bf16.msra.mxu1 %v7636_v2  ;;  %6188 = vmatprep.subr.bf16.mxu0 %v7592_v1 }
 0x2bf   :  { %6198 = vmatprep.subr.bf16.mxu1 %v7592_v1 }
 0x2c1   :  { %6189 = vmatpush3.bf16.msra.mxu0 %v7661_v8 }
 0x2c2   :  { %6199 = vmatpush3.bf16.msra.mxu1 %v7661_v8  ;;  %6204 = vmatprep.subr.bf16.mxu0 %v7592_v1 }
 0x2c3   :  { %6218 = vmatprep.subr.bf16.mxu1 %v7592_v1 }
 0x38b   :  { %v418_v56 = vpop.f32.mrb[12].mxu0 }
 0x38c   :  { %v468_v57 = vmul.f32 %v418_v56, %v7748_v29  ;;  %v834_v58 = vmul.f32 2.0, %v418_v56  ;;  %v462_v59 = vpop.f32.mrb[12].mxu1  ;;  %v6168_v60 = vpop.f32.mrb[13].mxu0 }
 0x38d   :  { %v470_v61 = vmul.f32 %v462_v59, %v7748_v29  ;;  %v842_v62 = vmul.f32 2.0, %v462_v59  ;;  %v6182_v63 = vpop.f32.mrb[13].mxu1  ;;  %v421_v3 = vpop.f32.mrb[14].mxu0 }
 0x38e   :  { %v469_v4 = vadd.f32 %v468_v57, %v7652_v6  ;;  %v7808_v5 = vadd.f32 %v834_v58, %v7750_v30  ;;  %v465_v9 = vpop.f32.mrb[14].mxu1  ;;  %v6169_v10 = vpop.f32.mrb[15].mxu0 }
 0x38f   :  { %v471_v15 = vadd.f32 %v470_v61, %v7657_v7  ;;  %v7812_v17 = vadd.f32 %v842_v62, %v7754_v32  ;;  %v6183_v18 = vpop.f32.mrb[15].mxu1 }
 0x390   :  { %v472_v19 = vpack.c.bf16 %v469_v4, %v469_v4  ;;  %v839_v4 = vstv %s833_s20  ;;  %s8263_s20 = ssub.f32 %s8259_s19, %s7990_s25 }
 0x391   :  { %v516_v20 = vpack.c.bf16 %v471_v15, %v471_v15 }
 0x392   :  { %6191 = vmatmul.mubr.msk.bf16.vlgmr.msra.gmra.mrb[16].mxu0 %vm69_vm2, %v472_v19  ;;  %s1798_s0 = smul.f32 0.5, %s8263_s20 }
 0x393   :  { %6201 = vmatmul.mubr.msk.bf16.vlgmr.msra.gmra.mrb[16].mxu1 %vm69_vm2, %v516_v20  ;;  %6205 = vmatpush3.bf16.msra.mxu0 %v7674_v11  ;;  %s2347_s22 = smul.f32 0.16666667, %s8263_s20 }
 0x394   :  { %6219 = vmatpush3.bf16.msra.mxu1 %v7674_v11  ;;  %6206 = vmatprep.subr.bf16.mxu0 %v7592_v1 }
 0x395   :  { %6220 = vmatprep.subr.bf16.mxu1 %v7592_v1  ;;  %6214 = vmatprep.mubr.msk.bf16.mxu0 %vm7594_vm1, %v7592_v1 }
 0x396   :  { %6228 = vmatprep.mubr.msk.bf16.mxu1 %vm7594_vm1, %v7592_v1 }
 0x397   :  { %6207 = vmatpush3.bf16.msra.mxu0 %v7685_v12 }
 0x398   :  { %6221 = vmatpush3.bf16.msra.mxu1 %v7685_v12  ;;  %6208 = vmatprep.subr.bf16.mxu0 %v7592_v1 }
 0x399   :  { %6222 = vmatprep.subr.bf16.mxu1 %v7592_v1 }
 0x39b   :  { %6209 = vmatpush3.bf16.msra.mxu0 %v7700_v13 }
 0x39c   :  { %6223 = vmatpush3.bf16.msra.mxu1 %v7700_v13  ;;  %6210 = vmatprep.subr.bf16.mxu0 %v7592_v1 }
 0x39d   :  { %6224 = vmatprep.subr.bf16.mxu1 %v7592_v1 }
 0x39f   :  { %6211 = vmatpush3.bf16.msra.mxu0 %v7709_v14 }
 0x3a0   :  { %6225 = vmatpush3.bf16.msra.mxu1 %v7709_v14  ;;  %6212 = vmatprep.subr.bf16.mxu0 %v7592_v1 }
 0x3a1   :  { %6226 = vmatprep.subr.bf16.mxu1 %v7592_v1 }
 0x3a3   :  { %6213 = vmatpush3.bf16.msra.mxu0 %v7718_v16 }
 0x3a4   :  { %6227 = vmatpush3.bf16.msra.mxu1 %v7718_v16  ;;  %6232 = vmatprep.subr.bf16.mxu0 %v7592_v1 }
 0x3a5   :  { %6242 = vmatprep.subr.bf16.mxu1 %v7592_v1 }
 0x465   :  { %v510_v21 = vpop.f32.mrb[16].mxu0 }
 0x466   :  { %7455 = vtanh.f32 %v510_v21  ;;  %v554_v22 = vpop.f32.mrb[16].mxu1  ;;  %v6192_v23 = vpop.f32.mrb[17].mxu0 }
 0x467   :  { %7457 = vtanh.f32 %v554_v22  ;;  %v6202_v24 = vpop.f32.mrb[17].mxu1  ;;  %v513_v25 = vpop.f32.mrb[18].mxu0 }
 0x468   :  { %v557_v26 = vpop.f32.mrb[18].mxu1  ;;  %v6193_v27 = vpop.f32.mrb[19].mxu0 }
 0x469   :  { %v6203_v28 = vpop.f32.mrb[19].mxu1 }
 0x470   :  { %v7456_v29 = vpop.eup %7455 }
 0x471   :  { %v7458_v30 = vpop.eup %7457  ;;  %v562_v31 = vpack.c.bf16 %v7456_v29, %v7456_v29 }
 0x472   :  { %v606_v32 = vpack.c.bf16 %v7458_v30, %v7458_v30 }
 0x473   :  { %6215 = vmatmul.mubr.msk.bf16.vlgmr.msra.gmra.mrb[20].mxu0 %vm193_vm3, %v562_v31 }
 0x474   :  { %6229 = vmatmul.mubr.msk.bf16.vlgmr.msra.gmra.mrb[20].mxu1 %vm193_vm3, %v606_v32  ;;  %6233 = vmatpush3.bf16.msra.mxu0 %v7629_v0 }
 0x475   :  { %6243 = vmatpush3.bf16.msra.mxu1 %v7629_v0  ;;  %6234 = vmatprep.subr.bf16.mxu0 %v7592_v1 }
 0x476   :  { %6244 = vmatprep.subr.bf16.mxu1 %v7592_v1  ;;  %6238 = vmatprep.mubr.msk.bf16.mxu0 %vm7594_vm1, %v7592_v1 }
 0x477   :  { %6248 = vmatprep.mubr.msk.bf16.mxu1 %vm7594_vm1, %v7592_v1 }
 0x478   :  { %6235 = vmatpush3.bf16.msra.mxu0 %v7636_v2 }
 0x479   :  { %6245 = vmatpush3.bf16.msra.mxu1 %v7636_v2  ;;  %6236 = vmatprep.subr.bf16.mxu0 %v7592_v1 }
 0x47a   :  { %6246 = vmatprep.subr.bf16.mxu1 %v7592_v1 }
 0x47c   :  { %6237 = vmatpush3.bf16.msra.mxu0 %v7661_v8 }
 0x47d   :  { %6247 = vmatpush3.bf16.msra.mxu1 %v7661_v8  ;;  %6252 = vmatprep.subr.bf16.mxu0 %v7592_v1 }
 0x47e   :  { %6266 = vmatprep.subr.bf16.mxu1 %v7592_v1 }
 0x546   :  { %v600_v34 = vpop.f32.mrb[20].mxu0 }
 0x547   :  { %v651_v35 = vmul.f32 %v650_v33, %v600_v34  ;;  %v836_v36 = vmul.f32 2.0, %v600_v34  ;;  %v644_v37 = vpop.f32.mrb[20].mxu1  ;;  %v6216_v38 = vpop.f32.mrb[21].mxu0 }
 0x548   :  { %v653_v39 = vmul.f32 %v650_v33, %v644_v37  ;;  %v844_v40 = vmul.f32 2.0, %v644_v37  ;;  %v6230_v41 = vpop.f32.mrb[21].mxu1  ;;  %v603_v42 = vpop.f32.mrb[22].mxu0 }
 0x549   :  { %v652_v43 = vadd.f32 %v651_v35, %v7652_v6  ;;  %v647_v44 = vpop.f32.mrb[22].mxu1  ;;  %v6217_v45 = vpop.f32.mrb[23].mxu0  ;;  %v7861_v46 = vadd.f32 %v836_v36, %v7808_v5 }
 0x54a   :  { %v654_v47 = vadd.f32 %v653_v39, %v7657_v7  ;;  %v6231_v48 = vpop.f32.mrb[23].mxu1  ;;  %v7865_v49 = vadd.f32 %v844_v40, %v7812_v17  ;;  %v7997_v40 = vstv %s1041_s27 }
 0x54b   :  { %v655_v50 = vpack.c.bf16 %v652_v43, %v652_v43 }
 0x54c   :  { %v699_v51 = vpack.c.bf16 %v654_v47, %v654_v47 }
 0x54d   :  { %6239 = vmatmul.mubr.msk.bf16.vlgmr.msra.gmra.mrb[24].mxu0 %vm69_vm2, %v655_v50 }
 0x54e   :  { %6249 = vmatmul.mubr.msk.bf16.vlgmr.msra.gmra.mrb[24].mxu1 %vm69_vm2, %v699_v51  ;;  %6253 = vmatpush3.bf16.msra.mxu0 %v7674_v11 }
 0x54f   :  { %6267 = vmatpush3.bf16.msra.mxu1 %v7674_v11  ;;  %6254 = vmatprep.subr.bf16.mxu0 %v7592_v1 }
 0x550   :  { %6268 = vmatprep.subr.bf16.mxu1 %v7592_v1  ;;  %6262 = vmatprep.mubr.msk.bf16.mxu0 %vm7594_vm1, %v7592_v1 }
 0x551   :  { %6276 = vmatprep.mubr.msk.bf16.mxu1 %vm7594_vm1, %v7592_v1 }
 0x552   :  { %6255 = vmatpush3.bf16.msra.mxu0 %v7685_v12 }
 0x553   :  { %6269 = vmatpush3.bf16.msra.mxu1 %v7685_v12  ;;  %6256 = vmatprep.subr.bf16.mxu0 %v7592_v1 }
 0x554   :  { %6270 = vmatprep.subr.bf16.mxu1 %v7592_v1 }
 0x556   :  { %6257 = vmatpush3.bf16.msra.mxu0 %v7700_v13 }
 0x557   :  { %6271 = vmatpush3.bf16.msra.mxu1 %v7700_v13  ;;  %6258 = vmatprep.subr.bf16.mxu0 %v7592_v1 }
 0x558   :  { %6272 = vmatprep.subr.bf16.mxu1 %v7592_v1 }
 0x55a   :  { %6259 = vmatpush3.bf16.msra.mxu0 %v7709_v14 }
 0x55b   :  { %6273 = vmatpush3.bf16.msra.mxu1 %v7709_v14  ;;  %6260 = vmatprep.subr.bf16.mxu0 %v7592_v1 }
 0x55c   :  { %6274 = vmatprep.subr.bf16.mxu1 %v7592_v1 }
 0x55e   :  { %6261 = vmatpush3.bf16.msra.mxu0 %v7718_v16 }
 0x55f   :  { %6275 = vmatpush3.bf16.msra.mxu1 %v7718_v16  ;;  %6280 = vmatprep.subr.bf16.mxu0 %v7592_v1 }
 0x560   :  { %6290 = vmatprep.subr.bf16.mxu1 %v7592_v1 }
 0x620   :  { %v693_v52 = vpop.f32.mrb[24].mxu0 }
 0x621   :  { %7459 = vtanh.f32 %v693_v52  ;;  %v737_v53 = vpop.f32.mrb[24].mxu1  ;;  %v6240_v54 = vpop.f32.mrb[25].mxu0 }
 0x622   :  { %7461 = vtanh.f32 %v737_v53  ;;  %v6250_v55 = vpop.f32.mrb[25].mxu1  ;;  %v696_v56 = vpop.f32.mrb[26].mxu0 }
 0x623   :  { %v740_v57 = vpop.f32.mrb[26].mxu1  ;;  %v6241_v58 = vpop.f32.mrb[27].mxu0 }
 0x624   :  { %v6251_v59 = vpop.f32.mrb[27].mxu1 }
 0x62b   :  { %v7460_v60 = vpop.eup %7459 }
 0x62c   :  { %v7462_v61 = vpop.eup %7461  ;;  %v745_v62 = vpack.c.bf16 %v7460_v60, %v7460_v60 }
 0x62d   :  { %v789_v63 = vpack.c.bf16 %v7462_v61, %v7462_v61 }
 0x62e   :  { %6263 = vmatmul.mubr.msk.bf16.vlgmr.msra.gmra.mrb[28].mxu0 %vm193_vm3, %v745_v62 }
 0x62f   :  { %6277 = vmatmul.mubr.msk.bf16.vlgmr.msra.gmra.mrb[28].mxu1 %vm193_vm3, %v789_v63  ;;  %6281 = vmatpush3.bf16.msra.mxu0 %v7629_v0 }
 0x630   :  { %6291 = vmatpush3.bf16.msra.mxu1 %v7629_v0  ;;  %6282 = vmatprep.subr.bf16.mxu0 %v7592_v1 }
 0x631   :  { %6292 = vmatprep.subr.bf16.mxu1 %v7592_v1  ;;  %6286 = vmatprep.mubr.msk.bf16.mxu0 %vm7594_vm1, %v7592_v1 }
 0x632   :  { %6296 = vmatprep.mubr.msk.bf16.mxu1 %vm7594_vm1, %v7592_v1 }
 0x633   :  { %6283 = vmatpush3.bf16.msra.mxu0 %v7636_v2 }
 0x634   :  { %6293 = vmatpush3.bf16.msra.mxu1 %v7636_v2  ;;  %6284 = vmatprep.subr.bf16.mxu0 %v7592_v1 }
 0x635   :  { %6294 = vmatprep.subr.bf16.mxu1 %v7592_v1 }
 0x637   :  { %6285 = vmatpush3.bf16.msra.mxu0 %v7661_v8 }
 0x638   :  { %6295 = vmatpush3.bf16.msra.mxu1 %v7661_v8  ;;  %6300 = vmatprep.subr.bf16.mxu0 %v7592_v1 }
 0x639   :  { %6314 = vmatprep.subr.bf16.mxu1 %v7592_v1 }
 0x701   :  { %v783_v3 = vpop.f32.mrb[28].mxu0 }
 0x702   :  { %v838_v5 = vadd.f32 %v7861_v46, %v783_v3  ;;  %v827_v9 = vpop.f32.mrb[28].mxu1  ;;  %v6264_v10 = vpop.f32.mrb[29].mxu0 }
 0x703   :  { %v846_v15 = vadd.f32 %v7865_v49, %v827_v9  ;;  %v6278_v17 = vpop.f32.mrb[29].mxu1  ;;  %v786_v18 = vpop.f32.mrb[30].mxu0 }
 0x704   :  { %v840_v19 = vmul.f32 %v839_v4, %v838_v5  ;;  %v830_v20 = vpop.f32.mrb[30].mxu1  ;;  %v6265_v21 = vpop.f32.mrb[31].mxu0 }
 0x705   :  { %v847_v22 = vmul.f32 %v846_v15, %v839_v4  ;;  %v6279_v23 = vpop.f32.mrb[31].mxu1 }
 0x706   :  { %v7925_v24 = vadd.f32 %v840_v19, %v7652_v6 }
 0x707   :  { %v7928_v25 = vadd.f32 %v847_v22, %v7657_v7 }
 0x708   :  { %850 = vrot.lane.b32.xlu0 %v7925_v24, %s7595_s21  ;;  %v863_v26 = vpack.c.bf16 %v7925_v24, %v7925_v24 }
 0x709   :  { %v907_v27 = vpack.c.bf16 %v7928_v25, %v7928_v25 }
 0x70a   :  { %6287 = vmatmul.mubr.msk.bf16.vlgmr.msra.gmra.mrb[32].mxu0 %vm69_vm2, %v863_v26 }
 0x70b   :  { %6297 = vmatmul.mubr.msk.bf16.vlgmr.msra.gmra.mrb[32].mxu1 %vm69_vm2, %v907_v27  ;;  %6301 = vmatpush3.bf16.msra.mxu0 %v7674_v11 }
 0x70c   :  { %856 = vrot.lane.b32.xlu0 %v7928_v25, %s7595_s21  ;;  %6315 = vmatpush3.bf16.msra.mxu1 %v7674_v11 }
 0x70d   :  { %6302 = vmatprep.subr.bf16.mxu0 %v7592_v1  ;;  %6316 = vmatprep.subr.bf16.mxu1 %v7592_v1 }
 0x70e   :  { %6310 = vmatprep.mubr.msk.bf16.mxu0 %vm7594_vm1, %v7592_v1  ;;  %6324 = vmatprep.mubr.msk.bf16.mxu1 %vm7594_vm1, %v7592_v1 }
 0x70f   :  { %6303 = vmatpush3.bf16.msra.mxu0 %v7685_v12 }
 0x710   :  { %6317 = vmatpush3.bf16.msra.mxu1 %v7685_v12  ;;  %6304 = vmatprep.subr.bf16.mxu0 %v7592_v1 }
 0x711   :  { %6318 = vmatprep.subr.bf16.mxu1 %v7592_v1 }
 0x713   :  { %6305 = vmatpush3.bf16.msra.mxu0 %v7700_v13 }
 0x714   :  { %6319 = vmatpush3.bf16.msra.mxu1 %v7700_v13  ;;  %6306 = vmatprep.subr.bf16.mxu0 %v7592_v1 }
 0x715   :  { %6320 = vmatprep.subr.bf16.mxu1 %v7592_v1 }
 0x717   :  { %6307 = vmatpush3.bf16.msra.mxu0 %v7709_v14 }
 0x718   :  { %6321 = vmatpush3.bf16.msra.mxu1 %v7709_v14  ;;  %6308 = vmatprep.subr.bf16.mxu0 %v7592_v1 }
 0x719   :  { %6322 = vmatprep.subr.bf16.mxu1 %v7592_v1 }
 0x71b   :  { %6309 = vmatpush3.bf16.msra.mxu0 %v7718_v16 }
 0x71c   :  { %6323 = vmatpush3.bf16.msra.mxu1 %v7718_v16  ;;  %6328 = vmatprep.subr.bf16.mxu0 %v7592_v1 }
 0x71d   :  { %6338 = vmatprep.subr.bf16.mxu1 %v7592_v1 }
 0x77a   :  { %v851_v6 = vpop.permute.xlu0 %850 }
 0x77b   :  { %854 = vst.msk [vmem:[%s9435_s4] sm:$0xff] %vm853_vm5, %v851_v6 }
 0x77e   :  { %v857_v7 = vpop.permute.xlu0 %856 }
 0x77f   :  { %859 = vst.msk [vmem:[%s9435_s4 + $0x10] sm:$0xff] %vm853_vm5, %v857_v7 }
 0x7dd   :  { %v901_v28 = vpop.f32.mrb[32].mxu0 }
 0x7de   :  { %7463 = vtanh.f32 %v901_v28  ;;  %v945_v29 = vpop.f32.mrb[32].mxu1  ;;  %v6288_v30 = vpop.f32.mrb[33].mxu0 }
 0x7df   :  { %7465 = vtanh.f32 %v945_v29  ;;  %v6298_v31 = vpop.f32.mrb[33].mxu1  ;;  %v904_v32 = vpop.f32.mrb[34].mxu0 }
 0x7e0   :  { %v948_v33 = vpop.f32.mrb[34].mxu1  ;;  %v6289_v34 = vpop.f32.mrb[35].mxu0 }
 0x7e1   :  { %v6299_v35 = vpop.f32.mrb[35].mxu1 }
 0x7e8   :  { %v7464_v36 = vpop.eup %7463 }
 0x7e9   :  { %v7466_v37 = vpop.eup %7465  ;;  %v953_v38 = vpack.c.bf16 %v7464_v36, %v7464_v36 }
 0x7ea   :  { %v997_v39 = vpack.c.bf16 %v7466_v37, %v7466_v37 }
 0x7eb   :  { %6311 = vmatmul.mubr.msk.bf16.vlgmr.msra.gmra.mrb[36].mxu0 %vm193_vm3, %v953_v38  ;;  %v8094_v38 = vld [vmem:[%s9433_s2] sm:$0xff]  }
 0x7ec   :  { %6325 = vmatmul.mubr.msk.bf16.vlgmr.msra.gmra.mrb[36].mxu1 %vm193_vm3, %v997_v39  ;;  %6329 = vmatpush3.bf16.msra.mxu0 %v7629_v0  ;;  %v8107_v39 = vld [vmem:[%s9433_s2 + $0x8] sm:$0xff]  }
 0x7ed   :  { %6339 = vmatpush3.bf16.msra.mxu1 %v7629_v0  ;;  %6330 = vmatprep.subr.bf16.mxu0 %v7592_v1 }
 0x7ee   :  { %6340 = vmatprep.subr.bf16.mxu1 %v7592_v1  ;;  %6334 = vmatprep.mubr.msk.bf16.mxu0 %vm7594_vm1, %v7592_v1 }
 0x7ef   :  { %6344 = vmatprep.mubr.msk.bf16.mxu1 %vm7594_vm1, %v7592_v1 }
 0x7f0   :  { %6331 = vmatpush3.bf16.msra.mxu0 %v7636_v2 }
 0x7f1   :  { %6341 = vmatpush3.bf16.msra.mxu1 %v7636_v2  ;;  %6332 = vmatprep.subr.bf16.mxu0 %v7592_v1 }
 0x7f2   :  { %6342 = vmatprep.subr.bf16.mxu1 %v7592_v1 }
 0x7f4   :  { %6333 = vmatpush3.bf16.msra.mxu0 %v7661_v8 }
 0x7f5   :  { %6343 = vmatpush3.bf16.msra.mxu1 %v7661_v8  ;;  %6348 = vmatprep.subr.bf16.mxu0 %v7592_v1 }
 0x7f6   :  { %6362 = vmatprep.subr.bf16.mxu1 %v7592_v1 }
 0x8be   :  { %v7999_v41 = vpop.f32.mrb[36].mxu0 }
 0x8bf   :  { %v1043_v42 = vmul.f32 %v7997_v40, %v7999_v41  ;;  %v8003_v43 = vpop.f32.mrb[36].mxu1  ;;  %v6312_v44 = vpop.f32.mrb[37].mxu0 }
 0x8c0   :  { %v1045_v45 = vmul.f32 %v7997_v40, %v8003_v43  ;;  %v6326_v46 = vpop.f32.mrb[37].mxu1  ;;  %v994_v47 = vpop.f32.mrb[38].mxu0 }
 0x8c1   :  { %v1044_v48 = vadd.f32 %v1043_v42, %v7925_v24  ;;  %v1038_v49 = vpop.f32.mrb[38].mxu1  ;;  %v6313_v50 = vpop.f32.mrb[39].mxu0 }
 0x8c2   :  { %v1046_v51 = vadd.f32 %v1045_v45, %v7928_v25  ;;  %v6327_v52 = vpop.f32.mrb[39].mxu1 }
 0x8c3   :  { %v1047_v53 = vpack.c.bf16 %v1044_v48, %v1044_v48 }
 0x8c4   :  { %v1091_v54 = vpack.c.bf16 %v1046_v51, %v1046_v51 }
 0x8c5   :  { %6335 = vmatmul.mubr.msk.bf16.vlgmr.msra.gmra.mrb[40].mxu0 %vm69_vm2, %v1047_v53 }
 0x8c6   :  { %6345 = vmatmul.mubr.msk.bf16.vlgmr.msra.gmra.mrb[40].mxu1 %vm69_vm2, %v1091_v54  ;;  %6349 = vmatpush3.bf16.msra.mxu0 %v7674_v11 }
 0x8c7   :  { %6363 = vmatpush3.bf16.msra.mxu1 %v7674_v11  ;;  %6350 = vmatprep.subr.bf16.mxu0 %v7592_v1 }
 0x8c8   :  { %6364 = vmatprep.subr.bf16.mxu1 %v7592_v1  ;;  %6358 = vmatprep.mubr.msk.bf16.mxu0 %vm7594_vm1, %v7592_v1 }
 0x8c9   :  { %6372 = vmatprep.mubr.msk.bf16.mxu1 %vm7594_vm1, %v7592_v1 }
 0x8ca   :  { %6351 = vmatpush3.bf16.msra.mxu0 %v7685_v12 }
 0x8cb   :  { %6365 = vmatpush3.bf16.msra.mxu1 %v7685_v12  ;;  %6352 = vmatprep.subr.bf16.mxu0 %v7592_v1 }
 0x8cc   :  { %6366 = vmatprep.subr.bf16.mxu1 %v7592_v1 }
 0x8ce   :  { %6353 = vmatpush3.bf16.msra.mxu0 %v7700_v13 }
 0x8cf   :  { %6367 = vmatpush3.bf16.msra.mxu1 %v7700_v13  ;;  %6354 = vmatprep.subr.bf16.mxu0 %v7592_v1 }
 0x8d0   :  { %6368 = vmatprep.subr.bf16.mxu1 %v7592_v1 }
 0x8d2   :  { %6355 = vmatpush3.bf16.msra.mxu0 %v7709_v14 }
 0x8d3   :  { %6369 = vmatpush3.bf16.msra.mxu1 %v7709_v14  ;;  %6356 = vmatprep.subr.bf16.mxu0 %v7592_v1 }
 0x8d4   :  { %6370 = vmatprep.subr.bf16.mxu1 %v7592_v1 }
 0x8d6   :  { %6357 = vmatpush3.bf16.msra.mxu0 %v7718_v16 }
 0x8d7   :  { %6371 = vmatpush3.bf16.msra.mxu1 %v7718_v16  ;;  %6376 = vmatprep.subr.bf16.mxu0 %v7592_v1 }
 0x8d8   :  { %6386 = vmatprep.subr.bf16.mxu1 %v7592_v1 }
 0x998   :  { %v1085_v55 = vpop.f32.mrb[40].mxu0 }
 0x999   :  { %7467 = vtanh.f32 %v1085_v55  ;;  %v1129_v56 = vpop.f32.mrb[40].mxu1  ;;  %v6336_v57 = vpop.f32.mrb[41].mxu0 }
 0x99a   :  { %7469 = vtanh.f32 %v1129_v56  ;;  %v6346_v58 = vpop.f32.mrb[41].mxu1  ;;  %v1088_v59 = vpop.f32.mrb[42].mxu0 }
 0x99b   :  { %v1132_v60 = vpop.f32.mrb[42].mxu1  ;;  %v6337_v61 = vpop.f32.mrb[43].mxu0  ;;  %v8131_v59 = vld [vmem:[%s9434_s3] sm:$0xff]  }
 0x99c   :  { %v6347_v62 = vpop.f32.mrb[43].mxu1  ;;  %v8144_v60 = vld [vmem:[%s9434_s3 + $0x8] sm:$0xff]   ;;  %v8153_v61 = vld [vmem:[%s9434_s3 + $0x10] sm:$0xff]  }
 0x99d   :  { %v8162_v62 = vld [vmem:[%s9434_s3 + $0x18] sm:$0xff]  }
 0x9a3   :  { %v7468_v63 = vpop.eup %7467 }
 0x9a4   :  { %v7470_v3 = vpop.eup %7469  ;;  %v1137_v4 = vpack.c.bf16 %v7468_v63, %v7468_v63 }
 0x9a5   :  { %v1181_v5 = vpack.c.bf16 %v7470_v3, %v7470_v3 }
 0x9a6   :  { %6359 = vmatmul.mubr.msk.bf16.vlgmr.msra.gmra.mrb[44].mxu0 %vm193_vm3, %v1137_v4 }
 0x9a7   :  { %6373 = vmatmul.mubr.msk.bf16.vlgmr.msra.gmra.mrb[44].mxu1 %vm193_vm3, %v1181_v5  ;;  %6377 = vmatpush3.bf16.msra.mxu0 %v7629_v0 }
 0x9a8   :  { %6387 = vmatpush3.bf16.msra.mxu1 %v7629_v0  ;;  %6378 = vmatprep.subr.bf16.mxu0 %v7592_v1 }
 0x9a9   :  { %6388 = vmatprep.subr.bf16.mxu1 %v7592_v1  ;;  %6382 = vmatprep.mubr.msk.bf16.mxu0 %vm7594_vm1, %v7592_v1 }
 0x9aa   :  { %6392 = vmatprep.mubr.msk.bf16.mxu1 %vm7594_vm1, %v7592_v1 }
 0x9ab   :  { %6379 = vmatpush3.bf16.msra.mxu0 %v7636_v2 }
 0x9ac   :  { %6389 = vmatpush3.bf16.msra.mxu1 %v7636_v2  ;;  %6380 = vmatprep.subr.bf16.mxu0 %v7592_v1 }
 0x9ad   :  { %6390 = vmatprep.subr.bf16.mxu1 %v7592_v1 }
 0x9af   :  { %6381 = vmatpush3.bf16.msra.mxu0 %v7661_v8 }
 0x9b0   :  { %6391 = vmatpush3.bf16.msra.mxu1 %v7661_v8  ;;  %6396 = vmatprep.subr.bf16.mxu0 %v7592_v1 }
 0x9b1   :  { %6410 = vmatprep.subr.bf16.mxu1 %v7592_v1 }
 0xa79   :  { %v1175_v0 = vpop.f32.mrb[44].mxu0 }
 0xa7a   :  { %v1225_v9 = vmul.f32 %v1175_v0, %v7997_v40  ;;  %v1591_v10 = vmul.f32 2.0, %v1175_v0  ;;  %v1219_v15 = vpop.f32.mrb[44].mxu1  ;;  %v6360_v17 = vpop.f32.mrb[45].mxu0 }
 0xa7b   :  { %v1227_v2 = vmul.f32 %v1219_v15, %v7997_v40  ;;  %v1599_v18 = vmul.f32 2.0, %v1219_v15  ;;  %v6374_v19 = vpop.f32.mrb[45].mxu1  ;;  %v1178_v20 = vpop.f32.mrb[46].mxu0  ;;  %v1407_v40 = vstv %s7994_s26 }
 0xa7c   :  { %v1226_v21 = vadd.f32 %v1225_v9, %v7925_v24  ;;  %v8057_v22 = vadd.f32 %v1591_v10, %v7999_v41  ;;  %v1222_v23 = vpop.f32.mrb[46].mxu1  ;;  %v6361_v26 = vpop.f32.mrb[47].mxu0 }
 0xa7d   :  { %v1228_v27 = vadd.f32 %v1227_v2, %v7928_v25  ;;  %v8061_v6 = vadd.f32 %v1599_v18, %v8003_v43  ;;  %v6375_v7 = vpop.f32.mrb[47].mxu1 }
 0xa7e   :  { %v1229_v28 = vpack.c.bf16 %v1226_v21, %v1226_v21  ;;  %v1596_v21 = vstv %s1590_s13 }
 0xa7f   :  { %v1273_v29 = vpack.c.bf16 %v1228_v27, %v1228_v27 }
 0xa80   :  { %6383 = vmatmul.mubr.msk.bf16.vlgmr.msra.gmra.mrb[48].mxu0 %vm69_vm2, %v1229_v28 }
 0xa81   :  { %6393 = vmatmul.mubr.msk.bf16.vlgmr.msra.gmra.mrb[48].mxu1 %vm69_vm2, %v1273_v29  ;;  %6397 = vmatpush3.bf16.msra.mxu0 %v7674_v11 }
 0xa82   :  { %6411 = vmatpush3.bf16.msra.mxu1 %v7674_v11  ;;  %6398 = vmatprep.subr.bf16.mxu0 %v7592_v1 }
 0xa83   :  { %6412 = vmatprep.subr.bf16.mxu1 %v7592_v1  ;;  %6406 = vmatprep.mubr.msk.bf16.mxu0 %vm7594_vm1, %v7592_v1 }
 0xa84   :  { %6420 = vmatprep.mubr.msk.bf16.mxu1 %vm7594_vm1, %v7592_v1 }
 0xa85   :  { %6399 = vmatpush3.bf16.msra.mxu0 %v7685_v12 }
 0xa86   :  { %6413 = vmatpush3.bf16.msra.mxu1 %v7685_v12  ;;  %6400 = vmatprep.subr.bf16.mxu0 %v7592_v1 }
 0xa87   :  { %6414 = vmatprep.subr.bf16.mxu1 %v7592_v1 }
 0xa89   :  { %6401 = vmatpush3.bf16.msra.mxu0 %v7700_v13 }
 0xa8a   :  { %6415 = vmatpush3.bf16.msra.mxu1 %v7700_v13  ;;  %6402 = vmatprep.subr.bf16.mxu0 %v7592_v1 }
 0xa8b   :  { %6416 = vmatprep.subr.bf16.mxu1 %v7592_v1 }
 0xa8d   :  { %6403 = vmatpush3.bf16.msra.mxu0 %v7709_v14 }
 0xa8e   :  { %6417 = vmatpush3.bf16.msra.mxu1 %v7709_v14  ;;  %6404 = vmatprep.subr.bf16.mxu0 %v7592_v1 }
 0xa8f   :  { %6418 = vmatprep.subr.bf16.mxu1 %v7592_v1 }
 0xa91   :  { %6405 = vmatpush3.bf16.msra.mxu0 %v7718_v16 }
 0xa92   :  { %6419 = vmatpush3.bf16.msra.mxu1 %v7718_v16  ;;  %6424 = vmatprep.subr.bf16.mxu0 %v7592_v1 }
 0xa93   :  { %6434 = vmatprep.subr.bf16.mxu1 %v7592_v1 }
 0xb53   :  { %v1267_v11 = vpop.f32.mrb[48].mxu0 }
 0xb54   :  { %7471 = vtanh.f32 %v1267_v11  ;;  %v1311_v12 = vpop.f32.mrb[48].mxu1  ;;  %v6384_v13 = vpop.f32.mrb[49].mxu0 }
 0xb55   :  { %7473 = vtanh.f32 %v1311_v12  ;;  %v6394_v30 = vpop.f32.mrb[49].mxu1  ;;  %v1270_v31 = vpop.f32.mrb[50].mxu0 }
 0xb56   :  { %v1314_v14 = vpop.f32.mrb[50].mxu1  ;;  %v6385_v32 = vpop.f32.mrb[51].mxu0 }
 0xb57   :  { %v6395_v33 = vpop.f32.mrb[51].mxu1 }
 0xb5e   :  { %v7472_v34 = vpop.eup %7471 }
 0xb5f   :  { %v7474_v35 = vpop.eup %7473  ;;  %v1319_v36 = vpack.c.bf16 %v7472_v34, %v7472_v34 }
 0xb60   :  { %v1363_v37 = vpack.c.bf16 %v7474_v35, %v7474_v35 }
 0xb61   :  { %6407 = vmatmul.mubr.msk.bf16.vlgmr.msra.gmra.mrb[52].mxu0 %vm193_vm3, %v1319_v36 }
 0xb62   :  { %6421 = vmatmul.mubr.msk.bf16.vlgmr.msra.gmra.mrb[52].mxu1 %vm193_vm3, %v1363_v37  ;;  %6425 = vmatpush3.bf16.msra.mxu0 %v8094_v38 }
 0xb63   :  { %6435 = vmatpush3.bf16.msra.mxu1 %v8094_v38  ;;  %6426 = vmatprep.subr.bf16.mxu0 %v7592_v1 }
 0xb64   :  { %6436 = vmatprep.subr.bf16.mxu1 %v7592_v1  ;;  %6430 = vmatprep.mubr.msk.bf16.mxu0 %vm7594_vm1, %v7592_v1 }
 0xb65   :  { %6440 = vmatprep.mubr.msk.bf16.mxu1 %vm7594_vm1, %v7592_v1 }
 0xb66   :  { %6427 = vmatpush3.bf16.msra.mxu0 %v8107_v39 }
 0xb67   :  { %6437 = vmatpush3.bf16.msra.mxu1 %v8107_v39  ;;  %6428 = vmatprep.subr.bf16.mxu0 %v7592_v1 }
 0xb68   :  { %6438 = vmatprep.subr.bf16.mxu1 %v7592_v1 }
 0xb6a   :  { %6429 = vmatpush3.bf16.msra.mxu0 %v7661_v8 }
 0xb6b   :  { %6439 = vmatpush3.bf16.msra.mxu1 %v7661_v8  ;;  %6444 = vmatprep.subr.bf16.mxu0 %v7592_v1 }
 0xb6c   :  { %6458 = vmatprep.subr.bf16.mxu1 %v7592_v1 }
 0xc34   :  { %v1357_v41 = vpop.f32.mrb[52].mxu0 }
 0xc35   :  { %v1408_v42 = vmul.f32 %v1407_v40, %v1357_v41  ;;  %v1593_v43 = vmul.f32 2.0, %v1357_v41  ;;  %v1401_v44 = vpop.f32.mrb[52].mxu1  ;;  %v6408_v45 = vpop.f32.mrb[53].mxu0 }
 0xc36   :  { %v1410_v46 = vmul.f32 %v1407_v40, %v1401_v44  ;;  %v1601_v47 = vmul.f32 2.0, %v1401_v44  ;;  %v6422_v48 = vpop.f32.mrb[53].mxu1  ;;  %v1360_v49 = vpop.f32.mrb[54].mxu0 }
 0xc37   :  { %v1409_v50 = vadd.f32 %v1408_v42, %v7925_v24  ;;  %v1404_v51 = vpop.f32.mrb[54].mxu1  ;;  %v6409_v52 = vpop.f32.mrb[55].mxu0  ;;  %v8120_v53 = vadd.f32 %v1593_v43, %v8057_v22 }
 0xc38   :  { %v1411_v54 = vadd.f32 %v1410_v46, %v7928_v25  ;;  %v6423_v55 = vpop.f32.mrb[55].mxu1  ;;  %v8124_v56 = vadd.f32 %v1601_v47, %v8061_v6  ;;  %v8266_v47 = vstv %s1798_s0  ;;  %s5510_s0 = sld [smem:[#allocation2 + $0x7]] }
 0xc39   :  { %v1412_v57 = vpack.c.bf16 %v1409_v50, %v1409_v50 }
 0xc3a   :  { %v1456_v58 = vpack.c.bf16 %v1411_v54, %v1411_v54 }
 0xc3b   :  { %6431 = vmatmul.mubr.msk.bf16.vlgmr.msra.gmra.mrb[56].mxu0 %vm69_vm2, %v1412_v57 }
 0xc3c   :  { %6441 = vmatmul.mubr.msk.bf16.vlgmr.msra.gmra.mrb[56].mxu1 %vm69_vm2, %v1456_v58  ;;  %6445 = vmatpush3.bf16.msra.mxu0 %v8131_v59 }
 0xc3d   :  { %6459 = vmatpush3.bf16.msra.mxu1 %v8131_v59  ;;  %6446 = vmatprep.subr.bf16.mxu0 %v7592_v1 }
 0xc3e   :  { %6460 = vmatprep.subr.bf16.mxu1 %v7592_v1  ;;  %6454 = vmatprep.mubr.msk.bf16.mxu0 %vm7594_vm1, %v7592_v1 }
 0xc3f   :  { %6468 = vmatprep.mubr.msk.bf16.mxu1 %vm7594_vm1, %v7592_v1 }
 0xc40   :  { %6447 = vmatpush3.bf16.msra.mxu0 %v8144_v60 }
 0xc41   :  { %6461 = vmatpush3.bf16.msra.mxu1 %v8144_v60  ;;  %6448 = vmatprep.subr.bf16.mxu0 %v7592_v1 }
 0xc42   :  { %6462 = vmatprep.subr.bf16.mxu1 %v7592_v1 }
 0xc44   :  { %6449 = vmatpush3.bf16.msra.mxu0 %v8153_v61 }
 0xc45   :  { %6463 = vmatpush3.bf16.msra.mxu1 %v8153_v61  ;;  %6450 = vmatprep.subr.bf16.mxu0 %v7592_v1 }
 0xc46   :  { %6464 = vmatprep.subr.bf16.mxu1 %v7592_v1 }
 0xc48   :  { %6451 = vmatpush3.bf16.msra.mxu0 %v8162_v62 }
 0xc49   :  { %6465 = vmatpush3.bf16.msra.mxu1 %v8162_v62  ;;  %6452 = vmatprep.subr.bf16.mxu0 %v7592_v1 }
 0xc4a   :  { %6466 = vmatprep.subr.bf16.mxu1 %v7592_v1 }
 0xc4c   :  { %6453 = vmatpush3.bf16.msra.mxu0 %v7718_v16 }
 0xc4d   :  { %6467 = vmatpush3.bf16.msra.mxu1 %v7718_v16  ;;  %6472 = vmatprep.subr.bf16.mxu0 %v7592_v1 }
 0xc4e   :  { %6482 = vmatprep.subr.bf16.mxu1 %v7592_v1 }
 0xd0e   :  { %v1450_v63 = vpop.f32.mrb[56].mxu0 }
 0xd0f   :  { %7475 = vtanh.f32 %v1450_v63  ;;  %v1494_v3 = vpop.f32.mrb[56].mxu1  ;;  %v6432_v4 = vpop.f32.mrb[57].mxu0 }
 0xd10   :  { %7477 = vtanh.f32 %v1494_v3  ;;  %v6442_v5 = vpop.f32.mrb[57].mxu1  ;;  %v1453_v0 = vpop.f32.mrb[58].mxu0 }
 0xd11   :  { %v1497_v9 = vpop.f32.mrb[58].mxu1  ;;  %v6433_v10 = vpop.f32.mrb[59].mxu0 }
 0xd12   :  { %v6443_v15 = vpop.f32.mrb[59].mxu1 }
 0xd19   :  { %v7476_v17 = vpop.eup %7475 }
 0xd1a   :  { %v7478_v2 = vpop.eup %7477  ;;  %v1502_v18 = vpack.c.bf16 %v7476_v17, %v7476_v17 }
 0xd1b   :  { %v1546_v19 = vpack.c.bf16 %v7478_v2, %v7478_v2 }
 0xd1c   :  { %6455 = vmatmul.mubr.msk.bf16.vlgmr.msra.gmra.mrb[60].mxu0 %vm193_vm3, %v1502_v18 }
 0xd1d   :  { %6469 = vmatmul.mubr.msk.bf16.vlgmr.msra.gmra.mrb[60].mxu1 %vm193_vm3, %v1546_v19  ;;  %6473 = vmatpush3.bf16.msra.mxu0 %v8094_v38 }
 0xd1e   :  { %6483 = vmatpush3.bf16.msra.mxu1 %v8094_v38  ;;  %6474 = vmatprep.subr.bf16.mxu0 %v7592_v1 }
 0xd1f   :  { %6484 = vmatprep.subr.bf16.mxu1 %v7592_v1  ;;  %6478 = vmatprep.mubr.msk.bf16.mxu0 %vm7594_vm1, %v7592_v1 }
 0xd20   :  { %6488 = vmatprep.mubr.msk.bf16.mxu1 %vm7594_vm1, %v7592_v1 }
 0xd21   :  { %6475 = vmatpush3.bf16.msra.mxu0 %v8107_v39 }
 0xd22   :  { %6485 = vmatpush3.bf16.msra.mxu1 %v8107_v39  ;;  %6476 = vmatprep.subr.bf16.mxu0 %v7592_v1 }
 0xd23   :  { %6486 = vmatprep.subr.bf16.mxu1 %v7592_v1 }
 0xd25   :  { %6477 = vmatpush3.bf16.msra.mxu0 %v7661_v8 }
 0xd26   :  { %6487 = vmatpush3.bf16.msra.mxu1 %v7661_v8  ;;  %6492 = vmatprep.subr.bf16.mxu0 %v7592_v1 }
 0xd27   :  { %6506 = vmatprep.subr.bf16.mxu1 %v7592_v1 }
 0xdef   :  { %v1540_v20 = vpop.f32.mrb[60].mxu0 }
 0xdf0   :  { %v1595_v22 = vadd.f32 %v8120_v53, %v1540_v20  ;;  %v1584_v23 = vpop.f32.mrb[60].mxu1  ;;  %v6456_v26 = vpop.f32.mrb[61].mxu0 }
 0xdf1   :  { %v1603_v27 = vadd.f32 %v8124_v56, %v1584_v23  ;;  %v6470_v6 = vpop.f32.mrb[61].mxu1  ;;  %v1543_v7 = vpop.f32.mrb[62].mxu0 }
 0xdf2   :  { %v1597_v28 = vmul.f32 %v1596_v21, %v1595_v22  ;;  %v1587_v29 = vpop.f32.mrb[62].mxu1  ;;  %v6457_v11 = vpop.f32.mrb[63].mxu0 }
 0xdf3   :  { %v1604_v12 = vmul.f32 %v1603_v27, %v1596_v21  ;;  %v6471_v13 = vpop.f32.mrb[63].mxu1 }
 0xdf4   :  { %v8194_v30 = vadd.f32 %v1597_v28, %v7925_v24 }
 0xdf5   :  { %v8197_v31 = vadd.f32 %v1604_v12, %v7928_v25 }
 0xdf6   :  { %1607 = vrot.lane.b32.xlu0 %v8194_v30, %s7596_s14  ;;  %v1620_v14 = vpack.c.bf16 %v8194_v30, %v8194_v30 }
 0xdf7   :  { %1613 = vrot.lane.b32.xlu1 %v8197_v31, %s7596_s14  ;;  %v1664_v32 = vpack.c.bf16 %v8197_v31, %v8197_v31 }
 0xdf8   :  { %6479 = vmatmul.mubr.msk.bf16.vlgmr.msra.gmra.mrb[64].mxu0 %vm69_vm2, %v1620_v14 }
 0xdf9   :  { %6489 = vmatmul.mubr.msk.bf16.vlgmr.msra.gmra.mrb[64].mxu1 %vm69_vm2, %v1664_v32  ;;  %6493 = vmatpush3.bf16.msra.mxu0 %v8131_v59 }
 0xdfa   :  { %6507 = vmatpush3.bf16.msra.mxu1 %v8131_v59  ;;  %6494 = vmatprep.subr.bf16.mxu0 %v7592_v1 }
 0xdfb   :  { %6508 = vmatprep.subr.bf16.mxu1 %v7592_v1  ;;  %6502 = vmatprep.mubr.msk.bf16.mxu0 %vm7594_vm1, %v7592_v1 }
 0xdfc   :  { %6516 = vmatprep.mubr.msk.bf16.mxu1 %vm7594_vm1, %v7592_v1 }
 0xdfd   :  { %6495 = vmatpush3.bf16.msra.mxu0 %v8144_v60 }
 0xdfe   :  { %6509 = vmatpush3.bf16.msra.mxu1 %v8144_v60  ;;  %6496 = vmatprep.subr.bf16.mxu0 %v7592_v1 }
 0xdff   :  { %6510 = vmatprep.subr.bf16.mxu1 %v7592_v1 }
 0xe01   :  { %6497 = vmatpush3.bf16.msra.mxu0 %v8153_v61 }
 0xe02   :  { %6511 = vmatpush3.bf16.msra.mxu1 %v8153_v61  ;;  %6498 = vmatprep.subr.bf16.mxu0 %v7592_v1 }
 0xe03   :  { %6512 = vmatprep.subr.bf16.mxu1 %v7592_v1 }
 0xe05   :  { %6499 = vmatpush3.bf16.msra.mxu0 %v8162_v62 }
 0xe06   :  { %6513 = vmatpush3.bf16.msra.mxu1 %v8162_v62  ;;  %6500 = vmatprep.subr.bf16.mxu0 %v7592_v1 }
 0xe07   :  { %6514 = vmatprep.subr.bf16.mxu1 %v7592_v1 }
 0xe09   :  { %6501 = vmatpush3.bf16.msra.mxu0 %v7718_v16 }
 0xe0a   :  { %6515 = vmatpush3.bf16.msra.mxu1 %v7718_v16  ;;  %6520 = vmatprep.subr.bf16.mxu0 %v7592_v1 }
 0xe0b   :  { %6530 = vmatprep.subr.bf16.mxu1 %v7592_v1 }
 0xe68   :  { %v1608_v24 = vpop.permute.xlu0 %1607 }
 0xe69   :  { %v1614_v25 = vpop.permute.xlu1 %1613  ;;  %1611 = vst.msk [vmem:[%s9435_s4] sm:$0xff] %vm1610_vm6, %v1608_v24 }
 0xe6a   :  { %1616 = vst.msk [vmem:[%s9435_s4 + $0x10] sm:$0xff] %vm1610_vm6, %v1614_v25 }
 0xecb   :  { %v1658_v33 = vpop.f32.mrb[64].mxu0 }
 0xecc   :  { %7479 = vtanh.f32 %v1658_v33  ;;  %v1702_v34 = vpop.f32.mrb[64].mxu1  ;;  %v6480_v35 = vpop.f32.mrb[65].mxu0 }
 0xecd   :  { %7481 = vtanh.f32 %v1702_v34  ;;  %v6490_v36 = vpop.f32.mrb[65].mxu1  ;;  %v1661_v37 = vpop.f32.mrb[66].mxu0 }
 0xece   :  { %v1705_v40 = vpop.f32.mrb[66].mxu1  ;;  %v6481_v41 = vpop.f32.mrb[67].mxu0 }
 0xecf   :  { %v6491_v42 = vpop.f32.mrb[67].mxu1 }
 0xed6   :  { %v7480_v43 = vpop.eup %7479 }
 0xed7   :  { %v7482_v44 = vpop.eup %7481  ;;  %v1710_v45 = vpack.c.bf16 %v7480_v43, %v7480_v43 }
 0xed8   :  { %v1754_v46 = vpack.c.bf16 %v7482_v44, %v7482_v44 }
 0xed9   :  { %6503 = vmatmul.mubr.msk.bf16.vlgmr.msra.gmra.mrb[68].mxu0 %vm193_vm3, %v1710_v45 }
 0xeda   :  { %6517 = vmatmul.mubr.msk.bf16.vlgmr.msra.gmra.mrb[68].mxu1 %vm193_vm3, %v1754_v46  ;;  %6521 = vmatpush3.bf16.msra.mxu0 %v8094_v38 }
 0xedb   :  { %6531 = vmatpush3.bf16.msra.mxu1 %v8094_v38  ;;  %6522 = vmatprep.subr.bf16.mxu0 %v7592_v1 }
 0xedc   :  { %6532 = vmatprep.subr.bf16.mxu1 %v7592_v1  ;;  %6526 = vmatprep.mubr.msk.bf16.mxu0 %vm7594_vm1, %v7592_v1 }
 0xedd   :  { %6536 = vmatprep.mubr.msk.bf16.mxu1 %vm7594_vm1, %v7592_v1 }
 0xede   :  { %6523 = vmatpush3.bf16.msra.mxu0 %v8107_v39 }
 0xedf   :  { %6533 = vmatpush3.bf16.msra.mxu1 %v8107_v39  ;;  %6524 = vmatprep.subr.bf16.mxu0 %v7592_v1 }
 0xee0   :  { %6534 = vmatprep.subr.bf16.mxu1 %v7592_v1 }
 0xee2   :  { %6525 = vmatpush3.bf16.msra.mxu0 %v7661_v8 }
 0xee3   :  { %6535 = vmatpush3.bf16.msra.mxu1 %v7661_v8  ;;  %6540 = vmatprep.subr.bf16.mxu0 %v7592_v1 }
 0xee4   :  { %6554 = vmatprep.subr.bf16.mxu1 %v7592_v1 }
 0xfac   :  { %v8268_v48 = vpop.f32.mrb[68].mxu0 }
 0xfad   :  { %v1800_v49 = vmul.f32 %v8266_v47, %v8268_v48  ;;  %v8272_v50 = vpop.f32.mrb[68].mxu1  ;;  %v6504_v51 = vpop.f32.mrb[69].mxu0 }
 0xfae   :  { %v1802_v52 = vmul.f32 %v8266_v47, %v8272_v50  ;;  %v6518_v53 = vpop.f32.mrb[69].mxu1  ;;  %v1751_v54 = vpop.f32.mrb[70].mxu0  ;;  %v2164_v51 = vstv %s8263_s20 }
 0xfaf   :  { %v1801_v55 = vadd.f32 %v1800_v49, %v8194_v30  ;;  %v1795_v56 = vpop.f32.mrb[70].mxu1  ;;  %v6505_v57 = vpop.f32.mrb[71].mxu0 }
 0xfb0   :  { %v1803_v58 = vadd.f32 %v1802_v52, %v8197_v31  ;;  %v6519_v63 = vpop.f32.mrb[71].mxu1 }
 0xfb1   :  { %v1804_v3 = vpack.c.bf16 %v1801_v55, %v1801_v55 }
 0xfb2   :  { %v1848_v4 = vpack.c.bf16 %v1803_v58, %v1803_v58 }
 0xfb3   :  { %6527 = vmatmul.mubr.msk.bf16.vlgmr.msra.gmra.mrb[72].mxu0 %vm69_vm2, %v1804_v3 }
 0xfb4   :  { %6537 = vmatmul.mubr.msk.bf16.vlgmr.msra.gmra.mrb[72].mxu1 %vm69_vm2, %v1848_v4  ;;  %6541 = vmatpush3.bf16.msra.mxu0 %v8131_v59 }
 0xfb5   :  { %6555 = vmatpush3.bf16.msra.mxu1 %v8131_v59  ;;  %6542 = vmatprep.subr.bf16.mxu0 %v7592_v1 }
 0xfb6   :  { %6556 = vmatprep.subr.bf16.mxu1 %v7592_v1  ;;  %6550 = vmatprep.mubr.msk.bf16.mxu0 %vm7594_vm1, %v7592_v1 }
 0xfb7   :  { %6564 = vmatprep.mubr.msk.bf16.mxu1 %vm7594_vm1, %v7592_v1 }
 0xfb8   :  { %6543 = vmatpush3.bf16.msra.mxu0 %v8144_v60 }
 0xfb9   :  { %6557 = vmatpush3.bf16.msra.mxu1 %v8144_v60  ;;  %6544 = vmatprep.subr.bf16.mxu0 %v7592_v1 }
 0xfba   :  { %6558 = vmatprep.subr.bf16.mxu1 %v7592_v1 }
 0xfbc   :  { %6545 = vmatpush3.bf16.msra.mxu0 %v8153_v61 }
 0xfbd   :  { %6559 = vmatpush3.bf16.msra.mxu1 %v8153_v61  ;;  %6546 = vmatprep.subr.bf16.mxu0 %v7592_v1 }
 0xfbe   :  { %6560 = vmatprep.subr.bf16.mxu1 %v7592_v1 }
 0xfc0   :  { %6547 = vmatpush3.bf16.msra.mxu0 %v8162_v62 }
 0xfc1   :  { %6561 = vmatpush3.bf16.msra.mxu1 %v8162_v62  ;;  %6548 = vmatprep.subr.bf16.mxu0 %v7592_v1 }
 0xfc2   :  { %6562 = vmatprep.subr.bf16.mxu1 %v7592_v1 }
 0xfc4   :  { %6549 = vmatpush3.bf16.msra.mxu0 %v7718_v16 }
 0xfc5   :  { %6563 = vmatpush3.bf16.msra.mxu1 %v7718_v16  ;;  %6568 = vmatprep.subr.bf16.mxu0 %v7592_v1 }
 0xfc6   :  { %6578 = vmatprep.subr.bf16.mxu1 %v7592_v1 }
0x1086   :  { %v1842_v5 = vpop.f32.mrb[72].mxu0 }
0x1087   :  { %7483 = vtanh.f32 %v1842_v5  ;;  %v1886_v0 = vpop.f32.mrb[72].mxu1  ;;  %v6528_v9 = vpop.f32.mrb[73].mxu0 }
0x1088   :  { %7485 = vtanh.f32 %v1886_v0  ;;  %v6538_v10 = vpop.f32.mrb[73].mxu1  ;;  %v1845_v15 = vpop.f32.mrb[74].mxu0 }
0x1089   :  { %v1889_v17 = vpop.f32.mrb[74].mxu1  ;;  %v6529_v2 = vpop.f32.mrb[75].mxu0 }
0x108a   :  { %v6539_v18 = vpop.f32.mrb[75].mxu1 }
0x1091   :  { %v7484_v19 = vpop.eup %7483 }
0x1092   :  { %v7486_v20 = vpop.eup %7485  ;;  %v1894_v21 = vpack.c.bf16 %v7484_v19, %v7484_v19 }
0x1093   :  { %v1938_v22 = vpack.c.bf16 %v7486_v20, %v7486_v20 }
0x1094   :  { %6551 = vmatmul.mubr.msk.bf16.vlgmr.msra.gmra.mrb[76].mxu0 %vm193_vm3, %v1894_v21 }
0x1095   :  { %6565 = vmatmul.mubr.msk.bf16.vlgmr.msra.gmra.mrb[76].mxu1 %vm193_vm3, %v1938_v22  ;;  %6569 = vmatpush3.bf16.msra.mxu0 %v8094_v38 }
0x1096   :  { %6579 = vmatpush3.bf16.msra.mxu1 %v8094_v38  ;;  %6570 = vmatprep.subr.bf16.mxu0 %v7592_v1 }
0x1097   :  { %6580 = vmatprep.subr.bf16.mxu1 %v7592_v1  ;;  %6574 = vmatprep.mubr.msk.bf16.mxu0 %vm7594_vm1, %v7592_v1 }
0x1098   :  { %6584 = vmatprep.mubr.msk.bf16.mxu1 %vm7594_vm1, %v7592_v1 }
0x1099   :  { %6571 = vmatpush3.bf16.msra.mxu0 %v8107_v39 }
0x109a   :  { %6581 = vmatpush3.bf16.msra.mxu1 %v8107_v39  ;;  %6572 = vmatprep.subr.bf16.mxu0 %v7592_v1 }
0x109b   :  { %6582 = vmatprep.subr.bf16.mxu1 %v7592_v1 }
0x109d   :  { %6573 = vmatpush3.bf16.msra.mxu0 %v7661_v8 }
0x109e   :  { %6583 = vmatpush3.bf16.msra.mxu1 %v7661_v8  ;;  %6588 = vmatprep.subr.bf16.mxu0 %v7592_v1 }
0x109f   :  { %6602 = vmatprep.subr.bf16.mxu1 %v7592_v1 }
0x1167   :  { %v1932_v23 = vpop.f32.mrb[76].mxu0 }
0x1168   :  { %v1982_v26 = vmul.f32 %v1932_v23, %v8266_v47  ;;  %v2348_v27 = vmul.f32 2.0, %v1932_v23  ;;  %v1976_v6 = vpop.f32.mrb[76].mxu1  ;;  %v6552_v7 = vpop.f32.mrb[77].mxu0 }
0x1169   :  { %v1984_v28 = vmul.f32 %v1976_v6, %v8266_v47  ;;  %v2356_v29 = vmul.f32 2.0, %v1976_v6  ;;  %v6566_v11 = vpop.f32.mrb[77].mxu1  ;;  %v1935_v12 = vpop.f32.mrb[78].mxu0 }
0x116a   :  { %v1983_v13 = vadd.f32 %v1982_v26, %v8194_v30  ;;  %v8326_v14 = vadd.f32 %v2348_v27, %v8268_v48  ;;  %v1979_v32 = vpop.f32.mrb[78].mxu1  ;;  %v6553_v24 = vpop.f32.mrb[79].mxu0 }
0x116b   :  { %v1985_v25 = vadd.f32 %v1984_v28, %v8197_v31  ;;  %v8330_v33 = vadd.f32 %v2356_v29, %v8272_v50  ;;  %v6567_v34 = vpop.f32.mrb[79].mxu1 }
0x116c   :  { %v1986_v35 = vpack.c.bf16 %v1983_v13, %v1983_v13  ;;  %v2353_v13 = vstv %s2347_s22  ;;  %s8765_s22 = sld [smem:[#allocation2 + $0x5]] }
0x116d   :  { %v2030_v36 = vpack.c.bf16 %v1985_v25, %v1985_v25 }
0x116e   :  { %6575 = vmatmul.mubr.msk.bf16.vlgmr.msra.gmra.mrb[80].mxu0 %vm69_vm2, %v1986_v35 }
0x116f   :  { %6585 = vmatmul.mubr.msk.bf16.vlgmr.msra.gmra.mrb[80].mxu1 %vm69_vm2, %v2030_v36  ;;  %6589 = vmatpush3.bf16.msra.mxu0 %v8131_v59 }
0x1170   :  { %6603 = vmatpush3.bf16.msra.mxu1 %v8131_v59  ;;  %6590 = vmatprep.subr.bf16.mxu0 %v7592_v1 }
0x1171   :  { %6604 = vmatprep.subr.bf16.mxu1 %v7592_v1  ;;  %6598 = vmatprep.mubr.msk.bf16.mxu0 %vm7594_vm1, %v7592_v1 }
0x1172   :  { %6612 = vmatprep.mubr.msk.bf16.mxu1 %vm7594_vm1, %v7592_v1  ;;  %s8769_s24 = ssub.f32 %s8765_s22, %s8498_s28 }
0x1173   :  { %6591 = vmatpush3.bf16.msra.mxu0 %v8144_v60 }
0x1174   :  { %6605 = vmatpush3.bf16.msra.mxu1 %v8144_v60  ;;  %6592 = vmatprep.subr.bf16.mxu0 %v7592_v1  ;;  %s3303_s25 = smul.f32 0.5, %s8769_s24 }
0x1175   :  { %6606 = vmatprep.subr.bf16.mxu1 %v7592_v1  ;;  %s3852_s26 = smul.f32 0.16666667, %s8769_s24 }
0x1177   :  { %6593 = vmatpush3.bf16.msra.mxu0 %v8153_v61 }
0x1178   :  { %6607 = vmatpush3.bf16.msra.mxu1 %v8153_v61  ;;  %6594 = vmatprep.subr.bf16.mxu0 %v7592_v1 }
0x1179   :  { %6608 = vmatprep.subr.bf16.mxu1 %v7592_v1 }
0x117b   :  { %6595 = vmatpush3.bf16.msra.mxu0 %v8162_v62 }
0x117c   :  { %6609 = vmatpush3.bf16.msra.mxu1 %v8162_v62  ;;  %6596 = vmatprep.subr.bf16.mxu0 %v7592_v1 }
0x117d   :  { %6610 = vmatprep.subr.bf16.mxu1 %v7592_v1 }
0x117f   :  { %6597 = vmatpush3.bf16.msra.mxu0 %v7718_v16 }
0x1180   :  { %6611 = vmatpush3.bf16.msra.mxu1 %v7718_v16  ;;  %6616 = vmatprep.subr.bf16.mxu0 %v7592_v1 }
0x1181   :  { %6626 = vmatprep.subr.bf16.mxu1 %v7592_v1 }
0x1241   :  { %v2024_v37 = vpop.f32.mrb[80].mxu0 }
0x1242   :  { %7487 = vtanh.f32 %v2024_v37  ;;  %v2068_v40 = vpop.f32.mrb[80].mxu1  ;;  %v6576_v41 = vpop.f32.mrb[81].mxu0 }
0x1243   :  { %7489 = vtanh.f32 %v2068_v40  ;;  %v6586_v42 = vpop.f32.mrb[81].mxu1  ;;  %v2027_v43 = vpop.f32.mrb[82].mxu0 }
0x1244   :  { %v2071_v44 = vpop.f32.mrb[82].mxu1  ;;  %v6577_v45 = vpop.f32.mrb[83].mxu0 }
0x1245   :  { %v6587_v46 = vpop.f32.mrb[83].mxu1 }
0x124c   :  { %v7488_v47 = vpop.eup %7487 }
0x124d   :  { %v7490_v48 = vpop.eup %7489  ;;  %v2076_v49 = vpack.c.bf16 %v7488_v47, %v7488_v47 }
0x124e   :  { %v2120_v50 = vpack.c.bf16 %v7490_v48, %v7490_v48 }
0x124f   :  { %6599 = vmatmul.mubr.msk.bf16.vlgmr.msra.gmra.mrb[84].mxu0 %vm193_vm3, %v2076_v49 }
0x1250   :  { %6613 = vmatmul.mubr.msk.bf16.vlgmr.msra.gmra.mrb[84].mxu1 %vm193_vm3, %v2120_v50  ;;  %6617 = vmatpush3.bf16.msra.mxu0 %v8094_v38 }
0x1251   :  { %6627 = vmatpush3.bf16.msra.mxu1 %v8094_v38  ;;  %6618 = vmatprep.subr.bf16.mxu0 %v7592_v1 }
0x1252   :  { %6628 = vmatprep.subr.bf16.mxu1 %v7592_v1  ;;  %6622 = vmatprep.mubr.msk.bf16.mxu0 %vm7594_vm1, %v7592_v1 }
0x1253   :  { %6632 = vmatprep.mubr.msk.bf16.mxu1 %vm7594_vm1, %v7592_v1 }
0x1254   :  { %6619 = vmatpush3.bf16.msra.mxu0 %v8107_v39 }
0x1255   :  { %6629 = vmatpush3.bf16.msra.mxu1 %v8107_v39  ;;  %6620 = vmatprep.subr.bf16.mxu0 %v7592_v1 }
0x1256   :  { %6630 = vmatprep.subr.bf16.mxu1 %v7592_v1 }
0x1258   :  { %6621 = vmatpush3.bf16.msra.mxu0 %v7661_v8 }
0x1259   :  { %6631 = vmatpush3.bf16.msra.mxu1 %v7661_v8  ;;  %6636 = vmatprep.subr.bf16.mxu0 %v7592_v1 }
0x125a   :  { %6650 = vmatprep.subr.bf16.mxu1 %v7592_v1 }
0x1322   :  { %v2114_v52 = vpop.f32.mrb[84].mxu0 }
0x1323   :  { %v2165_v53 = vmul.f32 %v2164_v51, %v2114_v52  ;;  %v2350_v54 = vmul.f32 2.0, %v2114_v52  ;;  %v2158_v55 = vpop.f32.mrb[84].mxu1  ;;  %v6600_v56 = vpop.f32.mrb[85].mxu0 }
0x1324   :  { %v2167_v57 = vmul.f32 %v2164_v51, %v2158_v55  ;;  %v2358_v58 = vmul.f32 2.0, %v2158_v55  ;;  %v6614_v63 = vpop.f32.mrb[85].mxu1  ;;  %v2117_v3 = vpop.f32.mrb[86].mxu0 }
0x1325   :  { %v2166_v4 = vadd.f32 %v2165_v53, %v8194_v30  ;;  %v2161_v5 = vpop.f32.mrb[86].mxu1  ;;  %v6601_v0 = vpop.f32.mrb[87].mxu0  ;;  %v8379_v9 = vadd.f32 %v2350_v54, %v8326_v14 }
0x1326   :  { %v2168_v10 = vadd.f32 %v2167_v57, %v8197_v31  ;;  %v6615_v15 = vpop.f32.mrb[87].mxu1  ;;  %v8383_v17 = vadd.f32 %v2358_v58, %v8330_v33 }
0x1327   :  { %v2169_v2 = vpack.c.bf16 %v2166_v4, %v2166_v4 }
0x1328   :  { %v2213_v18 = vpack.c.bf16 %v2168_v10, %v2168_v10 }
0x1329   :  { %6623 = vmatmul.mubr.msk.bf16.vlgmr.msra.gmra.mrb[88].mxu0 %vm69_vm2, %v2169_v2 }
0x132a   :  { %6633 = vmatmul.mubr.msk.bf16.vlgmr.msra.gmra.mrb[88].mxu1 %vm69_vm2, %v2213_v18  ;;  %6637 = vmatpush3.bf16.msra.mxu0 %v8131_v59 }
0x132b   :  { %6651 = vmatpush3.bf16.msra.mxu1 %v8131_v59  ;;  %6638 = vmatprep.subr.bf16.mxu0 %v7592_v1 }
0x132c   :  { %6652 = vmatprep.subr.bf16.mxu1 %v7592_v1  ;;  %6646 = vmatprep.mubr.msk.bf16.mxu0 %vm7594_vm1, %v7592_v1 }
0x132d   :  { %6660 = vmatprep.mubr.msk.bf16.mxu1 %vm7594_vm1, %v7592_v1 }
0x132e   :  { %6639 = vmatpush3.bf16.msra.mxu0 %v8144_v60 }
0x132f   :  { %6653 = vmatpush3.bf16.msra.mxu1 %v8144_v60  ;;  %6640 = vmatprep.subr.bf16.mxu0 %v7592_v1 }
0x1330   :  { %6654 = vmatprep.subr.bf16.mxu1 %v7592_v1 }
0x1332   :  { %6641 = vmatpush3.bf16.msra.mxu0 %v8153_v61 }
0x1333   :  { %6655 = vmatpush3.bf16.msra.mxu1 %v8153_v61  ;;  %6642 = vmatprep.subr.bf16.mxu0 %v7592_v1 }
0x1334   :  { %6656 = vmatprep.subr.bf16.mxu1 %v7592_v1 }
0x1336   :  { %6643 = vmatpush3.bf16.msra.mxu0 %v8162_v62 }
0x1337   :  { %6657 = vmatpush3.bf16.msra.mxu1 %v8162_v62  ;;  %6644 = vmatprep.subr.bf16.mxu0 %v7592_v1 }
0x1338   :  { %6658 = vmatprep.subr.bf16.mxu1 %v7592_v1 }
0x133a   :  { %6645 = vmatpush3.bf16.msra.mxu0 %v7718_v16 }
0x133b   :  { %6659 = vmatpush3.bf16.msra.mxu1 %v7718_v16  ;;  %6664 = vmatprep.subr.bf16.mxu0 %v7592_v1 }
0x133c   :  { %6674 = vmatprep.subr.bf16.mxu1 %v7592_v1 }
0x13fc   :  { %v2207_v19 = vpop.f32.mrb[88].mxu0 }
0x13fd   :  { %7491 = vtanh.f32 %v2207_v19  ;;  %v2251_v20 = vpop.f32.mrb[88].mxu1  ;;  %v6624_v21 = vpop.f32.mrb[89].mxu0 }
0x13fe   :  { %7493 = vtanh.f32 %v2251_v20  ;;  %v6634_v22 = vpop.f32.mrb[89].mxu1  ;;  %v2210_v23 = vpop.f32.mrb[90].mxu0 }
0x13ff   :  { %v2254_v26 = vpop.f32.mrb[90].mxu1  ;;  %v6625_v27 = vpop.f32.mrb[91].mxu0 }
0x1400   :  { %v6635_v6 = vpop.f32.mrb[91].mxu1 }
0x1407   :  { %v7492_v7 = vpop.eup %7491 }
0x1408   :  { %v7494_v28 = vpop.eup %7493  ;;  %v2259_v29 = vpack.c.bf16 %v7492_v7, %v7492_v7 }
0x1409   :  { %v2303_v11 = vpack.c.bf16 %v7494_v28, %v7494_v28  ;;  %v8548_v28 = vld [vmem:[%s9433_s2] sm:$0xff]  }
0x140a   :  { %6647 = vmatmul.mubr.msk.bf16.vlgmr.msra.gmra.mrb[92].mxu0 %vm193_vm3, %v2259_v29  ;;  %v8561_v29 = vld [vmem:[%s9433_s2 + $0x8] sm:$0xff]  }
0x140b   :  { %6661 = vmatmul.mubr.msk.bf16.vlgmr.msra.gmra.mrb[92].mxu1 %vm193_vm3, %v2303_v11  ;;  %6665 = vmatpush3.bf16.msra.mxu0 %v8094_v38 }
0x140c   :  { %6675 = vmatpush3.bf16.msra.mxu1 %v8094_v38  ;;  %6666 = vmatprep.subr.bf16.mxu0 %v7592_v1 }
0x140d   :  { %6676 = vmatprep.subr.bf16.mxu1 %v7592_v1  ;;  %6670 = vmatprep.mubr.msk.bf16.mxu0 %vm7594_vm1, %v7592_v1 }
0x140e   :  { %6680 = vmatprep.mubr.msk.bf16.mxu1 %vm7594_vm1, %v7592_v1 }
0x140f   :  { %6667 = vmatpush3.bf16.msra.mxu0 %v8107_v39 }
0x1410   :  { %6677 = vmatpush3.bf16.msra.mxu1 %v8107_v39  ;;  %6668 = vmatprep.subr.bf16.mxu0 %v7592_v1 }
0x1411   :  { %6678 = vmatprep.subr.bf16.mxu1 %v7592_v1 }
0x1413   :  { %6669 = vmatpush3.bf16.msra.mxu0 %v7661_v8 }
0x1414   :  { %6679 = vmatpush3.bf16.msra.mxu1 %v7661_v8  ;;  %6684 = vmatprep.subr.bf16.mxu0 %v7592_v1 }
0x1415   :  { %6698 = vmatprep.subr.bf16.mxu1 %v7592_v1 }
0x14dd   :  { %v2297_v12 = vpop.f32.mrb[92].mxu0 }
0x14de   :  { %v2352_v14 = vadd.f32 %v8379_v9, %v2297_v12  ;;  %v2341_v32 = vpop.f32.mrb[92].mxu1  ;;  %v6648_v24 = vpop.f32.mrb[93].mxu0 }
0x14df   :  { %v2360_v25 = vadd.f32 %v8383_v17, %v2341_v32  ;;  %v6662_v33 = vpop.f32.mrb[93].mxu1  ;;  %v2300_v34 = vpop.f32.mrb[94].mxu0 }
0x14e0   :  { %v2354_v35 = vmul.f32 %v2353_v13, %v2352_v14  ;;  %v2344_v36 = vpop.f32.mrb[94].mxu1  ;;  %v6649_v37 = vpop.f32.mrb[95].mxu0 }
0x14e1   :  { %v2361_v40 = vmul.f32 %v2360_v25, %v2353_v13  ;;  %v6663_v41 = vpop.f32.mrb[95].mxu1 }
0x14e2   :  { %v8433_v42 = vadd.f32 %v2354_v35, %v8194_v30 }
0x14e3   :  { %v8436_v43 = vadd.f32 %v2361_v40, %v8197_v31 }
0x14e4   :  { %2364 = vrot.lane.b32.xlu0 %v8433_v42, %s7597_s23  ;;  %v2377_v44 = vpack.c.bf16 %v8433_v42, %v8433_v42 }
0x14e5   :  { %2370 = vrot.lane.b32.xlu1 %v8436_v43, %s7597_s23  ;;  %v2421_v45 = vpack.c.bf16 %v8436_v43, %v8436_v43 }
0x14e6   :  { %6671 = vmatmul.mubr.msk.bf16.vlgmr.msra.gmra.mrb[96].mxu0 %vm69_vm2, %v2377_v44 }
0x14e7   :  { %6681 = vmatmul.mubr.msk.bf16.vlgmr.msra.gmra.mrb[96].mxu1 %vm69_vm2, %v2421_v45  ;;  %6685 = vmatpush3.bf16.msra.mxu0 %v8131_v59 }
0x14e8   :  { %6699 = vmatpush3.bf16.msra.mxu1 %v8131_v59  ;;  %6686 = vmatprep.subr.bf16.mxu0 %v7592_v1 }
0x14e9   :  { %6700 = vmatprep.subr.bf16.mxu1 %v7592_v1  ;;  %6694 = vmatprep.mubr.msk.bf16.mxu0 %vm7594_vm1, %v7592_v1 }
0x14ea   :  { %6708 = vmatprep.mubr.msk.bf16.mxu1 %vm7594_vm1, %v7592_v1 }
0x14eb   :  { %6687 = vmatpush3.bf16.msra.mxu0 %v8144_v60 }
0x14ec   :  { %6701 = vmatpush3.bf16.msra.mxu1 %v8144_v60  ;;  %6688 = vmatprep.subr.bf16.mxu0 %v7592_v1 }
0x14ed   :  { %6702 = vmatprep.subr.bf16.mxu1 %v7592_v1 }
0x14ef   :  { %6689 = vmatpush3.bf16.msra.mxu0 %v8153_v61 }
0x14f0   :  { %6703 = vmatpush3.bf16.msra.mxu1 %v8153_v61  ;;  %6690 = vmatprep.subr.bf16.mxu0 %v7592_v1 }
0x14f1   :  { %6704 = vmatprep.subr.bf16.mxu1 %v7592_v1 }
0x14f3   :  { %6691 = vmatpush3.bf16.msra.mxu0 %v8162_v62 }
0x14f4   :  { %6705 = vmatpush3.bf16.msra.mxu1 %v8162_v62  ;;  %6692 = vmatprep.subr.bf16.mxu0 %v7592_v1 }
0x14f5   :  { %6706 = vmatprep.subr.bf16.mxu1 %v7592_v1 }
0x14f7   :  { %6693 = vmatpush3.bf16.msra.mxu0 %v7718_v16 }
0x14f8   :  { %6707 = vmatpush3.bf16.msra.mxu1 %v7718_v16  ;;  %6712 = vmatprep.subr.bf16.mxu0 %v7592_v1 }
0x14f9   :  { %6722 = vmatprep.subr.bf16.mxu1 %v7592_v1 }
0x1556   :  { %v2365_v30 = vpop.permute.xlu0 %2364 }
0x1557   :  { %v2371_v31 = vpop.permute.xlu1 %2370  ;;  %2368 = vst.msk [vmem:[%s9435_s4] sm:$0xff] %vm2367_vm7, %v2365_v30 }
0x1558   :  { %2373 = vst.msk [vmem:[%s9435_s4 + $0x10] sm:$0xff] %vm2367_vm7, %v2371_v31 }
0x15b9   :  { %v2415_v46 = vpop.f32.mrb[96].mxu0 }
0x15ba   :  { %7495 = vtanh.f32 %v2415_v46  ;;  %v2459_v47 = vpop.f32.mrb[96].mxu1  ;;  %v6672_v48 = vpop.f32.mrb[97].mxu0  ;;  %v8586_v46 = vld [vmem:[%s9434_s3] sm:$0xff]  }
0x15bb   :  { %7497 = vtanh.f32 %v2459_v47  ;;  %v6682_v49 = vpop.f32.mrb[97].mxu1  ;;  %v2418_v50 = vpop.f32.mrb[98].mxu0  ;;  %v8599_v47 = vld [vmem:[%s9434_s3 + $0x8] sm:$0xff]   ;;  %v8608_v48 = vld [vmem:[%s9434_s3 + $0x10] sm:$0xff]  }
0x15bc   :  { %v2462_v51 = vpop.f32.mrb[98].mxu1  ;;  %v6673_v52 = vpop.f32.mrb[99].mxu0  ;;  %v8617_v49 = vld [vmem:[%s9434_s3 + $0x18] sm:$0xff]  }
0x15bd   :  { %v6683_v53 = vpop.f32.mrb[99].mxu1 }
0x15c4   :  { %v7496_v54 = vpop.eup %7495 }
0x15c5   :  { %v7498_v55 = vpop.eup %7497  ;;  %v2467_v56 = vpack.c.bf16 %v7496_v54, %v7496_v54 }
0x15c6   :  { %v2511_v57 = vpack.c.bf16 %v7498_v55, %v7498_v55 }
0x15c7   :  { %6695 = vmatmul.mubr.msk.bf16.vlgmr.msra.gmra.mrb[100].mxu0 %vm193_vm3, %v2467_v56 }
0x15c8   :  { %6709 = vmatmul.mubr.msk.bf16.vlgmr.msra.gmra.mrb[100].mxu1 %vm193_vm3, %v2511_v57  ;;  %6713 = vmatpush3.bf16.msra.mxu0 %v8094_v38 }
0x15c9   :  { %6723 = vmatpush3.bf16.msra.mxu1 %v8094_v38  ;;  %6714 = vmatprep.subr.bf16.mxu0 %v7592_v1  ;;  %v8505_v38 = vstv %s2555_s29 }
0x15ca   :  { %6724 = vmatprep.subr.bf16.mxu1 %v7592_v1  ;;  %6718 = vmatprep.mubr.msk.bf16.mxu0 %vm7594_vm1, %v7592_v1 }
0x15cb   :  { %6728 = vmatprep.mubr.msk.bf16.mxu1 %vm7594_vm1, %v7592_v1 }
0x15cc   :  { %6715 = vmatpush3.bf16.msra.mxu0 %v8107_v39 }
0x15cd   :  { %6725 = vmatpush3.bf16.msra.mxu1 %v8107_v39  ;;  %6716 = vmatprep.subr.bf16.mxu0 %v7592_v1 }
0x15ce   :  { %6726 = vmatprep.subr.bf16.mxu1 %v7592_v1 }
0x15d0   :  { %6717 = vmatpush3.bf16.msra.mxu0 %v7661_v8 }
0x15d1   :  { %6727 = vmatpush3.bf16.msra.mxu1 %v7661_v8  ;;  %6732 = vmatprep.subr.bf16.mxu0 %v7592_v1 }
0x15d2   :  { %6746 = vmatprep.subr.bf16.mxu1 %v7592_v1 }
0x169a   :  { %v8507_v39 = vpop.f32.mrb[100].mxu0 }
0x169b   :  { %v2557_v58 = vmul.f32 %v8505_v38, %v8507_v39  ;;  %v8511_v63 = vpop.f32.mrb[100].mxu1  ;;  %v6696_v3 = vpop.f32.mrb[101].mxu0 }
0x169c   :  { %v2559_v4 = vmul.f32 %v8505_v38, %v8511_v63  ;;  %v6710_v5 = vpop.f32.mrb[101].mxu1  ;;  %v2508_v0 = vpop.f32.mrb[102].mxu0  ;;  %v2921_v3 = vstv %s8502_s1 }
0x169d   :  { %v2558_v9 = vadd.f32 %v2557_v58, %v8433_v42  ;;  %v2552_v10 = vpop.f32.mrb[102].mxu1  ;;  %v6697_v15 = vpop.f32.mrb[103].mxu0 }
0x169e   :  { %v2560_v17 = vadd.f32 %v2559_v4, %v8436_v43  ;;  %v6711_v2 = vpop.f32.mrb[103].mxu1 }
0x169f   :  { %v2561_v18 = vpack.c.bf16 %v2558_v9, %v2558_v9 }
0x16a0   :  { %v2605_v19 = vpack.c.bf16 %v2560_v17, %v2560_v17 }
0x16a1   :  { %6719 = vmatmul.mubr.msk.bf16.vlgmr.msra.gmra.mrb[104].mxu0 %vm69_vm2, %v2561_v18 }
0x16a2   :  { %6729 = vmatmul.mubr.msk.bf16.vlgmr.msra.gmra.mrb[104].mxu1 %vm69_vm2, %v2605_v19  ;;  %6733 = vmatpush3.bf16.msra.mxu0 %v8131_v59 }
0x16a3   :  { %6747 = vmatpush3.bf16.msra.mxu1 %v8131_v59  ;;  %6734 = vmatprep.subr.bf16.mxu0 %v7592_v1 }
0x16a4   :  { %6748 = vmatprep.subr.bf16.mxu1 %v7592_v1  ;;  %6742 = vmatprep.mubr.msk.bf16.mxu0 %vm7594_vm1, %v7592_v1 }
0x16a5   :  { %6756 = vmatprep.mubr.msk.bf16.mxu1 %vm7594_vm1, %v7592_v1 }
0x16a6   :  { %6735 = vmatpush3.bf16.msra.mxu0 %v8144_v60 }
0x16a7   :  { %6749 = vmatpush3.bf16.msra.mxu1 %v8144_v60  ;;  %6736 = vmatprep.subr.bf16.mxu0 %v7592_v1 }
0x16a8   :  { %6750 = vmatprep.subr.bf16.mxu1 %v7592_v1 }
0x16aa   :  { %6737 = vmatpush3.bf16.msra.mxu0 %v8153_v61 }
0x16ab   :  { %6751 = vmatpush3.bf16.msra.mxu1 %v8153_v61  ;;  %6738 = vmatprep.subr.bf16.mxu0 %v7592_v1 }
0x16ac   :  { %6752 = vmatprep.subr.bf16.mxu1 %v7592_v1 }
0x16ae   :  { %6739 = vmatpush3.bf16.msra.mxu0 %v8162_v62 }
0x16af   :  { %6753 = vmatpush3.bf16.msra.mxu1 %v8162_v62  ;;  %6740 = vmatprep.subr.bf16.mxu0 %v7592_v1 }
0x16b0   :  { %6754 = vmatprep.subr.bf16.mxu1 %v7592_v1 }
0x16b2   :  { %6741 = vmatpush3.bf16.msra.mxu0 %v7718_v16 }
0x16b3   :  { %6755 = vmatpush3.bf16.msra.mxu1 %v7718_v16  ;;  %6760 = vmatprep.subr.bf16.mxu0 %v7592_v1 }
0x16b4   :  { %6770 = vmatprep.subr.bf16.mxu1 %v7592_v1 }
0x1774   :  { %v2599_v59 = vpop.f32.mrb[104].mxu0 }
0x1775   :  { %7499 = vtanh.f32 %v2599_v59  ;;  %v2643_v60 = vpop.f32.mrb[104].mxu1  ;;  %v6720_v61 = vpop.f32.mrb[105].mxu0 }
0x1776   :  { %7501 = vtanh.f32 %v2643_v60  ;;  %v6730_v20 = vpop.f32.mrb[105].mxu1  ;;  %v2602_v21 = vpop.f32.mrb[106].mxu0 }
0x1777   :  { %v2646_v62 = vpop.f32.mrb[106].mxu1  ;;  %v6721_v22 = vpop.f32.mrb[107].mxu0 }
0x1778   :  { %v6731_v23 = vpop.f32.mrb[107].mxu1 }
0x177f   :  { %v7500_v26 = vpop.eup %7499 }
0x1780   :  { %v7502_v27 = vpop.eup %7501  ;;  %v2651_v6 = vpack.c.bf16 %v7500_v26, %v7500_v26 }
0x1781   :  { %v2695_v7 = vpack.c.bf16 %v7502_v27, %v7502_v27 }
0x1782   :  { %6743 = vmatmul.mubr.msk.bf16.vlgmr.msra.gmra.mrb[108].mxu0 %vm193_vm3, %v2651_v6 }
0x1783   :  { %6757 = vmatmul.mubr.msk.bf16.vlgmr.msra.gmra.mrb[108].mxu1 %vm193_vm3, %v2695_v7  ;;  %6761 = vmatpush3.bf16.msra.mxu0 %v8548_v28 }
0x1784   :  { %6771 = vmatpush3.bf16.msra.mxu1 %v8548_v28  ;;  %6762 = vmatprep.subr.bf16.mxu0 %v7592_v1 }
0x1785   :  { %6772 = vmatprep.subr.bf16.mxu1 %v7592_v1  ;;  %6766 = vmatprep.mubr.msk.bf16.mxu0 %vm7594_vm1, %v7592_v1 }
0x1786   :  { %6776 = vmatprep.mubr.msk.bf16.mxu1 %vm7594_vm1, %v7592_v1 }
0x1787   :  { %6763 = vmatpush3.bf16.msra.mxu0 %v8561_v29 }
0x1788   :  { %6773 = vmatpush3.bf16.msra.mxu1 %v8561_v29  ;;  %6764 = vmatprep.subr.bf16.mxu0 %v7592_v1 }
0x1789   :  { %6774 = vmatprep.subr.bf16.mxu1 %v7592_v1 }
0x178b   :  { %6765 = vmatpush3.bf16.msra.mxu0 %v7661_v8 }
0x178c   :  { %6775 = vmatpush3.bf16.msra.mxu1 %v7661_v8  ;;  %6780 = vmatprep.subr.bf16.mxu0 %v7592_v1 }
0x178d   :  { %6794 = vmatprep.subr.bf16.mxu1 %v7592_v1 }
0x1855   :  { %v2689_v11 = vpop.f32.mrb[108].mxu0 }
0x1856   :  { %v2739_v12 = vmul.f32 %v2689_v11, %v8505_v38  ;;  %v3105_v13 = vmul.f32 2.0, %v2689_v11  ;;  %v2733_v14 = vpop.f32.mrb[108].mxu1  ;;  %v6744_v32 = vpop.f32.mrb[109].mxu0 }
0x1857   :  { %v2741_v24 = vmul.f32 %v2733_v14, %v8505_v38  ;;  %v3113_v25 = vmul.f32 2.0, %v2733_v14  ;;  %v6758_v33 = vpop.f32.mrb[109].mxu1  ;;  %v2692_v34 = vpop.f32.mrb[110].mxu0 }
0x1858   :  { %v2740_v35 = vadd.f32 %v2739_v12, %v8433_v42  ;;  %v8575_v36 = vadd.f32 %v3105_v13, %v8507_v39  ;;  %v2736_v37 = vpop.f32.mrb[110].mxu1  ;;  %v6745_v40 = vpop.f32.mrb[111].mxu0 }
0x1859   :  { %v2742_v41 = vadd.f32 %v2741_v24, %v8436_v43  ;;  %v8579_v44 = vadd.f32 %v3113_v25, %v8511_v63  ;;  %v6759_v45 = vpop.f32.mrb[111].mxu1 }
0x185a   :  { %v2743_v30 = vpack.c.bf16 %v2740_v35, %v2740_v35  ;;  %v3110_v35 = vstv %s3104_s17 }
0x185b   :  { %v2787_v31 = vpack.c.bf16 %v2742_v41, %v2742_v41 }
0x185c   :  { %6767 = vmatmul.mubr.msk.bf16.vlgmr.msra.gmra.mrb[112].mxu0 %vm69_vm2, %v2743_v30 }
0x185d   :  { %6777 = vmatmul.mubr.msk.bf16.vlgmr.msra.gmra.mrb[112].mxu1 %vm69_vm2, %v2787_v31  ;;  %6781 = vmatpush3.bf16.msra.mxu0 %v8586_v46 }
0x185e   :  { %6795 = vmatpush3.bf16.msra.mxu1 %v8586_v46  ;;  %6782 = vmatprep.subr.bf16.mxu0 %v7592_v1 }
0x185f   :  { %6796 = vmatprep.subr.bf16.mxu1 %v7592_v1  ;;  %6790 = vmatprep.mubr.msk.bf16.mxu0 %vm7594_vm1, %v7592_v1 }
0x1860   :  { %6804 = vmatprep.mubr.msk.bf16.mxu1 %vm7594_vm1, %v7592_v1 }
0x1861   :  { %6783 = vmatpush3.bf16.msra.mxu0 %v8599_v47 }
0x1862   :  { %6797 = vmatpush3.bf16.msra.mxu1 %v8599_v47  ;;  %6784 = vmatprep.subr.bf16.mxu0 %v7592_v1 }
0x1863   :  { %6798 = vmatprep.subr.bf16.mxu1 %v7592_v1 }
0x1865   :  { %6785 = vmatpush3.bf16.msra.mxu0 %v8608_v48 }
0x1866   :  { %6799 = vmatpush3.bf16.msra.mxu1 %v8608_v48  ;;  %6786 = vmatprep.subr.bf16.mxu0 %v7592_v1 }
0x1867   :  { %6800 = vmatprep.subr.bf16.mxu1 %v7592_v1 }
0x1869   :  { %6787 = vmatpush3.bf16.msra.mxu0 %v8617_v49 }
0x186a   :  { %6801 = vmatpush3.bf16.msra.mxu1 %v8617_v49  ;;  %6788 = vmatprep.subr.bf16.mxu0 %v7592_v1 }
0x186b   :  { %6802 = vmatprep.subr.bf16.mxu1 %v7592_v1 }
0x186d   :  { %6789 = vmatpush3.bf16.msra.mxu0 %v7718_v16 }
0x186e   :  { %6803 = vmatpush3.bf16.msra.mxu1 %v7718_v16  ;;  %6808 = vmatprep.subr.bf16.mxu0 %v7592_v1 }
0x186f   :  { %6818 = vmatprep.subr.bf16.mxu1 %v7592_v1 }
0x192f   :  { %v2781_v50 = vpop.f32.mrb[112].mxu0 }
0x1930   :  { %7503 = vtanh.f32 %v2781_v50  ;;  %v2825_v51 = vpop.f32.mrb[112].mxu1  ;;  %v6768_v52 = vpop.f32.mrb[113].mxu0 }
0x1931   :  { %7505 = vtanh.f32 %v2825_v51  ;;  %v6778_v53 = vpop.f32.mrb[113].mxu1  ;;  %v2784_v54 = vpop.f32.mrb[114].mxu0 }
0x1932   :  { %v2828_v55 = vpop.f32.mrb[114].mxu1  ;;  %v6769_v56 = vpop.f32.mrb[115].mxu0 }
0x1933   :  { %v6779_v57 = vpop.f32.mrb[115].mxu1 }
0x193a   :  { %v7504_v38 = vpop.eup %7503 }
0x193b   :  { %v7506_v39 = vpop.eup %7505  ;;  %v2833_v58 = vpack.c.bf16 %v7504_v38, %v7504_v38 }
0x193c   :  { %v2877_v63 = vpack.c.bf16 %v7506_v39, %v7506_v39 }
0x193d   :  { %6791 = vmatmul.mubr.msk.bf16.vlgmr.msra.gmra.mrb[116].mxu0 %vm193_vm3, %v2833_v58 }
0x193e   :  { %6805 = vmatmul.mubr.msk.bf16.vlgmr.msra.gmra.mrb[116].mxu1 %vm193_vm3, %v2877_v63  ;;  %6809 = vmatpush3.bf16.msra.mxu0 %v8548_v28 }
0x193f   :  { %6819 = vmatpush3.bf16.msra.mxu1 %v8548_v28  ;;  %6810 = vmatprep.subr.bf16.mxu0 %v7592_v1 }
0x1940   :  { %6820 = vmatprep.subr.bf16.mxu1 %v7592_v1  ;;  %6814 = vmatprep.mubr.msk.bf16.mxu0 %vm7594_vm1, %v7592_v1 }
0x1941   :  { %6824 = vmatprep.mubr.msk.bf16.mxu1 %vm7594_vm1, %v7592_v1 }
0x1942   :  { %6811 = vmatpush3.bf16.msra.mxu0 %v8561_v29 }
0x1943   :  { %6821 = vmatpush3.bf16.msra.mxu1 %v8561_v29  ;;  %6812 = vmatprep.subr.bf16.mxu0 %v7592_v1 }
0x1944   :  { %6822 = vmatprep.subr.bf16.mxu1 %v7592_v1 }
0x1946   :  { %6813 = vmatpush3.bf16.msra.mxu0 %v7661_v8 }
0x1947   :  { %6823 = vmatpush3.bf16.msra.mxu1 %v7661_v8  ;;  %6828 = vmatprep.subr.bf16.mxu0 %v7592_v1 }
0x1948   :  { %6842 = vmatprep.subr.bf16.mxu1 %v7592_v1 }
0x1a10   :  { %v2871_v4 = vpop.f32.mrb[116].mxu0 }
0x1a11   :  { %v2922_v5 = vmul.f32 %v2921_v3, %v2871_v4  ;;  %v3107_v0 = vmul.f32 2.0, %v2871_v4  ;;  %v2915_v9 = vpop.f32.mrb[116].mxu1  ;;  %v6792_v10 = vpop.f32.mrb[117].mxu0 }
0x1a12   :  { %v2924_v15 = vmul.f32 %v2921_v3, %v2915_v9  ;;  %v3115_v17 = vmul.f32 2.0, %v2915_v9  ;;  %v6806_v2 = vpop.f32.mrb[117].mxu1  ;;  %v2874_v18 = vpop.f32.mrb[118].mxu0  ;;  %v8772_v10 = vstv %s3303_s25 }
0x1a13   :  { %v2923_v19 = vadd.f32 %v2922_v5, %v8433_v42  ;;  %v2918_v59 = vpop.f32.mrb[118].mxu1  ;;  %v6793_v60 = vpop.f32.mrb[119].mxu0  ;;  %v8648_v61 = vadd.f32 %v3107_v0, %v8575_v36 }
0x1a14   :  { %v2925_v20 = vadd.f32 %v2924_v15, %v8436_v43  ;;  %v6807_v21 = vpop.f32.mrb[119].mxu1  ;;  %v8652_v62 = vadd.f32 %v3115_v17, %v8579_v44 }
0x1a15   :  { %v2926_v22 = vpack.c.bf16 %v2923_v19, %v2923_v19 }
0x1a16   :  { %v2970_v23 = vpack.c.bf16 %v2925_v20, %v2925_v20 }
0x1a17   :  { %6815 = vmatmul.mubr.msk.bf16.vlgmr.msra.gmra.mrb[120].mxu0 %vm69_vm2, %v2926_v22 }
0x1a18   :  { %6825 = vmatmul.mubr.msk.bf16.vlgmr.msra.gmra.mrb[120].mxu1 %vm69_vm2, %v2970_v23  ;;  %6829 = vmatpush3.bf16.msra.mxu0 %v8586_v46 }
0x1a19   :  { %6843 = vmatpush3.bf16.msra.mxu1 %v8586_v46  ;;  %6830 = vmatprep.subr.bf16.mxu0 %v7592_v1 }
0x1a1a   :  { %6844 = vmatprep.subr.bf16.mxu1 %v7592_v1  ;;  %6838 = vmatprep.mubr.msk.bf16.mxu0 %vm7594_vm1, %v7592_v1 }
0x1a1b   :  { %6852 = vmatprep.mubr.msk.bf16.mxu1 %vm7594_vm1, %v7592_v1 }
0x1a1c   :  { %6831 = vmatpush3.bf16.msra.mxu0 %v8599_v47 }
0x1a1d   :  { %6845 = vmatpush3.bf16.msra.mxu1 %v8599_v47  ;;  %6832 = vmatprep.subr.bf16.mxu0 %v7592_v1 }
0x1a1e   :  { %6846 = vmatprep.subr.bf16.mxu1 %v7592_v1 }
0x1a20   :  { %6833 = vmatpush3.bf16.msra.mxu0 %v8608_v48 }
0x1a21   :  { %6847 = vmatpush3.bf16.msra.mxu1 %v8608_v48  ;;  %6834 = vmatprep.subr.bf16.mxu0 %v7592_v1 }
0x1a22   :  { %6848 = vmatprep.subr.bf16.mxu1 %v7592_v1 }
0x1a24   :  { %6835 = vmatpush3.bf16.msra.mxu0 %v8617_v49 }
0x1a25   :  { %6849 = vmatpush3.bf16.msra.mxu1 %v8617_v49  ;;  %6836 = vmatprep.subr.bf16.mxu0 %v7592_v1 }
0x1a26   :  { %6850 = vmatprep.subr.bf16.mxu1 %v7592_v1 }
0x1a28   :  { %6837 = vmatpush3.bf16.msra.mxu0 %v7718_v16 }
0x1a29   :  { %6851 = vmatpush3.bf16.msra.mxu1 %v7718_v16  ;;  %6856 = vmatprep.subr.bf16.mxu0 %v7592_v1 }
0x1a2a   :  { %6866 = vmatprep.subr.bf16.mxu1 %v7592_v1 }
0x1aea   :  { %v2964_v26 = vpop.f32.mrb[120].mxu0 }
0x1aeb   :  { %7507 = vtanh.f32 %v2964_v26  ;;  %v3008_v27 = vpop.f32.mrb[120].mxu1  ;;  %v6816_v6 = vpop.f32.mrb[121].mxu0 }
0x1aec   :  { %7509 = vtanh.f32 %v3008_v27  ;;  %v6826_v7 = vpop.f32.mrb[121].mxu1  ;;  %v2967_v11 = vpop.f32.mrb[122].mxu0 }
0x1aed   :  { %v3011_v12 = vpop.f32.mrb[122].mxu1  ;;  %v6817_v13 = vpop.f32.mrb[123].mxu0 }
0x1aee   :  { %v6827_v14 = vpop.f32.mrb[123].mxu1 }
0x1af5   :  { %v7508_v32 = vpop.eup %7507 }
0x1af6   :  { %v7510_v24 = vpop.eup %7509  ;;  %v3016_v25 = vpack.c.bf16 %v7508_v32, %v7508_v32 }
0x1af7   :  { %v3060_v33 = vpack.c.bf16 %v7510_v24, %v7510_v24 }
0x1af8   :  { %6839 = vmatmul.mubr.msk.bf16.vlgmr.msra.gmra.mrb[124].mxu0 %vm193_vm3, %v3016_v25 }
0x1af9   :  { %6853 = vmatmul.mubr.msk.bf16.vlgmr.msra.gmra.mrb[124].mxu1 %vm193_vm3, %v3060_v33  ;;  %6857 = vmatpush3.bf16.msra.mxu0 %v8548_v28 }
0x1afa   :  { %6867 = vmatpush3.bf16.msra.mxu1 %v8548_v28  ;;  %6858 = vmatprep.subr.bf16.mxu0 %v7592_v1 }
0x1afb   :  { %6868 = vmatprep.subr.bf16.mxu1 %v7592_v1  ;;  %6862 = vmatprep.mubr.msk.bf16.mxu0 %vm7594_vm1, %v7592_v1 }
0x1afc   :  { %6872 = vmatprep.mubr.msk.bf16.mxu1 %vm7594_vm1, %v7592_v1 }
0x1afd   :  { %6859 = vmatpush3.bf16.msra.mxu0 %v8561_v29 }
0x1afe   :  { %6869 = vmatpush3.bf16.msra.mxu1 %v8561_v29  ;;  %6860 = vmatprep.subr.bf16.mxu0 %v7592_v1 }
0x1aff   :  { %6870 = vmatprep.subr.bf16.mxu1 %v7592_v1 }
0x1b01   :  { %6861 = vmatpush3.bf16.msra.mxu0 %v7661_v8 }
0x1b02   :  { %6871 = vmatpush3.bf16.msra.mxu1 %v7661_v8  ;;  %6876 = vmatprep.subr.bf16.mxu0 %v7592_v1 }
0x1b03   :  { %6890 = vmatprep.subr.bf16.mxu1 %v7592_v1 }
0x1bcb   :  { %v3054_v34 = vpop.f32.mrb[124].mxu0 }
0x1bcc   :  { %v3109_v36 = vadd.f32 %v8648_v61, %v3054_v34  ;;  %v3098_v37 = vpop.f32.mrb[124].mxu1  ;;  %v6840_v40 = vpop.f32.mrb[125].mxu0 }
0x1bcd   :  { %v3117_v41 = vadd.f32 %v8652_v62, %v3098_v37  ;;  %v6854_v44 = vpop.f32.mrb[125].mxu1  ;;  %v3057_v45 = vpop.f32.mrb[126].mxu0 }
0x1bce   :  { %v3111_v30 = vmul.f32 %v3110_v35, %v3109_v36  ;;  %v3101_v31 = vpop.f32.mrb[126].mxu1  ;;  %v6841_v50 = vpop.f32.mrb[127].mxu0 }
0x1bcf   :  { %v3118_v51 = vmul.f32 %v3117_v41, %v3110_v35  ;;  %v6855_v52 = vpop.f32.mrb[127].mxu1 }
0x1bd0   :  { %v8702_v53 = vadd.f32 %v3111_v30, %v8433_v42 }
0x1bd1   :  { %v8705_v54 = vadd.f32 %v3118_v51, %v8436_v43 }
0x1bd2   :  { %3120 = vst.msk [vmem:[%s9435_s4 + $0x8] sm:$0xff] %vm47_vm4, %v8702_v53  ;;  %v3125_v55 = vpack.c.bf16 %v8702_v53, %v8702_v53 }
0x1bd3   :  { %3121 = vst.msk [vmem:[%s9435_s4 + $0x18] sm:$0xff] %vm47_vm4, %v8705_v54  ;;  %v3169_v42 = vpack.c.bf16 %v8705_v54, %v8705_v54 }
0x1bd4   :  { %6863 = vmatmul.mubr.msk.bf16.vlgmr.msra.gmra.mrb[128].mxu0 %vm69_vm2, %v3125_v55 }
0x1bd5   :  { %6873 = vmatmul.mubr.msk.bf16.vlgmr.msra.gmra.mrb[128].mxu1 %vm69_vm2, %v3169_v42  ;;  %6877 = vmatpush3.bf16.msra.mxu0 %v8586_v46 }
0x1bd6   :  { %6891 = vmatpush3.bf16.msra.mxu1 %v8586_v46  ;;  %6878 = vmatprep.subr.bf16.mxu0 %v7592_v1 }
0x1bd7   :  { %6892 = vmatprep.subr.bf16.mxu1 %v7592_v1  ;;  %6886 = vmatprep.mubr.msk.bf16.mxu0 %vm7594_vm1, %v7592_v1 }
0x1bd8   :  { %6900 = vmatprep.mubr.msk.bf16.mxu1 %vm7594_vm1, %v7592_v1 }
0x1bd9   :  { %6879 = vmatpush3.bf16.msra.mxu0 %v8599_v47 }
0x1bda   :  { %6893 = vmatpush3.bf16.msra.mxu1 %v8599_v47  ;;  %6880 = vmatprep.subr.bf16.mxu0 %v7592_v1 }
0x1bdb   :  { %6894 = vmatprep.subr.bf16.mxu1 %v7592_v1 }
0x1bdd   :  { %6881 = vmatpush3.bf16.msra.mxu0 %v8608_v48 }
0x1bde   :  { %6895 = vmatpush3.bf16.msra.mxu1 %v8608_v48  ;;  %6882 = vmatprep.subr.bf16.mxu0 %v7592_v1 }
0x1bdf   :  { %6896 = vmatprep.subr.bf16.mxu1 %v7592_v1 }
0x1be1   :  { %6883 = vmatpush3.bf16.msra.mxu0 %v8617_v49 }
0x1be2   :  { %6897 = vmatpush3.bf16.msra.mxu1 %v8617_v49  ;;  %6884 = vmatprep.subr.bf16.mxu0 %v7592_v1 }
0x1be3   :  { %6898 = vmatprep.subr.bf16.mxu1 %v7592_v1 }
0x1be5   :  { %6885 = vmatpush3.bf16.msra.mxu0 %v7718_v16 }
0x1be6   :  { %6899 = vmatpush3.bf16.msra.mxu1 %v7718_v16  ;;  %6904 = vmatprep.subr.bf16.mxu0 %v7592_v1 }
0x1be7   :  { %6914 = vmatprep.subr.bf16.mxu1 %v7592_v1 }
0x1ca7   :  { %v3163_v43 = vpop.f32.mrb[128].mxu0 }
0x1ca8   :  { %7511 = vtanh.f32 %v3163_v43  ;;  %v3207_v56 = vpop.f32.mrb[128].mxu1  ;;  %v6864_v57 = vpop.f32.mrb[129].mxu0 }
0x1ca9   :  { %7513 = vtanh.f32 %v3207_v56  ;;  %v6874_v38 = vpop.f32.mrb[129].mxu1  ;;  %v3166_v39 = vpop.f32.mrb[130].mxu0 }
0x1caa   :  { %v3210_v58 = vpop.f32.mrb[130].mxu1  ;;  %v6865_v63 = vpop.f32.mrb[131].mxu0 }
0x1cab   :  { %v6875_v3 = vpop.f32.mrb[131].mxu1 }
0x1cb2   :  { %v7512_v4 = vpop.eup %7511 }
0x1cb3   :  { %v7514_v5 = vpop.eup %7513  ;;  %v3215_v0 = vpack.c.bf16 %v7512_v4, %v7512_v4 }
0x1cb4   :  { %v3259_v9 = vpack.c.bf16 %v7514_v5, %v7514_v5 }
0x1cb5   :  { %6887 = vmatmul.mubr.msk.bf16.vlgmr.msra.gmra.mrb[132].mxu0 %vm193_vm3, %v3215_v0 }
0x1cb6   :  { %6901 = vmatmul.mubr.msk.bf16.vlgmr.msra.gmra.mrb[132].mxu1 %vm193_vm3, %v3259_v9  ;;  %6905 = vmatpush3.bf16.msra.mxu0 %v8548_v28 }
0x1cb7   :  { %6915 = vmatpush3.bf16.msra.mxu1 %v8548_v28  ;;  %6906 = vmatprep.subr.bf16.mxu0 %v7592_v1 }
0x1cb8   :  { %6916 = vmatprep.subr.bf16.mxu1 %v7592_v1  ;;  %6910 = vmatprep.mubr.msk.bf16.mxu0 %vm7594_vm1, %v7592_v1 }
0x1cb9   :  { %6920 = vmatprep.mubr.msk.bf16.mxu1 %vm7594_vm1, %v7592_v1 }
0x1cba   :  { %6907 = vmatpush3.bf16.msra.mxu0 %v8561_v29 }
0x1cbb   :  { %6917 = vmatpush3.bf16.msra.mxu1 %v8561_v29  ;;  %6908 = vmatprep.subr.bf16.mxu0 %v7592_v1 }
0x1cbc   :  { %6918 = vmatprep.subr.bf16.mxu1 %v7592_v1 }
0x1cbe   :  { %6909 = vmatpush3.bf16.msra.mxu0 %v7661_v8 }
0x1cbf   :  { %6919 = vmatpush3.bf16.msra.mxu1 %v7661_v8  ;;  %6924 = vmatprep.subr.bf16.mxu0 %v7592_v1 }
0x1cc0   :  { %6938 = vmatprep.subr.bf16.mxu1 %v7592_v1 }
0x1d88   :  { %v8774_v15 = vpop.f32.mrb[132].mxu0 }
0x1d89   :  { %v3305_v17 = vmul.f32 %v8772_v10, %v8774_v15  ;;  %v8778_v2 = vpop.f32.mrb[132].mxu1  ;;  %v6888_v18 = vpop.f32.mrb[133].mxu0 }
0x1d8a   :  { %v3307_v19 = vmul.f32 %v8772_v10, %v8778_v2  ;;  %v6902_v59 = vpop.f32.mrb[133].mxu1  ;;  %v3256_v60 = vpop.f32.mrb[134].mxu0  ;;  %v3669_v18 = vstv %s8769_s24 }
0x1d8b   :  { %v3306_v61 = vadd.f32 %v3305_v17, %v8702_v53  ;;  %v3300_v20 = vpop.f32.mrb[134].mxu1  ;;  %v6889_v21 = vpop.f32.mrb[135].mxu0 }
0x1d8c   :  { %v3308_v62 = vadd.f32 %v3307_v19, %v8705_v54  ;;  %v6903_v22 = vpop.f32.mrb[135].mxu1 }
0x1d8d   :  { %v3309_v23 = vpack.c.bf16 %v3306_v61, %v3306_v61 }
0x1d8e   :  { %v3353_v26 = vpack.c.bf16 %v3308_v62, %v3308_v62 }
0x1d8f   :  { %6911 = vmatmul.mubr.msk.bf16.vlgmr.msra.gmra.mrb[136].mxu0 %vm69_vm2, %v3309_v23 }
0x1d90   :  { %6921 = vmatmul.mubr.msk.bf16.vlgmr.msra.gmra.mrb[136].mxu1 %vm69_vm2, %v3353_v26  ;;  %6925 = vmatpush3.bf16.msra.mxu0 %v8586_v46 }
0x1d91   :  { %6939 = vmatpush3.bf16.msra.mxu1 %v8586_v46  ;;  %6926 = vmatprep.subr.bf16.mxu0 %v7592_v1 }
0x1d92   :  { %6940 = vmatprep.subr.bf16.mxu1 %v7592_v1  ;;  %6934 = vmatprep.mubr.msk.bf16.mxu0 %vm7594_vm1, %v7592_v1 }
0x1d93   :  { %6948 = vmatprep.mubr.msk.bf16.mxu1 %vm7594_vm1, %v7592_v1 }
0x1d94   :  { %6927 = vmatpush3.bf16.msra.mxu0 %v8599_v47 }
0x1d95   :  { %6941 = vmatpush3.bf16.msra.mxu1 %v8599_v47  ;;  %6928 = vmatprep.subr.bf16.mxu0 %v7592_v1 }
0x1d96   :  { %6942 = vmatprep.subr.bf16.mxu1 %v7592_v1 }
0x1d98   :  { %6929 = vmatpush3.bf16.msra.mxu0 %v8608_v48 }
0x1d99   :  { %6943 = vmatpush3.bf16.msra.mxu1 %v8608_v48  ;;  %6930 = vmatprep.subr.bf16.mxu0 %v7592_v1 }
0x1d9a   :  { %6944 = vmatprep.subr.bf16.mxu1 %v7592_v1 }
0x1d9c   :  { %6931 = vmatpush3.bf16.msra.mxu0 %v8617_v49 }
0x1d9d   :  { %6945 = vmatpush3.bf16.msra.mxu1 %v8617_v49  ;;  %6932 = vmatprep.subr.bf16.mxu0 %v7592_v1 }
0x1d9e   :  { %6946 = vmatprep.subr.bf16.mxu1 %v7592_v1 }
0x1da0   :  { %6933 = vmatpush3.bf16.msra.mxu0 %v7718_v16 }
0x1da1   :  { %6947 = vmatpush3.bf16.msra.mxu1 %v7718_v16  ;;  %6952 = vmatprep.subr.bf16.mxu0 %v7592_v1 }
0x1da2   :  { %6962 = vmatprep.subr.bf16.mxu1 %v7592_v1 }
0x1e62   :  { %v3347_v27 = vpop.f32.mrb[136].mxu0 }
0x1e63   :  { %7515 = vtanh.f32 %v3347_v27  ;;  %v3391_v6 = vpop.f32.mrb[136].mxu1  ;;  %v6912_v7 = vpop.f32.mrb[137].mxu0 }
0x1e64   :  { %7517 = vtanh.f32 %v3391_v6  ;;  %v6922_v11 = vpop.f32.mrb[137].mxu1  ;;  %v3350_v12 = vpop.f32.mrb[138].mxu0 }
0x1e65   :  { %v3394_v13 = vpop.f32.mrb[138].mxu1  ;;  %v6913_v14 = vpop.f32.mrb[139].mxu0 }
0x1e66   :  { %v6923_v32 = vpop.f32.mrb[139].mxu1 }
0x1e6d   :  { %v7516_v24 = vpop.eup %7515 }
0x1e6e   :  { %v7518_v25 = vpop.eup %7517  ;;  %v3399_v33 = vpack.c.bf16 %v7516_v24, %v7516_v24 }
0x1e6f   :  { %v3443_v34 = vpack.c.bf16 %v7518_v25, %v7518_v25 }
0x1e70   :  { %6935 = vmatmul.mubr.msk.bf16.vlgmr.msra.gmra.mrb[140].mxu0 %vm193_vm3, %v3399_v33 }
0x1e71   :  { %6949 = vmatmul.mubr.msk.bf16.vlgmr.msra.gmra.mrb[140].mxu1 %vm193_vm3, %v3443_v34  ;;  %6953 = vmatpush3.bf16.msra.mxu0 %v8548_v28 }
0x1e72   :  { %6963 = vmatpush3.bf16.msra.mxu1 %v8548_v28  ;;  %6954 = vmatprep.subr.bf16.mxu0 %v7592_v1 }
0x1e73   :  { %6964 = vmatprep.subr.bf16.mxu1 %v7592_v1  ;;  %6958 = vmatprep.mubr.msk.bf16.mxu0 %vm7594_vm1, %v7592_v1 }
0x1e74   :  { %6968 = vmatprep.mubr.msk.bf16.mxu1 %vm7594_vm1, %v7592_v1 }
0x1e75   :  { %6955 = vmatpush3.bf16.msra.mxu0 %v8561_v29 }
0x1e76   :  { %6965 = vmatpush3.bf16.msra.mxu1 %v8561_v29  ;;  %6956 = vmatprep.subr.bf16.mxu0 %v7592_v1 }
0x1e77   :  { %6966 = vmatprep.subr.bf16.mxu1 %v7592_v1 }
0x1e79   :  { %6957 = vmatpush3.bf16.msra.mxu0 %v7661_v8 }
0x1e7a   :  { %6967 = vmatpush3.bf16.msra.mxu1 %v7661_v8  ;;  %6972 = vmatprep.subr.bf16.mxu0 %v7592_v1 }
0x1e7b   :  { %6986 = vmatprep.subr.bf16.mxu1 %v7592_v1 }
0x1f43   :  { %v3437_v35 = vpop.f32.mrb[140].mxu0 }
0x1f44   :  { %v3487_v36 = vmul.f32 %v3437_v35, %v8772_v10  ;;  %v3853_v37 = vmul.f32 2.0, %v3437_v35  ;;  %v3481_v40 = vpop.f32.mrb[140].mxu1  ;;  %v6936_v41 = vpop.f32.mrb[141].mxu0 }
0x1f45   :  { %v3489_v44 = vmul.f32 %v3481_v40, %v8772_v10  ;;  %v3861_v45 = vmul.f32 2.0, %v3481_v40  ;;  %v6950_v30 = vpop.f32.mrb[141].mxu1  ;;  %v3440_v31 = vpop.f32.mrb[142].mxu0 }
0x1f46   :  { %v3488_v50 = vadd.f32 %v3487_v36, %v8702_v53  ;;  %v8832_v51 = vadd.f32 %v3853_v37, %v8774_v15  ;;  %v3484_v52 = vpop.f32.mrb[142].mxu1  ;;  %v6937_v55 = vpop.f32.mrb[143].mxu0  ;;  %v3858_v31 = vstv %s3852_s26 }
0x1f47   :  { %v3490_v42 = vadd.f32 %v3489_v44, %v8705_v54  ;;  %v8836_v43 = vadd.f32 %v3861_v45, %v8778_v2  ;;  %v6951_v56 = vpop.f32.mrb[143].mxu1 }
0x1f48   :  { %v3491_v57 = vpack.c.bf16 %v3488_v50, %v3488_v50 }
0x1f49   :  { %v3535_v38 = vpack.c.bf16 %v3490_v42, %v3490_v42 }
0x1f4a   :  { %6959 = vmatmul.mubr.msk.bf16.vlgmr.msra.gmra.mrb[144].mxu0 %vm69_vm2, %v3491_v57 }
0x1f4b   :  { %6969 = vmatmul.mubr.msk.bf16.vlgmr.msra.gmra.mrb[144].mxu1 %vm69_vm2, %v3535_v38  ;;  %6973 = vmatpush3.bf16.msra.mxu0 %v8586_v46 }
0x1f4c   :  { %6987 = vmatpush3.bf16.msra.mxu1 %v8586_v46  ;;  %6974 = vmatprep.subr.bf16.mxu0 %v7592_v1 }
0x1f4d   :  { %6988 = vmatprep.subr.bf16.mxu1 %v7592_v1  ;;  %6982 = vmatprep.mubr.msk.bf16.mxu0 %vm7594_vm1, %v7592_v1 }
0x1f4e   :  { %6996 = vmatprep.mubr.msk.bf16.mxu1 %vm7594_vm1, %v7592_v1 }
0x1f4f   :  { %6975 = vmatpush3.bf16.msra.mxu0 %v8599_v47 }
0x1f50   :  { %6989 = vmatpush3.bf16.msra.mxu1 %v8599_v47  ;;  %6976 = vmatprep.subr.bf16.mxu0 %v7592_v1 }
0x1f51   :  { %6990 = vmatprep.subr.bf16.mxu1 %v7592_v1 }
0x1f53   :  { %6977 = vmatpush3.bf16.msra.mxu0 %v8608_v48 }
0x1f54   :  { %6991 = vmatpush3.bf16.msra.mxu1 %v8608_v48  ;;  %6978 = vmatprep.subr.bf16.mxu0 %v7592_v1 }
0x1f55   :  { %6992 = vmatprep.subr.bf16.mxu1 %v7592_v1 }
0x1f57   :  { %6979 = vmatpush3.bf16.msra.mxu0 %v8617_v49 }
0x1f58   :  { %6993 = vmatpush3.bf16.msra.mxu1 %v8617_v49  ;;  %6980 = vmatprep.subr.bf16.mxu0 %v7592_v1 }
0x1f59   :  { %6994 = vmatprep.subr.bf16.mxu1 %v7592_v1 }
0x1f5b   :  { %6981 = vmatpush3.bf16.msra.mxu0 %v7718_v16 }
0x1f5c   :  { %6995 = vmatpush3.bf16.msra.mxu1 %v7718_v16  ;;  %7000 = vmatprep.subr.bf16.mxu0 %v7592_v1 }
0x1f5d   :  { %7010 = vmatprep.subr.bf16.mxu1 %v7592_v1 }
0x201d   :  { %v3529_v39 = vpop.f32.mrb[144].mxu0 }
0x201e   :  { %7519 = vtanh.f32 %v3529_v39  ;;  %v3573_v58 = vpop.f32.mrb[144].mxu1  ;;  %v6960_v63 = vpop.f32.mrb[145].mxu0 }
0x201f   :  { %7521 = vtanh.f32 %v3573_v58  ;;  %v6970_v3 = vpop.f32.mrb[145].mxu1  ;;  %v3532_v4 = vpop.f32.mrb[146].mxu0 }
0x2020   :  { %v3576_v5 = vpop.f32.mrb[146].mxu1  ;;  %v6961_v0 = vpop.f32.mrb[147].mxu0 }
0x2021   :  { %v6971_v9 = vpop.f32.mrb[147].mxu1 }
0x2028   :  { %v7520_v10 = vpop.eup %7519 }
0x2029   :  { %v7522_v15 = vpop.eup %7521  ;;  %v3581_v17 = vpack.c.bf16 %v7520_v10, %v7520_v10 }
0x202a   :  { %v3625_v2 = vpack.c.bf16 %v7522_v15, %v7522_v15 }
0x202b   :  { %6983 = vmatmul.mubr.msk.bf16.vlgmr.msra.gmra.mrb[148].mxu0 %vm193_vm3, %v3581_v17 }
0x202c   :  { %6997 = vmatmul.mubr.msk.bf16.vlgmr.msra.gmra.mrb[148].mxu1 %vm193_vm3, %v3625_v2  ;;  %7001 = vmatpush3.bf16.msra.mxu0 %v8548_v28 }
0x202d   :  { %7011 = vmatpush3.bf16.msra.mxu1 %v8548_v28  ;;  %7002 = vmatprep.subr.bf16.mxu0 %v7592_v1 }
0x202e   :  { %7012 = vmatprep.subr.bf16.mxu1 %v7592_v1  ;;  %7006 = vmatprep.mubr.msk.bf16.mxu0 %vm7594_vm1, %v7592_v1 }
0x202f   :  { %7016 = vmatprep.mubr.msk.bf16.mxu1 %vm7594_vm1, %v7592_v1 }
0x2030   :  { %7003 = vmatpush3.bf16.msra.mxu0 %v8561_v29 }
0x2031   :  { %7013 = vmatpush3.bf16.msra.mxu1 %v8561_v29  ;;  %7004 = vmatprep.subr.bf16.mxu0 %v7592_v1 }
0x2032   :  { %7014 = vmatprep.subr.bf16.mxu1 %v7592_v1 }
0x2034   :  { %7005 = vmatpush3.bf16.msra.mxu0 %v7661_v8 }
0x2035   :  { %7015 = vmatpush3.bf16.msra.mxu1 %v7661_v8  ;;  %7020 = vmatprep.subr.bf16.mxu0 %v7592_v1 }
0x2036   :  { %7034 = vmatprep.subr.bf16.mxu1 %v7592_v1 }
0x20fe   :  { %v3619_v19 = vpop.f32.mrb[148].mxu0 }
0x20ff   :  { %v3670_v59 = vmul.f32 %v3669_v18, %v3619_v19  ;;  %v3855_v60 = vmul.f32 2.0, %v3619_v19  ;;  %v3663_v61 = vpop.f32.mrb[148].mxu1  ;;  %v6984_v20 = vpop.f32.mrb[149].mxu0  ;;  %v8991_v19 = vld [vmem:[%s9433_s2] sm:$0xff]  }
0x2100   :  { %v3672_v21 = vmul.f32 %v3669_v18, %v3663_v61  ;;  %v3863_v62 = vmul.f32 2.0, %v3663_v61  ;;  %v6998_v22 = vpop.f32.mrb[149].mxu1  ;;  %v3622_v23 = vpop.f32.mrb[150].mxu0 }
0x2101   :  { %v3671_v26 = vadd.f32 %v3670_v59, %v8702_v53  ;;  %v3666_v27 = vpop.f32.mrb[150].mxu1  ;;  %v6985_v6 = vpop.f32.mrb[151].mxu0  ;;  %v8885_v7 = vadd.f32 %v3855_v60, %v8832_v51  ;;  %v9004_v59 = vld [vmem:[%s9433_s2 + $0x8] sm:$0xff]   ;;  %s9018_s2 = ssub.f32 %s9014_s7, %s8765_s22 }
0x2102   :  { %v3673_v11 = vadd.f32 %v3672_v21, %v8705_v54  ;;  %v6999_v12 = vpop.f32.mrb[151].mxu1  ;;  %v8889_v13 = vadd.f32 %v3863_v62, %v8836_v43  ;;  %s9274_s22 = ssub.f32 %s5510_s0, %s9014_s7 }
0x2103   :  { %v3674_v14 = vpack.c.bf16 %v3671_v26, %v3671_v26  ;;  %s4059_s8 = smul.f32 0.5, %s9018_s2 }
0x2104   :  { %v3718_v32 = vpack.c.bf16 %v3673_v11, %v3673_v11  ;;  %s4815_s24 = smul.f32 0.5, %s9274_s22 }
0x2105   :  { %7007 = vmatmul.mubr.msk.bf16.vlgmr.msra.gmra.mrb[152].mxu0 %vm69_vm2, %v3674_v14  ;;  %v9021_v60 = vstv %s4059_s8  ;;  %s5364_s25 = smul.f32 0.16666667, %s9274_s22 }
0x2106   :  { %7017 = vmatmul.mubr.msk.bf16.vlgmr.msra.gmra.mrb[152].mxu1 %vm69_vm2, %v3718_v32  ;;  %7021 = vmatpush3.bf16.msra.mxu0 %v8586_v46  ;;  %v9038_v32 = vld [vmem:[%s9434_s3] sm:$0xff]  }
0x2107   :  { %7035 = vmatpush3.bf16.msra.mxu1 %v8586_v46  ;;  %7022 = vmatprep.subr.bf16.mxu0 %v7592_v1 }
0x2108   :  { %7036 = vmatprep.subr.bf16.mxu1 %v7592_v1  ;;  %7030 = vmatprep.mubr.msk.bf16.mxu0 %vm7594_vm1, %v7592_v1 }
0x2109   :  { %7044 = vmatprep.mubr.msk.bf16.mxu1 %vm7594_vm1, %v7592_v1 }
0x210a   :  { %7023 = vmatpush3.bf16.msra.mxu0 %v8599_v47 }
0x210b   :  { %7037 = vmatpush3.bf16.msra.mxu1 %v8599_v47  ;;  %7024 = vmatprep.subr.bf16.mxu0 %v7592_v1 }
0x210c   :  { %7038 = vmatprep.subr.bf16.mxu1 %v7592_v1 }
0x210e   :  { %7025 = vmatpush3.bf16.msra.mxu0 %v8608_v48 }
0x210f   :  { %7039 = vmatpush3.bf16.msra.mxu1 %v8608_v48  ;;  %7026 = vmatprep.subr.bf16.mxu0 %v7592_v1 }
0x2110   :  { %7040 = vmatprep.subr.bf16.mxu1 %v7592_v1 }
0x2112   :  { %7027 = vmatpush3.bf16.msra.mxu0 %v8617_v49 }
0x2113   :  { %7041 = vmatpush3.bf16.msra.mxu1 %v8617_v49  ;;  %7028 = vmatprep.subr.bf16.mxu0 %v7592_v1 }
0x2114   :  { %7042 = vmatprep.subr.bf16.mxu1 %v7592_v1 }
0x2116   :  { %7029 = vmatpush3.bf16.msra.mxu0 %v7718_v16 }
0x2117   :  { %7043 = vmatpush3.bf16.msra.mxu1 %v7718_v16  ;;  %7048 = vmatprep.subr.bf16.mxu0 %v7592_v1 }
0x2118   :  { %7058 = vmatprep.subr.bf16.mxu1 %v7592_v1 }
0x21d8   :  { %v3712_v24 = vpop.f32.mrb[152].mxu0 }
0x21d9   :  { %7523 = vtanh.f32 %v3712_v24  ;;  %v3756_v25 = vpop.f32.mrb[152].mxu1  ;;  %v7008_v33 = vpop.f32.mrb[153].mxu0  ;;  %v9051_v24 = vld [vmem:[%s9434_s3 + $0x8] sm:$0xff]  }
0x21da   :  { %7525 = vtanh.f32 %v3756_v25  ;;  %v7018_v34 = vpop.f32.mrb[153].mxu1  ;;  %v3715_v35 = vpop.f32.mrb[154].mxu0  ;;  %v9060_v25 = vld [vmem:[%s9434_s3 + $0x10] sm:$0xff]   ;;  %v9069_v33 = vld [vmem:[%s9434_s3 + $0x18] sm:$0xff]   ;;  %s4608_s3 = smul.f32 0.16666667, %s9018_s2 }
0x21db   :  { %v3759_v36 = vpop.f32.mrb[154].mxu1  ;;  %v7009_v37 = vpop.f32.mrb[155].mxu0 }
0x21dc   :  { %v7019_v40 = vpop.f32.mrb[155].mxu1 }
0x21e3   :  { %v7524_v41 = vpop.eup %7523 }
0x21e4   :  { %v7526_v44 = vpop.eup %7525  ;;  %v3764_v45 = vpack.c.bf16 %v7524_v41, %v7524_v41 }
0x21e5   :  { %v3808_v30 = vpack.c.bf16 %v7526_v44, %v7526_v44 }
0x21e6   :  { %7031 = vmatmul.mubr.msk.bf16.vlgmr.msra.gmra.mrb[156].mxu0 %vm193_vm3, %v3764_v45 }
0x21e7   :  { %7045 = vmatmul.mubr.msk.bf16.vlgmr.msra.gmra.mrb[156].mxu1 %vm193_vm3, %v3808_v30  ;;  %7049 = vmatpush3.bf16.msra.mxu0 %v8548_v28 }
0x21e8   :  { %7059 = vmatpush3.bf16.msra.mxu1 %v8548_v28  ;;  %7050 = vmatprep.subr.bf16.mxu0 %v7592_v1 }
0x21e9   :  { %7060 = vmatprep.subr.bf16.mxu1 %v7592_v1  ;;  %7054 = vmatprep.mubr.msk.bf16.mxu0 %vm7594_vm1, %v7592_v1 }
0x21ea   :  { %7064 = vmatprep.mubr.msk.bf16.mxu1 %vm7594_vm1, %v7592_v1 }
0x21eb   :  { %7051 = vmatpush3.bf16.msra.mxu0 %v8561_v29 }
0x21ec   :  { %7061 = vmatpush3.bf16.msra.mxu1 %v8561_v29  ;;  %7052 = vmatprep.subr.bf16.mxu0 %v7592_v1 }
0x21ed   :  { %7062 = vmatprep.subr.bf16.mxu1 %v7592_v1 }
0x21ef   :  { %7053 = vmatpush3.bf16.msra.mxu0 %v7661_v8 }
0x21f0   :  { %7063 = vmatpush3.bf16.msra.mxu1 %v7661_v8  ;;  %7068 = vmatprep.subr.bf16.mxu0 %v7592_v1 }
0x21f1   :  { %7082 = vmatprep.subr.bf16.mxu1 %v7592_v1 }
0x22b9   :  { %v3802_v28 = vpop.f32.mrb[156].mxu0 }
0x22ba   :  { %v3857_v50 = vadd.f32 %v8885_v7, %v3802_v28  ;;  %v3846_v51 = vpop.f32.mrb[156].mxu1  ;;  %v7032_v52 = vpop.f32.mrb[157].mxu0 }
0x22bb   :  { %v3865_v29 = vadd.f32 %v8889_v13, %v3846_v51  ;;  %v7046_v55 = vpop.f32.mrb[157].mxu1  ;;  %v3805_v42 = vpop.f32.mrb[158].mxu0 }
0x22bc   :  { %v3859_v43 = vmul.f32 %v3858_v31, %v3857_v50  ;;  %v3849_v56 = vpop.f32.mrb[158].mxu1  ;;  %v7033_v57 = vpop.f32.mrb[159].mxu0 }
0x22bd   :  { %v3866_v38 = vmul.f32 %v3865_v29, %v3858_v31  ;;  %v7047_v39 = vpop.f32.mrb[159].mxu1 }
0x22be   :  { %v8939_v58 = vadd.f32 %v3859_v43, %v8702_v53 }
0x22bf   :  { %v8942_v63 = vadd.f32 %v3866_v38, %v8705_v54 }
0x22c0   :  { %3869 = vrot.lane.b32.xlu1 %v8939_v58, %s7595_s21  ;;  %v3881_v3 = vpack.c.bf16 %v8939_v58, %v8939_v58 }
0x22c1   :  { %v3925_v4 = vpack.c.bf16 %v8942_v63, %v8942_v63 }
0x22c2   :  { %7055 = vmatmul.mubr.msk.bf16.vlgmr.msra.gmra.mrb[160].mxu0 %vm69_vm2, %v3881_v3 }
0x22c3   :  { %7065 = vmatmul.mubr.msk.bf16.vlgmr.msra.gmra.mrb[160].mxu1 %vm69_vm2, %v3925_v4  ;;  %7069 = vmatpush3.bf16.msra.mxu0 %v8586_v46 }
0x22c4   :  { %3874 = vrot.lane.b32.xlu1 %v8942_v63, %s7595_s21  ;;  %7083 = vmatpush3.bf16.msra.mxu1 %v8586_v46 }
0x22c5   :  { %7070 = vmatprep.subr.bf16.mxu0 %v7592_v1  ;;  %7084 = vmatprep.subr.bf16.mxu1 %v7592_v1 }
0x22c6   :  { %7078 = vmatprep.mubr.msk.bf16.mxu0 %vm7594_vm1, %v7592_v1  ;;  %7092 = vmatprep.mubr.msk.bf16.mxu1 %vm7594_vm1, %v7592_v1 }
0x22c7   :  { %7071 = vmatpush3.bf16.msra.mxu0 %v8599_v47 }
0x22c8   :  { %7085 = vmatpush3.bf16.msra.mxu1 %v8599_v47  ;;  %7072 = vmatprep.subr.bf16.mxu0 %v7592_v1 }
0x22c9   :  { %7086 = vmatprep.subr.bf16.mxu1 %v7592_v1 }
0x22cb   :  { %7073 = vmatpush3.bf16.msra.mxu0 %v8608_v48 }
0x22cc   :  { %7087 = vmatpush3.bf16.msra.mxu1 %v8608_v48  ;;  %7074 = vmatprep.subr.bf16.mxu0 %v7592_v1 }
0x22cd   :  { %7088 = vmatprep.subr.bf16.mxu1 %v7592_v1 }
0x22cf   :  { %7075 = vmatpush3.bf16.msra.mxu0 %v8617_v49 }
0x22d0   :  { %7089 = vmatpush3.bf16.msra.mxu1 %v8617_v49  ;;  %7076 = vmatprep.subr.bf16.mxu0 %v7592_v1 }
0x22d1   :  { %7090 = vmatprep.subr.bf16.mxu1 %v7592_v1 }
0x22d3   :  { %7077 = vmatpush3.bf16.msra.mxu0 %v7718_v16 }
0x22d4   :  { %7091 = vmatpush3.bf16.msra.mxu1 %v7718_v16  ;;  %7096 = vmatprep.subr.bf16.mxu0 %v7592_v1 }
0x22d5   :  { %7106 = vmatprep.subr.bf16.mxu1 %v7592_v1 }
0x2332   :  { %v3870_v46 = vpop.permute.xlu1 %3869 }
0x2333   :  { %3872 = vst.msk [vmem:[%s9435_s4 + $0x8] sm:$0xff] %vm853_vm5, %v3870_v46 }
0x2336   :  { %v3875_v47 = vpop.permute.xlu1 %3874 }
0x2337   :  { %3877 = vst.msk [vmem:[%s9435_s4 + $0x18] sm:$0xff] %vm853_vm5, %v3875_v47 }
0x2395   :  { %v3919_v48 = vpop.f32.mrb[160].mxu0 }
0x2396   :  { %7527 = vtanh.f32 %v3919_v48  ;;  %v3963_v49 = vpop.f32.mrb[160].mxu1  ;;  %v7056_v53 = vpop.f32.mrb[161].mxu0 }
0x2397   :  { %7529 = vtanh.f32 %v3963_v49  ;;  %v7066_v54 = vpop.f32.mrb[161].mxu1  ;;  %v3922_v5 = vpop.f32.mrb[162].mxu0 }
0x2398   :  { %v3966_v0 = vpop.f32.mrb[162].mxu1  ;;  %v7057_v9 = vpop.f32.mrb[163].mxu0 }
0x2399   :  { %v7067_v10 = vpop.f32.mrb[163].mxu1 }
0x23a0   :  { %v7528_v15 = vpop.eup %7527 }
0x23a1   :  { %v7530_v17 = vpop.eup %7529  ;;  %v3971_v2 = vpack.c.bf16 %v7528_v15, %v7528_v15 }
0x23a2   :  { %v4015_v18 = vpack.c.bf16 %v7530_v17, %v7530_v17 }
0x23a3   :  { %7079 = vmatmul.mubr.msk.bf16.vlgmr.msra.gmra.mrb[164].mxu0 %vm193_vm3, %v3971_v2 }
0x23a4   :  { %7093 = vmatmul.mubr.msk.bf16.vlgmr.msra.gmra.mrb[164].mxu1 %vm193_vm3, %v4015_v18  ;;  %7097 = vmatpush3.bf16.msra.mxu0 %v8991_v19 }
0x23a5   :  { %7107 = vmatpush3.bf16.msra.mxu1 %v8991_v19  ;;  %7098 = vmatprep.subr.bf16.mxu0 %v7592_v1 }
0x23a6   :  { %7108 = vmatprep.subr.bf16.mxu1 %v7592_v1  ;;  %7102 = vmatprep.mubr.msk.bf16.mxu0 %vm7594_vm1, %v7592_v1 }
0x23a7   :  { %7112 = vmatprep.mubr.msk.bf16.mxu1 %vm7594_vm1, %v7592_v1 }
0x23a8   :  { %7099 = vmatpush3.bf16.msra.mxu0 %v9004_v59 }
0x23a9   :  { %7109 = vmatpush3.bf16.msra.mxu1 %v9004_v59  ;;  %7100 = vmatprep.subr.bf16.mxu0 %v7592_v1 }
0x23aa   :  { %7110 = vmatprep.subr.bf16.mxu1 %v7592_v1 }
0x23ac   :  { %7101 = vmatpush3.bf16.msra.mxu0 %v7661_v8 }
0x23ad   :  { %7111 = vmatpush3.bf16.msra.mxu1 %v7661_v8  ;;  %7116 = vmatprep.subr.bf16.mxu0 %v7592_v1 }
0x23ae   :  { %7130 = vmatprep.subr.bf16.mxu1 %v7592_v1 }
0x2476   :  { %v9023_v61 = vpop.f32.mrb[164].mxu0 }
0x2477   :  { %v4061_v20 = vmul.f32 %v9021_v60, %v9023_v61  ;;  %v9027_v21 = vpop.f32.mrb[164].mxu1  ;;  %v7080_v62 = vpop.f32.mrb[165].mxu0 }
0x2478   :  { %v4063_v22 = vmul.f32 %v9021_v60, %v9027_v21  ;;  %v7094_v23 = vpop.f32.mrb[165].mxu1  ;;  %v4012_v26 = vpop.f32.mrb[166].mxu0  ;;  %v4425_v62 = vstv %s9018_s2 }
0x2479   :  { %v4062_v27 = vadd.f32 %v4061_v20, %v8939_v58  ;;  %v4056_v6 = vpop.f32.mrb[166].mxu1  ;;  %v7081_v7 = vpop.f32.mrb[167].mxu0 }
0x247a   :  { %v4064_v11 = vadd.f32 %v4063_v22, %v8942_v63  ;;  %v7095_v12 = vpop.f32.mrb[167].mxu1 }
0x247b   :  { %v4065_v13 = vpack.c.bf16 %v4062_v27, %v4062_v27 }
0x247c   :  { %v4109_v14 = vpack.c.bf16 %v4064_v11, %v4064_v11 }
0x247d   :  { %7103 = vmatmul.mubr.msk.bf16.vlgmr.msra.gmra.mrb[168].mxu0 %vm69_vm2, %v4065_v13 }
0x247e   :  { %7113 = vmatmul.mubr.msk.bf16.vlgmr.msra.gmra.mrb[168].mxu1 %vm69_vm2, %v4109_v14  ;;  %7117 = vmatpush3.bf16.msra.mxu0 %v9038_v32 }
0x247f   :  { %7131 = vmatpush3.bf16.msra.mxu1 %v9038_v32  ;;  %7118 = vmatprep.subr.bf16.mxu0 %v7592_v1 }
0x2480   :  { %7132 = vmatprep.subr.bf16.mxu1 %v7592_v1  ;;  %7126 = vmatprep.mubr.msk.bf16.mxu0 %vm7594_vm1, %v7592_v1 }
0x2481   :  { %7140 = vmatprep.mubr.msk.bf16.mxu1 %vm7594_vm1, %v7592_v1 }
0x2482   :  { %7119 = vmatpush3.bf16.msra.mxu0 %v9051_v24 }
0x2483   :  { %7133 = vmatpush3.bf16.msra.mxu1 %v9051_v24  ;;  %7120 = vmatprep.subr.bf16.mxu0 %v7592_v1 }
0x2484   :  { %7134 = vmatprep.subr.bf16.mxu1 %v7592_v1 }
0x2486   :  { %7121 = vmatpush3.bf16.msra.mxu0 %v9060_v25 }
0x2487   :  { %7135 = vmatpush3.bf16.msra.mxu1 %v9060_v25  ;;  %7122 = vmatprep.subr.bf16.mxu0 %v7592_v1 }
0x2488   :  { %7136 = vmatprep.subr.bf16.mxu1 %v7592_v1 }
0x248a   :  { %7123 = vmatpush3.bf16.msra.mxu0 %v9069_v33 }
0x248b   :  { %7137 = vmatpush3.bf16.msra.mxu1 %v9069_v33  ;;  %7124 = vmatprep.subr.bf16.mxu0 %v7592_v1 }
0x248c   :  { %7138 = vmatprep.subr.bf16.mxu1 %v7592_v1 }
0x248e   :  { %7125 = vmatpush3.bf16.msra.mxu0 %v7718_v16 }
0x248f   :  { %7139 = vmatpush3.bf16.msra.mxu1 %v7718_v16  ;;  %7144 = vmatprep.subr.bf16.mxu0 %v7592_v1 }
0x2490   :  { %7154 = vmatprep.subr.bf16.mxu1 %v7592_v1 }
0x2550   :  { %v4103_v34 = vpop.f32.mrb[168].mxu0 }
0x2551   :  { %7531 = vtanh.f32 %v4103_v34  ;;  %v4147_v35 = vpop.f32.mrb[168].mxu1  ;;  %v7104_v36 = vpop.f32.mrb[169].mxu0 }
0x2552   :  { %7533 = vtanh.f32 %v4147_v35  ;;  %v7114_v37 = vpop.f32.mrb[169].mxu1  ;;  %v4106_v40 = vpop.f32.mrb[170].mxu0 }
0x2553   :  { %v4150_v41 = vpop.f32.mrb[170].mxu1  ;;  %v7105_v44 = vpop.f32.mrb[171].mxu0 }
0x2554   :  { %v7115_v45 = vpop.f32.mrb[171].mxu1 }
0x255b   :  { %v7532_v30 = vpop.eup %7531 }
0x255c   :  { %v7534_v28 = vpop.eup %7533  ;;  %v4155_v31 = vpack.c.bf16 %v7532_v30, %v7532_v30 }
0x255d   :  { %v4199_v50 = vpack.c.bf16 %v7534_v28, %v7534_v28 }
0x255e   :  { %7127 = vmatmul.mubr.msk.bf16.vlgmr.msra.gmra.mrb[172].mxu0 %vm193_vm3, %v4155_v31 }
0x255f   :  { %7141 = vmatmul.mubr.msk.bf16.vlgmr.msra.gmra.mrb[172].mxu1 %vm193_vm3, %v4199_v50  ;;  %7145 = vmatpush3.bf16.msra.mxu0 %v8991_v19 }
0x2560   :  { %7155 = vmatpush3.bf16.msra.mxu1 %v8991_v19  ;;  %7146 = vmatprep.subr.bf16.mxu0 %v7592_v1 }
0x2561   :  { %7156 = vmatprep.subr.bf16.mxu1 %v7592_v1  ;;  %7150 = vmatprep.mubr.msk.bf16.mxu0 %vm7594_vm1, %v7592_v1 }
0x2562   :  { %7160 = vmatprep.mubr.msk.bf16.mxu1 %vm7594_vm1, %v7592_v1 }
0x2563   :  { %7147 = vmatpush3.bf16.msra.mxu0 %v9004_v59 }
0x2564   :  { %7157 = vmatpush3.bf16.msra.mxu1 %v9004_v59  ;;  %7148 = vmatprep.subr.bf16.mxu0 %v7592_v1 }
0x2565   :  { %7158 = vmatprep.subr.bf16.mxu1 %v7592_v1 }
0x2567   :  { %7149 = vmatpush3.bf16.msra.mxu0 %v7661_v8 }
0x2568   :  { %7159 = vmatpush3.bf16.msra.mxu1 %v7661_v8  ;;  %7164 = vmatprep.subr.bf16.mxu0 %v7592_v1 }
0x2569   :  { %7178 = vmatprep.subr.bf16.mxu1 %v7592_v1 }
0x2631   :  { %v4193_v51 = vpop.f32.mrb[172].mxu0 }
0x2632   :  { %v4243_v52 = vmul.f32 %v4193_v51, %v9021_v60  ;;  %v4609_v29 = vmul.f32 2.0, %v4193_v51  ;;  %v4237_v55 = vpop.f32.mrb[172].mxu1  ;;  %v7128_v42 = vpop.f32.mrb[173].mxu0 }
0x2633   :  { %v4245_v43 = vmul.f32 %v4237_v55, %v9021_v60  ;;  %v4617_v56 = vmul.f32 2.0, %v4237_v55  ;;  %v7142_v57 = vpop.f32.mrb[173].mxu1  ;;  %v4196_v38 = vpop.f32.mrb[174].mxu0 }
0x2634   :  { %v4244_v39 = vadd.f32 %v4243_v52, %v8939_v58  ;;  %v9101_v3 = vadd.f32 %v4609_v29, %v9023_v61  ;;  %v4240_v4 = vpop.f32.mrb[174].mxu1  ;;  %v7129_v46 = vpop.f32.mrb[175].mxu0 }
0x2635   :  { %v4246_v47 = vadd.f32 %v4245_v43, %v8942_v63  ;;  %v9105_v48 = vadd.f32 %v4617_v56, %v9027_v21  ;;  %v7143_v49 = vpop.f32.mrb[175].mxu1 }
0x2636   :  { %v4247_v53 = vpack.c.bf16 %v4244_v39, %v4244_v39  ;;  %v4614_v39 = vstv %s4608_s3 }
0x2637   :  { %v4291_v54 = vpack.c.bf16 %v4246_v47, %v4246_v47 }
0x2638   :  { %7151 = vmatmul.mubr.msk.bf16.vlgmr.msra.gmra.mrb[176].mxu0 %vm69_vm2, %v4247_v53 }
0x2639   :  { %7161 = vmatmul.mubr.msk.bf16.vlgmr.msra.gmra.mrb[176].mxu1 %vm69_vm2, %v4291_v54  ;;  %7165 = vmatpush3.bf16.msra.mxu0 %v9038_v32 }
0x263a   :  { %7179 = vmatpush3.bf16.msra.mxu1 %v9038_v32  ;;  %7166 = vmatprep.subr.bf16.mxu0 %v7592_v1 }
0x263b   :  { %7180 = vmatprep.subr.bf16.mxu1 %v7592_v1  ;;  %7174 = vmatprep.mubr.msk.bf16.mxu0 %vm7594_vm1, %v7592_v1 }
0x263c   :  { %7188 = vmatprep.mubr.msk.bf16.mxu1 %vm7594_vm1, %v7592_v1 }
0x263d   :  { %7167 = vmatpush3.bf16.msra.mxu0 %v9051_v24 }
0x263e   :  { %7181 = vmatpush3.bf16.msra.mxu1 %v9051_v24  ;;  %7168 = vmatprep.subr.bf16.mxu0 %v7592_v1 }
0x263f   :  { %7182 = vmatprep.subr.bf16.mxu1 %v7592_v1 }
0x2641   :  { %7169 = vmatpush3.bf16.msra.mxu0 %v9060_v25 }
0x2642   :  { %7183 = vmatpush3.bf16.msra.mxu1 %v9060_v25  ;;  %7170 = vmatprep.subr.bf16.mxu0 %v7592_v1 }
0x2643   :  { %7184 = vmatprep.subr.bf16.mxu1 %v7592_v1 }
0x2645   :  { %7171 = vmatpush3.bf16.msra.mxu0 %v9069_v33 }
0x2646   :  { %7185 = vmatpush3.bf16.msra.mxu1 %v9069_v33  ;;  %7172 = vmatprep.subr.bf16.mxu0 %v7592_v1 }
0x2647   :  { %7186 = vmatprep.subr.bf16.mxu1 %v7592_v1 }
0x2649   :  { %7173 = vmatpush3.bf16.msra.mxu0 %v7718_v16 }
0x264a   :  { %7187 = vmatpush3.bf16.msra.mxu1 %v7718_v16  ;;  %7192 = vmatprep.subr.bf16.mxu0 %v7592_v1 }
0x264b   :  { %7202 = vmatprep.subr.bf16.mxu1 %v7592_v1 }
0x270b   :  { %v4285_v5 = vpop.f32.mrb[176].mxu0 }
0x270c   :  { %7535 = vtanh.f32 %v4285_v5  ;;  %v4329_v0 = vpop.f32.mrb[176].mxu1  ;;  %v7152_v9 = vpop.f32.mrb[177].mxu0 }
0x270d   :  { %7537 = vtanh.f32 %v4329_v0  ;;  %v7162_v10 = vpop.f32.mrb[177].mxu1  ;;  %v4288_v15 = vpop.f32.mrb[178].mxu0 }
0x270e   :  { %v4332_v17 = vpop.f32.mrb[178].mxu1  ;;  %v7153_v2 = vpop.f32.mrb[179].mxu0 }
0x270f   :  { %v7163_v18 = vpop.f32.mrb[179].mxu1 }
0x2716   :  { %v7536_v60 = vpop.eup %7535 }
0x2717   :  { %v7538_v61 = vpop.eup %7537  ;;  %v4337_v20 = vpack.c.bf16 %v7536_v60, %v7536_v60 }
0x2718   :  { %v4381_v21 = vpack.c.bf16 %v7538_v61, %v7538_v61 }
0x2719   :  { %7175 = vmatmul.mubr.msk.bf16.vlgmr.msra.gmra.mrb[180].mxu0 %vm193_vm3, %v4337_v20 }
0x271a   :  { %7189 = vmatmul.mubr.msk.bf16.vlgmr.msra.gmra.mrb[180].mxu1 %vm193_vm3, %v4381_v21  ;;  %7193 = vmatpush3.bf16.msra.mxu0 %v8991_v19 }
0x271b   :  { %7203 = vmatpush3.bf16.msra.mxu1 %v8991_v19  ;;  %7194 = vmatprep.subr.bf16.mxu0 %v7592_v1 }
0x271c   :  { %7204 = vmatprep.subr.bf16.mxu1 %v7592_v1  ;;  %7198 = vmatprep.mubr.msk.bf16.mxu0 %vm7594_vm1, %v7592_v1 }
0x271d   :  { %7208 = vmatprep.mubr.msk.bf16.mxu1 %vm7594_vm1, %v7592_v1 }
0x271e   :  { %7195 = vmatpush3.bf16.msra.mxu0 %v9004_v59 }
0x271f   :  { %7205 = vmatpush3.bf16.msra.mxu1 %v9004_v59  ;;  %7196 = vmatprep.subr.bf16.mxu0 %v7592_v1 }
0x2720   :  { %7206 = vmatprep.subr.bf16.mxu1 %v7592_v1 }
0x2722   :  { %7197 = vmatpush3.bf16.msra.mxu0 %v7661_v8 }
0x2723   :  { %7207 = vmatpush3.bf16.msra.mxu1 %v7661_v8  ;;  %7212 = vmatprep.subr.bf16.mxu0 %v7592_v1 }
0x2724   :  { %7226 = vmatprep.subr.bf16.mxu1 %v7592_v1 }
0x27ec   :  { %v4375_v22 = vpop.f32.mrb[180].mxu0 }
0x27ed   :  { %v4426_v23 = vmul.f32 %v4425_v62, %v4375_v22  ;;  %v4611_v26 = vmul.f32 2.0, %v4375_v22  ;;  %v4419_v27 = vpop.f32.mrb[180].mxu1  ;;  %v7176_v6 = vpop.f32.mrb[181].mxu0 }
0x27ee   :  { %v4428_v7 = vmul.f32 %v4425_v62, %v4419_v27  ;;  %v4619_v11 = vmul.f32 2.0, %v4419_v27  ;;  %v7190_v12 = vpop.f32.mrb[181].mxu1  ;;  %v4378_v13 = vpop.f32.mrb[182].mxu0 }
0x27ef   :  { %v4427_v14 = vadd.f32 %v4426_v23, %v8939_v58  ;;  %v4422_v34 = vpop.f32.mrb[182].mxu1  ;;  %v7177_v35 = vpop.f32.mrb[183].mxu0  ;;  %v9154_v36 = vadd.f32 %v4611_v26, %v9101_v3 }
0x27f0   :  { %v4429_v37 = vadd.f32 %v4428_v7, %v8942_v63  ;;  %v7191_v40 = vpop.f32.mrb[183].mxu1  ;;  %v9158_v41 = vadd.f32 %v4619_v11, %v9105_v48  ;;  %v9277_v11 = vstv %s4815_s24 }
0x27f1   :  { %v4430_v44 = vpack.c.bf16 %v4427_v14, %v4427_v14 }
0x27f2   :  { %v4474_v45 = vpack.c.bf16 %v4429_v37, %v4429_v37 }
0x27f3   :  { %7199 = vmatmul.mubr.msk.bf16.vlgmr.msra.gmra.mrb[184].mxu0 %vm69_vm2, %v4430_v44 }
0x27f4   :  { %7209 = vmatmul.mubr.msk.bf16.vlgmr.msra.gmra.mrb[184].mxu1 %vm69_vm2, %v4474_v45  ;;  %7213 = vmatpush3.bf16.msra.mxu0 %v9038_v32 }
0x27f5   :  { %7227 = vmatpush3.bf16.msra.mxu1 %v9038_v32  ;;  %7214 = vmatprep.subr.bf16.mxu0 %v7592_v1 }
0x27f6   :  { %7228 = vmatprep.subr.bf16.mxu1 %v7592_v1  ;;  %7222 = vmatprep.mubr.msk.bf16.mxu0 %vm7594_vm1, %v7592_v1 }
0x27f7   :  { %7236 = vmatprep.mubr.msk.bf16.mxu1 %vm7594_vm1, %v7592_v1 }
0x27f8   :  { %7215 = vmatpush3.bf16.msra.mxu0 %v9051_v24 }
0x27f9   :  { %7229 = vmatpush3.bf16.msra.mxu1 %v9051_v24  ;;  %7216 = vmatprep.subr.bf16.mxu0 %v7592_v1 }
0x27fa   :  { %7230 = vmatprep.subr.bf16.mxu1 %v7592_v1 }
0x27fc   :  { %7217 = vmatpush3.bf16.msra.mxu0 %v9060_v25 }
0x27fd   :  { %7231 = vmatpush3.bf16.msra.mxu1 %v9060_v25  ;;  %7218 = vmatprep.subr.bf16.mxu0 %v7592_v1 }
0x27fe   :  { %7232 = vmatprep.subr.bf16.mxu1 %v7592_v1 }
0x2800   :  { %7219 = vmatpush3.bf16.msra.mxu0 %v9069_v33 }
0x2801   :  { %7233 = vmatpush3.bf16.msra.mxu1 %v9069_v33  ;;  %7220 = vmatprep.subr.bf16.mxu0 %v7592_v1 }
0x2802   :  { %7234 = vmatprep.subr.bf16.mxu1 %v7592_v1 }
0x2804   :  { %7221 = vmatpush3.bf16.msra.mxu0 %v7718_v16 }
0x2805   :  { %7235 = vmatpush3.bf16.msra.mxu1 %v7718_v16  ;;  %7240 = vmatprep.subr.bf16.mxu0 %v7592_v1 }
0x2806   :  { %7250 = vmatprep.subr.bf16.mxu1 %v7592_v1 }
0x28c6   :  { %v4468_v30 = vpop.f32.mrb[184].mxu0 }
0x28c7   :  { %7539 = vtanh.f32 %v4468_v30  ;;  %v4512_v28 = vpop.f32.mrb[184].mxu1  ;;  %v7200_v31 = vpop.f32.mrb[185].mxu0 }
0x28c8   :  { %7541 = vtanh.f32 %v4512_v28  ;;  %v7210_v50 = vpop.f32.mrb[185].mxu1  ;;  %v4471_v51 = vpop.f32.mrb[186].mxu0 }
0x28c9   :  { %v4515_v52 = vpop.f32.mrb[186].mxu1  ;;  %v7201_v29 = vpop.f32.mrb[187].mxu0 }
0x28ca   :  { %v7211_v55 = vpop.f32.mrb[187].mxu1 }
0x28d1   :  { %v7540_v42 = vpop.eup %7539 }
0x28d2   :  { %v7542_v43 = vpop.eup %7541  ;;  %v4520_v56 = vpack.c.bf16 %v7540_v42, %v7540_v42 }
0x28d3   :  { %v4564_v57 = vpack.c.bf16 %v7542_v43, %v7542_v43 }
0x28d4   :  { %7223 = vmatmul.mubr.msk.bf16.vlgmr.msra.gmra.mrb[188].mxu0 %vm193_vm3, %v4520_v56 }
0x28d5   :  { %7237 = vmatmul.mubr.msk.bf16.vlgmr.msra.gmra.mrb[188].mxu1 %vm193_vm3, %v4564_v57  ;;  %7241 = vmatpush3.bf16.msra.mxu0 %v8991_v19 }
0x28d6   :  { %7251 = vmatpush3.bf16.msra.mxu1 %v8991_v19  ;;  %7242 = vmatprep.subr.bf16.mxu0 %v7592_v1 }
0x28d7   :  { %7252 = vmatprep.subr.bf16.mxu1 %v7592_v1  ;;  %7246 = vmatprep.mubr.msk.bf16.mxu0 %vm7594_vm1, %v7592_v1 }
0x28d8   :  { %7256 = vmatprep.mubr.msk.bf16.mxu1 %vm7594_vm1, %v7592_v1 }
0x28d9   :  { %7243 = vmatpush3.bf16.msra.mxu0 %v9004_v59 }
0x28da   :  { %7253 = vmatpush3.bf16.msra.mxu1 %v9004_v59  ;;  %7244 = vmatprep.subr.bf16.mxu0 %v7592_v1 }
0x28db   :  { %7254 = vmatprep.subr.bf16.mxu1 %v7592_v1 }
0x28dd   :  { %7245 = vmatpush3.bf16.msra.mxu0 %v7661_v8 }
0x28de   :  { %7255 = vmatpush3.bf16.msra.mxu1 %v7661_v8  ;;  %7260 = vmatprep.subr.bf16.mxu0 %v7592_v1 }
0x28df   :  { %7274 = vmatprep.subr.bf16.mxu1 %v7592_v1 }
0x29a7   :  { %v4558_v38 = vpop.f32.mrb[188].mxu0 }
0x29a8   :  { %v4613_v3 = vadd.f32 %v9154_v36, %v4558_v38  ;;  %v4602_v4 = vpop.f32.mrb[188].mxu1  ;;  %v7224_v46 = vpop.f32.mrb[189].mxu0 }
0x29a9   :  { %v4621_v47 = vadd.f32 %v9158_v41, %v4602_v4  ;;  %v7238_v48 = vpop.f32.mrb[189].mxu1  ;;  %v4561_v49 = vpop.f32.mrb[190].mxu0 }
0x29aa   :  { %v4615_v53 = vmul.f32 %v4614_v39, %v4613_v3  ;;  %v4605_v54 = vpop.f32.mrb[190].mxu1  ;;  %v7225_v5 = vpop.f32.mrb[191].mxu0 }
0x29ab   :  { %v4622_v0 = vmul.f32 %v4621_v47, %v4614_v39  ;;  %v7239_v9 = vpop.f32.mrb[191].mxu1 }
0x29ac   :  { %v9208_v10 = vadd.f32 %v4615_v53, %v8939_v58 }
0x29ad   :  { %v9211_v15 = vadd.f32 %v4622_v0, %v8942_v63 }
0x29ae   :  { %4625 = vrot.lane.b32.xlu0 %v9208_v10, %s7596_s14  ;;  %v4637_v17 = vpack.c.bf16 %v9208_v10, %v9208_v10 }
0x29af   :  { %4630 = vrot.lane.b32.xlu1 %v9211_v15, %s7596_s14  ;;  %v4681_v2 = vpack.c.bf16 %v9211_v15, %v9211_v15 }
0x29b0   :  { %7247 = vmatmul.mubr.msk.bf16.vlgmr.msra.gmra.mrb[192].mxu0 %vm69_vm2, %v4637_v17 }
0x29b1   :  { %7257 = vmatmul.mubr.msk.bf16.vlgmr.msra.gmra.mrb[192].mxu1 %vm69_vm2, %v4681_v2  ;;  %7261 = vmatpush3.bf16.msra.mxu0 %v9038_v32 }
0x29b2   :  { %7275 = vmatpush3.bf16.msra.mxu1 %v9038_v32  ;;  %7262 = vmatprep.subr.bf16.mxu0 %v7592_v1 }
0x29b3   :  { %7276 = vmatprep.subr.bf16.mxu1 %v7592_v1  ;;  %7270 = vmatprep.mubr.msk.bf16.mxu0 %vm7594_vm1, %v7592_v1 }
0x29b4   :  { %7284 = vmatprep.mubr.msk.bf16.mxu1 %vm7594_vm1, %v7592_v1 }
0x29b5   :  { %7263 = vmatpush3.bf16.msra.mxu0 %v9051_v24 }
0x29b6   :  { %7277 = vmatpush3.bf16.msra.mxu1 %v9051_v24  ;;  %7264 = vmatprep.subr.bf16.mxu0 %v7592_v1 }
0x29b7   :  { %7278 = vmatprep.subr.bf16.mxu1 %v7592_v1 }
0x29b9   :  { %7265 = vmatpush3.bf16.msra.mxu0 %v9060_v25 }
0x29ba   :  { %7279 = vmatpush3.bf16.msra.mxu1 %v9060_v25  ;;  %7266 = vmatprep.subr.bf16.mxu0 %v7592_v1 }
0x29bb   :  { %7280 = vmatprep.subr.bf16.mxu1 %v7592_v1 }
0x29bd   :  { %7267 = vmatpush3.bf16.msra.mxu0 %v9069_v33 }
0x29be   :  { %7281 = vmatpush3.bf16.msra.mxu1 %v9069_v33  ;;  %7268 = vmatprep.subr.bf16.mxu0 %v7592_v1 }
0x29bf   :  { %7282 = vmatprep.subr.bf16.mxu1 %v7592_v1 }
0x29c1   :  { %7269 = vmatpush3.bf16.msra.mxu0 %v7718_v16 }
0x29c2   :  { %7283 = vmatpush3.bf16.msra.mxu1 %v7718_v16  ;;  %7288 = vmatprep.subr.bf16.mxu0 %v7592_v1 }
0x29c3   :  { %7298 = vmatprep.subr.bf16.mxu1 %v7592_v1 }
0x2a20   :  { %v4626_v58 = vpop.permute.xlu0 %4625 }
0x2a21   :  { %v4631_v63 = vpop.permute.xlu1 %4630  ;;  %4628 = vst.msk [vmem:[%s9435_s4 + $0x8] sm:$0xff] %vm1610_vm6, %v4626_v58 }
0x2a22   :  { %4633 = vst.msk [vmem:[%s9435_s4 + $0x18] sm:$0xff] %vm1610_vm6, %v4631_v63 }
0x2a83   :  { %v4675_v18 = vpop.f32.mrb[192].mxu0 }
0x2a84   :  { %7543 = vtanh.f32 %v4675_v18  ;;  %v4719_v60 = vpop.f32.mrb[192].mxu1  ;;  %v7248_v61 = vpop.f32.mrb[193].mxu0 }
0x2a85   :  { %7545 = vtanh.f32 %v4719_v60  ;;  %v7258_v20 = vpop.f32.mrb[193].mxu1  ;;  %v4678_v21 = vpop.f32.mrb[194].mxu0 }
0x2a86   :  { %v4722_v62 = vpop.f32.mrb[194].mxu1  ;;  %v7249_v22 = vpop.f32.mrb[195].mxu0 }
0x2a87   :  { %v7259_v23 = vpop.f32.mrb[195].mxu1 }
0x2a8e   :  { %v7544_v26 = vpop.eup %7543 }
0x2a8f   :  { %v7546_v27 = vpop.eup %7545  ;;  %v4727_v6 = vpack.c.bf16 %v7544_v26, %v7544_v26 }
0x2a90   :  { %v4771_v7 = vpack.c.bf16 %v7546_v27, %v7546_v27 }
0x2a91   :  { %7271 = vmatmul.mubr.msk.bf16.vlgmr.msra.gmra.mrb[196].mxu0 %vm193_vm3, %v4727_v6 }
0x2a92   :  { %7285 = vmatmul.mubr.msk.bf16.vlgmr.msra.gmra.mrb[196].mxu1 %vm193_vm3, %v4771_v7  ;;  %7289 = vmatpush3.bf16.msra.mxu0 %v8991_v19 }
0x2a93   :  { %7299 = vmatpush3.bf16.msra.mxu1 %v8991_v19  ;;  %7290 = vmatprep.subr.bf16.mxu0 %v7592_v1 }
0x2a94   :  { %7300 = vmatprep.subr.bf16.mxu1 %v7592_v1  ;;  %7294 = vmatprep.mubr.msk.bf16.mxu0 %vm7594_vm1, %v7592_v1 }
0x2a95   :  { %7304 = vmatprep.mubr.msk.bf16.mxu1 %vm7594_vm1, %v7592_v1 }
0x2a96   :  { %7291 = vmatpush3.bf16.msra.mxu0 %v9004_v59 }
0x2a97   :  { %7301 = vmatpush3.bf16.msra.mxu1 %v9004_v59  ;;  %7292 = vmatprep.subr.bf16.mxu0 %v7592_v1 }
0x2a98   :  { %7302 = vmatprep.subr.bf16.mxu1 %v7592_v1 }
0x2a9a   :  { %7293 = vmatpush3.bf16.msra.mxu0 %v7661_v8 }
0x2a9b   :  { %7303 = vmatpush3.bf16.msra.mxu1 %v7661_v8  ;;  %7308 = vmatprep.subr.bf16.mxu0 %v7592_v1 }
0x2a9c   :  { %7322 = vmatprep.subr.bf16.mxu1 %v7592_v1 }
0x2b64   :  { %v9279_v12 = vpop.f32.mrb[196].mxu0 }
0x2b65   :  { %v4817_v13 = vmul.f32 %v9277_v11, %v9279_v12  ;;  %v9283_v14 = vpop.f32.mrb[196].mxu1  ;;  %v7272_v34 = vpop.f32.mrb[197].mxu0 }
0x2b66   :  { %v4819_v35 = vmul.f32 %v9277_v11, %v9283_v14  ;;  %v7286_v36 = vpop.f32.mrb[197].mxu1  ;;  %v4768_v37 = vpop.f32.mrb[198].mxu0 }
0x2b67   :  { %v4818_v40 = vadd.f32 %v4817_v13, %v9208_v10  ;;  %v4812_v41 = vpop.f32.mrb[198].mxu1  ;;  %v7273_v44 = vpop.f32.mrb[199].mxu0 }
0x2b68   :  { %v4820_v45 = vadd.f32 %v4819_v35, %v9211_v15  ;;  %v7287_v30 = vpop.f32.mrb[199].mxu1 }
0x2b69   :  { %v4821_v28 = vpack.c.bf16 %v4818_v40, %v4818_v40 }
0x2b6a   :  { %v4865_v31 = vpack.c.bf16 %v4820_v45, %v4820_v45 }
0x2b6b   :  { %7295 = vmatmul.mubr.msk.bf16.vlgmr.msra.gmra.mrb[200].mxu0 %vm69_vm2, %v4821_v28 }
0x2b6c   :  { %7305 = vmatmul.mubr.msk.bf16.vlgmr.msra.gmra.mrb[200].mxu1 %vm69_vm2, %v4865_v31  ;;  %7309 = vmatpush3.bf16.msra.mxu0 %v9038_v32 }
0x2b6d   :  { %7323 = vmatpush3.bf16.msra.mxu1 %v9038_v32  ;;  %7310 = vmatprep.subr.bf16.mxu0 %v7592_v1 }
0x2b6e   :  { %7324 = vmatprep.subr.bf16.mxu1 %v7592_v1  ;;  %7318 = vmatprep.mubr.msk.bf16.mxu0 %vm7594_vm1, %v7592_v1 }
0x2b6f   :  { %7332 = vmatprep.mubr.msk.bf16.mxu1 %vm7594_vm1, %v7592_v1 }
0x2b70   :  { %7311 = vmatpush3.bf16.msra.mxu0 %v9051_v24 }
0x2b71   :  { %7325 = vmatpush3.bf16.msra.mxu1 %v9051_v24  ;;  %7312 = vmatprep.subr.bf16.mxu0 %v7592_v1 }
0x2b72   :  { %7326 = vmatprep.subr.bf16.mxu1 %v7592_v1 }
0x2b74   :  { %7313 = vmatpush3.bf16.msra.mxu0 %v9060_v25 }
0x2b75   :  { %7327 = vmatpush3.bf16.msra.mxu1 %v9060_v25  ;;  %7314 = vmatprep.subr.bf16.mxu0 %v7592_v1 }
0x2b76   :  { %7328 = vmatprep.subr.bf16.mxu1 %v7592_v1 }
0x2b78   :  { %7315 = vmatpush3.bf16.msra.mxu0 %v9069_v33 }
0x2b79   :  { %7329 = vmatpush3.bf16.msra.mxu1 %v9069_v33  ;;  %7316 = vmatprep.subr.bf16.mxu0 %v7592_v1 }
0x2b7a   :  { %7330 = vmatprep.subr.bf16.mxu1 %v7592_v1 }
0x2b7c   :  { %7317 = vmatpush3.bf16.msra.mxu0 %v7718_v16 }
0x2b7d   :  { %7331 = vmatpush3.bf16.msra.mxu1 %v7718_v16  ;;  %7336 = vmatprep.subr.bf16.mxu0 %v7592_v1 }
0x2b7e   :  { %7346 = vmatprep.subr.bf16.mxu1 %v7592_v1 }
0x2c3e   :  { %v4859_v50 = vpop.f32.mrb[200].mxu0 }
0x2c3f   :  { %7547 = vtanh.f32 %v4859_v50  ;;  %v4903_v51 = vpop.f32.mrb[200].mxu1  ;;  %v7296_v52 = vpop.f32.mrb[201].mxu0 }
0x2c40   :  { %7549 = vtanh.f32 %v4903_v51  ;;  %v7306_v29 = vpop.f32.mrb[201].mxu1  ;;  %v4862_v55 = vpop.f32.mrb[202].mxu0 }
0x2c41   :  { %v4906_v42 = vpop.f32.mrb[202].mxu1  ;;  %v7297_v43 = vpop.f32.mrb[203].mxu0 }
0x2c42   :  { %v7307_v56 = vpop.f32.mrb[203].mxu1 }
0x2c49   :  { %v7548_v57 = vpop.eup %7547 }
0x2c4a   :  { %v7550_v38 = vpop.eup %7549  ;;  %v4911_v39 = vpack.c.bf16 %v7548_v57, %v7548_v57 }
0x2c4b   :  { %v4955_v3 = vpack.c.bf16 %v7550_v38, %v7550_v38 }
0x2c4c   :  { %7319 = vmatmul.mubr.msk.bf16.vlgmr.msra.gmra.mrb[204].mxu0 %vm193_vm3, %v4911_v39 }
0x2c4d   :  { %7333 = vmatmul.mubr.msk.bf16.vlgmr.msra.gmra.mrb[204].mxu1 %vm193_vm3, %v4955_v3  ;;  %7337 = vmatpush3.bf16.msra.mxu0 %v8991_v19 }
0x2c4e   :  { %7347 = vmatpush3.bf16.msra.mxu1 %v8991_v19  ;;  %7338 = vmatprep.subr.bf16.mxu0 %v7592_v1 }
0x2c4f   :  { %7348 = vmatprep.subr.bf16.mxu1 %v7592_v1  ;;  %7342 = vmatprep.mubr.msk.bf16.mxu0 %vm7594_vm1, %v7592_v1 }
0x2c50   :  { %7352 = vmatprep.mubr.msk.bf16.mxu1 %vm7594_vm1, %v7592_v1 }
0x2c51   :  { %7339 = vmatpush3.bf16.msra.mxu0 %v9004_v59 }
0x2c52   :  { %7349 = vmatpush3.bf16.msra.mxu1 %v9004_v59  ;;  %7340 = vmatprep.subr.bf16.mxu0 %v7592_v1 }
0x2c53   :  { %7350 = vmatprep.subr.bf16.mxu1 %v7592_v1 }
0x2c55   :  { %7341 = vmatpush3.bf16.msra.mxu0 %v7661_v8 }
0x2c56   :  { %7351 = vmatpush3.bf16.msra.mxu1 %v7661_v8  ;;  %7356 = vmatprep.subr.bf16.mxu0 %v7592_v1 }
0x2c57   :  { %7370 = vmatprep.subr.bf16.mxu1 %v7592_v1 }
0x2d1f   :  { %v4949_v4 = vpop.f32.mrb[204].mxu0 }
0x2d20   :  { %v4999_v46 = vmul.f32 %v4949_v4, %v9277_v11  ;;  %v5365_v47 = vmul.f32 2.0, %v4949_v4  ;;  %v4993_v48 = vpop.f32.mrb[204].mxu1  ;;  %v7320_v49 = vpop.f32.mrb[205].mxu0 }
0x2d21   :  { %v5001_v53 = vmul.f32 %v4993_v48, %v9277_v11  ;;  %v5373_v54 = vmul.f32 2.0, %v4993_v48  ;;  %v7334_v5 = vpop.f32.mrb[205].mxu1  ;;  %v4952_v0 = vpop.f32.mrb[206].mxu0 }
0x2d22   :  { %v5000_v9 = vadd.f32 %v4999_v46, %v9208_v10  ;;  %v9337_v17 = vadd.f32 %v5365_v47, %v9279_v12  ;;  %v4996_v2 = vpop.f32.mrb[206].mxu1  ;;  %v7321_v58 = vpop.f32.mrb[207].mxu0 }
0x2d23   :  { %v5002_v63 = vadd.f32 %v5001_v53, %v9211_v15  ;;  %v9341_v18 = vadd.f32 %v5373_v54, %v9283_v14  ;;  %v7335_v60 = vpop.f32.mrb[207].mxu1 }
0x2d24   :  { %v5003_v61 = vpack.c.bf16 %v5000_v9, %v5000_v9 }
0x2d25   :  { %v5047_v20 = vpack.c.bf16 %v5002_v63, %v5002_v63 }
0x2d26   :  { %7343 = vmatmul.mubr.msk.bf16.vlgmr.msra.gmra.mrb[208].mxu0 %vm69_vm2, %v5003_v61 }
0x2d27   :  { %7353 = vmatmul.mubr.msk.bf16.vlgmr.msra.gmra.mrb[208].mxu1 %vm69_vm2, %v5047_v20  ;;  %7357 = vmatpush3.bf16.msra.mxu0 %v9038_v32 }
0x2d28   :  { %7371 = vmatpush3.bf16.msra.mxu1 %v9038_v32  ;;  %7358 = vmatprep.subr.bf16.mxu0 %v7592_v1 }
0x2d29   :  { %7372 = vmatprep.subr.bf16.mxu1 %v7592_v1  ;;  %7366 = vmatprep.mubr.msk.bf16.mxu0 %vm7594_vm1, %v7592_v1 }
0x2d2a   :  { %7380 = vmatprep.mubr.msk.bf16.mxu1 %vm7594_vm1, %v7592_v1 }
0x2d2b   :  { %7359 = vmatpush3.bf16.msra.mxu0 %v9051_v24 }
0x2d2c   :  { %7373 = vmatpush3.bf16.msra.mxu1 %v9051_v24  ;;  %7360 = vmatprep.subr.bf16.mxu0 %v7592_v1 }
0x2d2d   :  { %7374 = vmatprep.subr.bf16.mxu1 %v7592_v1 }
0x2d2f   :  { %7361 = vmatpush3.bf16.msra.mxu0 %v9060_v25 }
0x2d30   :  { %7375 = vmatpush3.bf16.msra.mxu1 %v9060_v25  ;;  %7362 = vmatprep.subr.bf16.mxu0 %v7592_v1 }
0x2d31   :  { %7376 = vmatprep.subr.bf16.mxu1 %v7592_v1 }
0x2d33   :  { %7363 = vmatpush3.bf16.msra.mxu0 %v9069_v33 }
0x2d34   :  { %7377 = vmatpush3.bf16.msra.mxu1 %v9069_v33  ;;  %7364 = vmatprep.subr.bf16.mxu0 %v7592_v1 }
0x2d35   :  { %7378 = vmatprep.subr.bf16.mxu1 %v7592_v1 }
0x2d37   :  { %7365 = vmatpush3.bf16.msra.mxu0 %v7718_v16 }
0x2d38   :  { %7379 = vmatpush3.bf16.msra.mxu1 %v7718_v16  ;;  %7384 = vmatprep.subr.bf16.mxu0 %v7592_v1 }
0x2d39   :  { %7394 = vmatprep.subr.bf16.mxu1 %v7592_v1 }
0x2df9   :  { %v5041_v21 = vpop.f32.mrb[208].mxu0 }
0x2dfa   :  { %7551 = vtanh.f32 %v5041_v21  ;;  %v5085_v62 = vpop.f32.mrb[208].mxu1  ;;  %v7344_v22 = vpop.f32.mrb[209].mxu0 }
0x2dfb   :  { %7553 = vtanh.f32 %v5085_v62  ;;  %v7354_v23 = vpop.f32.mrb[209].mxu1  ;;  %v5044_v26 = vpop.f32.mrb[210].mxu0 }
0x2dfc   :  { %v5088_v27 = vpop.f32.mrb[210].mxu1  ;;  %v7345_v6 = vpop.f32.mrb[211].mxu0 }
0x2dfd   :  { %v7355_v7 = vpop.f32.mrb[211].mxu1 }
0x2e04   :  { %v7552_v11 = vpop.eup %7551 }
0x2e05   :  { %v7554_v12 = vpop.eup %7553  ;;  %v5093_v13 = vpack.c.bf16 %v7552_v11, %v7552_v11 }
0x2e06   :  { %v5137_v14 = vpack.c.bf16 %v7554_v12, %v7554_v12 }
0x2e07   :  { %7367 = vmatmul.mubr.msk.bf16.vlgmr.msra.gmra.mrb[212].mxu0 %vm193_vm3, %v5093_v13 }
0x2e08   :  { %7381 = vmatmul.mubr.msk.bf16.vlgmr.msra.gmra.mrb[212].mxu1 %vm193_vm3, %v5137_v14  ;;  %7385 = vmatpush3.bf16.msra.mxu0 %v8991_v19 }
0x2e09   :  { %7395 = vmatpush3.bf16.msra.mxu1 %v8991_v19  ;;  %7386 = vmatprep.subr.bf16.mxu0 %v7592_v1  ;;  %v5181_v19 = vstv %s9274_s22 }
0x2e0a   :  { %7396 = vmatprep.subr.bf16.mxu1 %v7592_v1  ;;  %7390 = vmatprep.mubr.msk.bf16.mxu0 %vm7594_vm1, %v7592_v1 }
0x2e0b   :  { %7400 = vmatprep.mubr.msk.bf16.mxu1 %vm7594_vm1, %v7592_v1 }
0x2e0c   :  { %7387 = vmatpush3.bf16.msra.mxu0 %v9004_v59 }
0x2e0d   :  { %7397 = vmatpush3.bf16.msra.mxu1 %v9004_v59  ;;  %7388 = vmatprep.subr.bf16.mxu0 %v7592_v1 }
0x2e0e   :  { %7398 = vmatprep.subr.bf16.mxu1 %v7592_v1 }
0x2e10   :  { %7389 = vmatpush3.bf16.msra.mxu0 %v7661_v8 }
0x2e11   :  { %7399 = vmatpush3.bf16.msra.mxu1 %v7661_v8  ;;  %7404 = vmatprep.subr.bf16.mxu0 %v7592_v1 }
0x2e12   :  { %7418 = vmatprep.subr.bf16.mxu1 %v7592_v1 }
0x2eda   :  { %v5131_v34 = vpop.f32.mrb[212].mxu0 }
0x2edb   :  { %v5182_v35 = vmul.f32 %v5181_v19, %v5131_v34  ;;  %v5367_v36 = vmul.f32 2.0, %v5131_v34  ;;  %v5175_v37 = vpop.f32.mrb[212].mxu1  ;;  %v7368_v40 = vpop.f32.mrb[213].mxu0 }
0x2edc   :  { %v5184_v41 = vmul.f32 %v5181_v19, %v5175_v37  ;;  %v5375_v59 = vmul.f32 2.0, %v5175_v37  ;;  %v7382_v44 = vpop.f32.mrb[213].mxu1  ;;  %v5134_v45 = vpop.f32.mrb[214].mxu0 }
0x2edd   :  { %v5183_v30 = vadd.f32 %v5182_v35, %v9208_v10  ;;  %v5178_v28 = vpop.f32.mrb[214].mxu1  ;;  %v7369_v31 = vpop.f32.mrb[215].mxu0  ;;  %v5368_v8 = vadd.f32 %v5367_v36, %v9337_v17 }
0x2ede   :  { %v5185_v50 = vadd.f32 %v5184_v41, %v9211_v15  ;;  %v7383_v51 = vpop.f32.mrb[215].mxu1  ;;  %v5376_v52 = vadd.f32 %v5375_v59, %v9341_v18 }
0x2edf   :  { %v5186_v29 = vpack.c.bf16 %v5183_v30, %v5183_v30 }
0x2ee0   :  { %v5230_v55 = vpack.c.bf16 %v5185_v50, %v5185_v50 }
0x2ee1   :  { %7391 = vmatmul.mubr.msk.bf16.vlgmr.msra.gmra.mrb[216].mxu0 %vm69_vm2, %v5186_v29 }
0x2ee2   :  { %7401 = vmatmul.mubr.msk.bf16.vlgmr.msra.gmra.mrb[216].mxu1 %vm69_vm2, %v5230_v55  ;;  %7405 = vmatpush3.bf16.msra.mxu0 %v9038_v32 }
0x2ee3   :  { %7419 = vmatpush3.bf16.msra.mxu1 %v9038_v32  ;;  %7406 = vmatprep.subr.bf16.mxu0 %v7592_v1 }
0x2ee4   :  { %7420 = vmatprep.subr.bf16.mxu1 %v7592_v1  ;;  %7414 = vmatprep.mubr.msk.bf16.mxu0 %vm7594_vm1, %v7592_v1 }
0x2ee5   :  { %7428 = vmatprep.mubr.msk.bf16.mxu1 %vm7594_vm1, %v7592_v1 }
0x2ee6   :  { %7407 = vmatpush3.bf16.msra.mxu0 %v9051_v24 }
0x2ee7   :  { %7421 = vmatpush3.bf16.msra.mxu1 %v9051_v24  ;;  %7408 = vmatprep.subr.bf16.mxu0 %v7592_v1 }
0x2ee8   :  { %7422 = vmatprep.subr.bf16.mxu1 %v7592_v1 }
0x2eea   :  { %7409 = vmatpush3.bf16.msra.mxu0 %v9060_v25 }
0x2eeb   :  { %7423 = vmatpush3.bf16.msra.mxu1 %v9060_v25  ;;  %7410 = vmatprep.subr.bf16.mxu0 %v7592_v1 }
0x2eec   :  { %7424 = vmatprep.subr.bf16.mxu1 %v7592_v1 }
0x2eee   :  { %7411 = vmatpush3.bf16.msra.mxu0 %v9069_v33 }
0x2eef   :  { %7425 = vmatpush3.bf16.msra.mxu1 %v9069_v33  ;;  %7412 = vmatprep.subr.bf16.mxu0 %v7592_v1 }
0x2ef0   :  { %7426 = vmatprep.subr.bf16.mxu1 %v7592_v1 }
0x2ef2   :  { %7413 = vmatpush3.bf16.msra.mxu0 %v7718_v16 }
0x2ef3   :  { %7427 = vmatpush3.bf16.msra.mxu1 %v7718_v16  ;;  %v5370_v16 = vstv %s5364_s25 }
0x2fb4   :  { %v5224_v32 = vpop.f32.mrb[216].mxu0 }
0x2fb5   :  { %7555 = vtanh.f32 %v5224_v32  ;;  %v5268_v24 = vpop.f32.mrb[216].mxu1  ;;  %v7392_v25 = vpop.f32.mrb[217].mxu0 }
0x2fb6   :  { %7557 = vtanh.f32 %v5268_v24  ;;  %v7402_v42 = vpop.f32.mrb[217].mxu1  ;;  %v5227_v43 = vpop.f32.mrb[218].mxu0 }
0x2fb7   :  { %v5271_v56 = vpop.f32.mrb[218].mxu1  ;;  %v7393_v57 = vpop.f32.mrb[219].mxu0 }
0x2fb8   :  { %v7403_v38 = vpop.f32.mrb[219].mxu1 }
0x2fbf   :  { %v7556_v33 = vpop.eup %7555 }
0x2fc0   :  { %v7558_v39 = vpop.eup %7557  ;;  %v5276_v3 = vpack.c.bf16 %v7556_v33, %v7556_v33 }
0x2fc1   :  { %v5320_v4 = vpack.c.bf16 %v7558_v39, %v7558_v39 }
0x2fc2   :  { %7415 = vmatmul.mubr.msk.bf16.vlgmr.msra.gmra.mrb[220].mxu0 %vm193_vm3, %v5276_v3 }
0x2fc3   :  { %7429 = vmatmul.mubr.msk.bf16.vlgmr.msra.gmra.mrb[220].mxu1 %vm193_vm3, %v5320_v4 }
0x3095   :  { %v5314_v1 = vpop.f32.mrb[220].mxu0 }
0x3096   :  { %v5369_v46 = vadd.f32 %v5368_v8, %v5314_v1  ;;  %v5358_v47 = vpop.f32.mrb[220].mxu1  ;;  %v7416_v48 = vpop.f32.mrb[221].mxu0 }
0x3097   :  { %v5377_v49 = vadd.f32 %v5376_v52, %v5358_v47  ;;  %v7430_v53 = vpop.f32.mrb[221].mxu1  ;;  %v5317_v54 = vpop.f32.mrb[222].mxu0 }
0x3098   :  { %v5371_v5 = vmul.f32 %v5370_v16, %v5369_v46  ;;  %v5361_v0 = vpop.f32.mrb[222].mxu1  ;;  %v7417_v9 = vpop.f32.mrb[223].mxu0 }
0x3099   :  { %v5378_v17 = vmul.f32 %v5377_v49, %v5370_v16  ;;  %v7431_v2 = vpop.f32.mrb[223].mxu1 }
0x309a   :  { %v5372_v58 = vadd.f32 %v5371_v5, %v9208_v10 }
0x309b   :  { %v5379_v63 = vadd.f32 %v5378_v17, %v9211_v15 }
0x309c   :  { %5381 = vrot.lane.b32.xlu0 %v5372_v58, %s7597_s23 }
0x309d   :  { %5386 = vrot.lane.b32.xlu1 %v5379_v63, %s7597_s23 }
0x310e   :  { %v5382_v18 = vpop.permute.xlu0 %5381 }
0x310f   :  { %v5387_v60 = vpop.permute.xlu1 %5386  ;;  %5384 = vst.msk [vmem:[%s9435_s4 + $0x8] sm:$0xff] %vm2367_vm7, %v5382_v18 }
0x3110   :  { %5389 = vst.msk [vmem:[%s9435_s4 + $0x18] sm:$0xff] %vm2367_vm7, %v5387_v60 }
0x3111   :  { %5394 = vsyncpa [#allocation3], 1 }

</bundles_post_ra>
